<compile_context>
chip_gen: v7x
topology: tpu7x:2x2x1
jax: 0.10.0
libtpu: 0.0.40
codegen_flags: <defaults>
</compile_context>

<pallas_src>
import functools
import math

import jax
import jax.numpy as jnp
import numpy as np
from jax.experimental import pallas as pl
from jax.experimental.pallas import tpu as pltpu

_EPS = 1e-5
# MXU input precision knob.  bf16 is the MXU's native fast path (accumulation
# stays f32).  Flip to jnp.float32 for ~1e-3 agreement with the reference
# (approx-reciprocal softmax only); bf16 widens the error to a few e-2.
_MXU_DTYPE = jnp.bfloat16


def _round_up(x, m):
    return ((x + m - 1) // m) * m


def _triaan_kernel(src_ref, trg_ref, means_ref, stds_ref,
                   qk_ref, wv_ref, c1_ref, c2_ref, vec_ref,
                   out_ref, *, c_real):
    f32 = jnp.float32
    cdt = qk_ref.dtype                      # MXU input dtype (bf16)
    Bb, Ts, Cp = src_ref.shape
    Tt = trg_ref.shape[1]
    BT = Bb * Ts

    src = src_ref[...]                      # (Bb, Ts, Cp) f32
    trg = trg_ref[...]                      # (Bb, Tt, Cp) f32

    # lane mask selecting the real (unpadded) channels
    ch_mask = (jax.lax.broadcasted_iota(jnp.int32, (1, 1, Cp), 2)
               < c_real).astype(f32)

    def inorm(x):
        # InstanceNorm: per-channel over time (unbiased var).  Padded lanes
        # are all-zero inputs -> they stay exactly zero.
        n = x.shape[1]
        mu = jnp.sum(x, axis=1, keepdims=True) * (1.0 / n)
        d = x - mu
        var = jnp.sum(d * d, axis=1, keepdims=True) * (1.0 / (n - 1))
        return d * jax.lax.rsqrt(var + _EPS)

    def tinorm(x):
        # TimeInstanceNorm: per-time-step over the *real* channels only.
        mu = jnp.sum(x, axis=2, keepdims=True) * (1.0 / c_real)
        d = (x - mu) * ch_mask
        var = jnp.sum(d * d, axis=2, keepdims=True) * (1.0 / (c_real - 1))
        return d * jax.lax.rsqrt(var + _EPS)

    src_in, trg_in = inorm(src), inorm(trg)
    src_tin, trg_tin = tinorm(src), tinorm(trg)

    # value projections for TAN / CAN (stacked weight, static ref slices)
    trg_m = trg.reshape(Bb * Tt, Cp).astype(cdt)
    v_tan = jnp.dot(trg_m, wv_ref[:, 0:Cp],
                    preferred_element_type=f32).reshape(Bb, Tt, Cp)
    v_can = jnp.dot(trg_m, wv_ref[:, Cp:2 * Cp],
                    preferred_element_type=f32).reshape(Bb, Tt, Cp)

    def softmax(z, axis):
        m = jnp.max(z, axis=axis, keepdims=True)
        p = jnp.exp(z - m)
        return p * pl.reciprocal(jnp.sum(p, axis=axis, keepdims=True),
                                 approx=True)

    def adaptive(src_qn, trg_kn, wq, wk, v):
        # TAN / CAN shared attention-normalization math.  1/sqrt(C) is folded
        # into wq on the host.
        q = jnp.dot(src_qn.reshape(BT, Cp).astype(cdt), wq,
                    preferred_element_type=f32).reshape(Bb, Ts, Cp)
        k = jnp.dot(trg_kn.reshape(Bb * Tt, Cp).astype(cdt), wk,
                    preferred_element_type=f32).reshape(Bb, Tt, Cp)
        attn = softmax(jnp.einsum('bqc,bkc->bqk', q.astype(cdt), k.astype(cdt),
                                  preferred_element_type=f32), axis=-1)
        # fused attn @ [v | v*v]: one MXU pass gives both E[v] and E[v^2]
        vcat = jnp.concatenate([v.astype(cdt), (v * v).astype(cdt)], axis=-1)
        me = jnp.einsum('bqk,bkc->bqc', attn.astype(cdt), vcat,
                        preferred_element_type=f32)            # (Bb, Ts, 2Cp)
        mean, e2 = me[:, :, 0:Cp], me[:, :, Cp:2 * Cp]
        var = jnp.maximum(e2 - mean * mean, 0.0)
        mean_c = jnp.mean(mean, axis=1, keepdims=True)         # (Bb, 1, Cp)
        std_c = jnp.sqrt(jnp.mean(var, axis=1, keepdims=True)) # (Bb, 1, Cp)
        return std_c * src_in + mean_c                         # (Bb, Ts, Cp)

    src1 = adaptive(src_tin, trg_tin, qk_ref[0], qk_ref[1], v_tan)   # TAN
    src2 = adaptive(src_in, trg_in, qk_ref[2], qk_ref[3], v_can)     # CAN

    vec = vec_ref[...]                                         # (5, Cp) f32
    b1, bn_scale, bn_shift = vec[0:1], vec[1:2], vec[2:3]

    # conv1: 1x1 conv over cat([src1, src2], channel) -> two accumulated dots
    y = (jnp.dot(src1.reshape(BT, Cp).astype(cdt), c1_ref[0:Cp, :],
                 preferred_element_type=f32)
         + jnp.dot(src2.reshape(BT, Cp).astype(cdt), c1_ref[Cp:2 * Cp, :],
                   preferred_element_type=f32)
         + b1)                                                 # (BT, Cp) f32

    # conv2: kernel_size=3, padding=1, bias=False.  Time shifts via XLU
    # sublane rotations across the flattened (batch*time) axis; the rows that
    # would leak across an utterance boundary are re-zeroed.
    t_idx = jax.lax.broadcasted_iota(jnp.int32, (BT, 1), 0) % Ts
    y_prev = jnp.where(t_idx == 0, 0.0, pltpu.roll(y, 1, axis=0))
    y_next = jnp.where(t_idx == Ts - 1, 0.0, pltpu.roll(y, BT - 1, axis=0))
    z = (jnp.dot(y_prev.astype(cdt), c2_ref[0:Cp, :],
                 preferred_element_type=f32)
         + jnp.dot(y.astype(cdt), c2_ref[Cp:2 * Cp, :],
                   preferred_element_type=f32)
         + jnp.dot(y_next.astype(cdt), c2_ref[2 * Cp:3 * Cp, :],
                   preferred_element_type=f32))
    # folded eval-mode BatchNorm1d + ReLU
    z = jnp.maximum(z * bn_scale + bn_shift, 0.0).reshape(Bb, Ts, Cp)

    # GLAN: self-attention pooling over means / stds, then affine on inorm(z)
    def sap(x, w):
        logits = jnp.sum(x * w.reshape(1, 1, Cp), axis=-1, keepdims=True)
        a = softmax(logits, axis=1)
        return jnp.sum(x * a, axis=1, keepdims=True)           # (Bb, 1, Cp)

    g_mean = sap(means_ref[...], vec[3:4])
    g_std = sap(stds_ref[...], vec[4:5])

    out_ref[...] = inorm(z) * g_std + g_mean


def _vmem_plan(B, Ts, Tt, N, Cp):
    """VMEM-aware batch tile (Bb) and explicit scoped-VMEM limit."""
    try:
        cap = int(pltpu.get_tpu_info().vmem_capacity_bytes)
    except Exception:                       # query unavailable -> assume v7x (64 MiB)
        cap = 64 << 20
    budget = min(int(cap * 0.75), 48 << 20)

    # single-buffered bf16 weights (11*Cp^2) + f32 vector params
    w_bytes = 2 * 11 * Cp * Cp + 4 * 5 * Cp

    def est(bb):
        io = 4 * 2 * bb * Cp * (2 * Ts + Tt + 2 * N)   # double-buffered I/O blocks (f32)
        tmp = 4 * bb * (12 * max(Ts, Tt) * Cp          # live (bb,T,Cp) f32 temporaries
                        + 2 * Ts * Tt                  # attention matrices
                        + 2 * Tt * Cp)                 # [v | v*v] (bf16)
        return io + w_bytes + tmp

    bb = 1
    for b in (8, 4, 2, 1):
        if B % b:
            continue
        if B >= 2 and B // b < 2:
            continue     # keep >=2 grid steps so both v7x TensorCores get work
        if est(b) <= budget:
            bb = b
            break
    vmem_limit = int(min(cap - (2 << 20), max(2 * est(bb), 32 << 20)))
    return bb, vmem_limit


def triaan_block(src, trg, means, stds, kparams):
    """src, trg: (B, C, T) f32; means, stds: (B, N, C).  Returns (B, C, Ts)."""
    B, C, Ts = src.shape
    Tt = trg.shape[2]
    N = means.shape[1]
    Cp = kparams["vec"].shape[-1]
    pad_c = Cp - C
    assert Ts > 1 and Tt > 1 and C > 1, "unbiased-variance norms need >=2 samples"

    # (B, C, T) -> (B, T, Cp): channels on lanes, zero-padded lane-dense.
    # TODO(synk): fuse these transposes/pads into neighbouring ops / in-kernel
    # pltpu.einshape to avoid the extra HBM round trip.
    src_p = jnp.pad(jnp.transpose(src, (0, 2, 1)).astype(jnp.float32),
                    ((0, 0), (0, 0), (0, pad_c)))
    trg_p = jnp.pad(jnp.transpose(trg, (0, 2, 1)).astype(jnp.float32),
                    ((0, 0), (0, 0), (0, pad_c)))
    means_p = jnp.pad(means.astype(jnp.float32), ((0, 0), (0, 0), (0, pad_c)))
    stds_p = jnp.pad(stds.astype(jnp.float32), ((0, 0), (0, 0), (0, pad_c)))

    Bb, vmem_limit = _vmem_plan(B, Ts, Tt, N, Cp)
    kernel = functools.partial(_triaan_kernel, c_real=C)

    def run(single_buffer_weights):
        def wspec(shape):
            zero = lambda b: (0,) * len(shape)
            if single_buffer_weights and hasattr(pl, "Buffered"):
                # grid-invariant weights: single-buffer them (halves weight VMEM)
                return pl.BlockSpec(shape, zero, pipeline_mode=pl.Buffered(1))
            return pl.BlockSpec(shape, zero)

        return pl.pallas_call(
            kernel,
            out_shape=jax.ShapeDtypeStruct((B, Ts, Cp), jnp.float32),
            grid_spec=pltpu.PrefetchScalarGridSpec(
                num_scalar_prefetch=0,
                grid=(B // Bb,),
                in_specs=[
                    pl.BlockSpec((Bb, Ts, Cp), lambda b: (b, 0, 0)),   # src
                    pl.BlockSpec((Bb, Tt, Cp), lambda b: (b, 0, 0)),   # trg
                    pl.BlockSpec((Bb, N, Cp), lambda b: (b, 0, 0)),    # means
                    pl.BlockSpec((Bb, N, Cp), lambda b: (b, 0, 0)),    # stds
                    wspec((4, Cp, Cp)),      # Wq/Wk (TAN, CAN), 1/sqrt(C) folded
                    wspec((Cp, 2 * Cp)),     # [Wv_tan | Wv_can]
                    wspec((2 * Cp, Cp)),     # conv1 stacked
                    wspec((3 * Cp, Cp)),     # conv2 stacked
                    wspec((5, Cp)),          # b1 / bn_scale / bn_shift / wm / ws
                ],
                out_specs=pl.BlockSpec((Bb, Ts, Cp), lambda b: (b, 0, 0)),
            ),
            compiler_params=pltpu.CompilerParams(
                dimension_semantics=("parallel",),   # batch steps -> v7x megacore
                vmem_limit_bytes=vmem_limit),
        )(src_p, trg_p, means_p, stds_p,
          kparams["qk_w"], kparams["wv_w"], kparams["conv1_w"],
          kparams["conv2_w"], kparams["vec"])

    try:
        out_p = jax.block_until_ready(run(True))
    except Exception:   # Pallas without BlockSpec pipeline_mode -> double-buffer
        out_p = run(False)

    return jnp.transpose(out_p[:, :, :C], (0, 2, 1))


def make_params(key, C):
    """Logical (unpadded) synthetic parameters, (C_in, C_out) orientation."""
    ks = jax.random.split(key, 10)
    s = 1.0 / math.sqrt(C)
    attn_w = jax.random.normal(ks[0], (6, C, C), jnp.float32) * s
    conv1_w = jax.random.normal(ks[1], (2, C, C), jnp.float32) * (1.0 / math.sqrt(2 * C))
    conv2_w = jax.random.normal(ks[2], (3, C, C), jnp.float32) * (1.0 / math.sqrt(3 * C))
    b1 = jax.random.normal(ks[3], (C,), jnp.float32) * 0.1
    gamma = 1.0 + 0.1 * jax.random.normal(ks[4], (C,), jnp.float32)
    beta = 0.1 * jax.random.normal(ks[5], (C,), jnp.float32)
    rmean = 0.1 * jax.random.normal(ks[6], (C,), jnp.float32)
    rvar = 1.0 + 0.1 * jnp.abs(jax.random.normal(ks[7], (C,), jnp.float32))
    wm = jax.random.normal(ks[8], (C,), jnp.float32) * s
    ws = jax.random.normal(ks[9], (C,), jnp.float32) * s
    return dict(attn_w=attn_w, conv1_w=conv1_w, conv2_w=conv2_w, b1=b1,
                gamma=gamma, beta=beta, rmean=rmean, rvar=rvar, wm=wm, ws=ws)


def prepare_params(p):
    """One-time host-side prep: fold 1/sqrt(C) into Wq, fold eval BatchNorm,
    pad channels to a lane-dense width, stack the conv / value-projection
    weights for fused matmuls, and pre-cast the MXU weights to bf16."""
    C = p["b1"].shape[0]
    Cp = _round_up(C, 128)
    inv_temp = 1.0 / math.sqrt(C)

    def pad2(w):
        return jnp.pad(w, ((0, Cp - C), (0, Cp - C)))

    def pad1(v):
        return jnp.pad(v, ((0, Cp - C),))

    aw = p["attn_w"]
    qk_w = jnp.stack([pad2(aw[0] * inv_temp), pad2(aw[1]),
                      pad2(aw[3] * inv_temp), pad2(aw[4])])                    # (4,Cp,Cp)
    wv_w = jnp.concatenate([pad2(aw[2]), pad2(aw[5])], axis=1)                 # (Cp,2Cp)
    conv1_w = jnp.concatenate([pad2(p["conv1_w"][0]), pad2(p["conv1_w"][1])],
                              axis=0)                                          # (2Cp,Cp)
    conv2_w = jnp.concatenate([pad2(p["conv2_w"][k]) for k in range(3)],
                              axis=0)                                          # (3Cp,Cp)
    bn_scale = p["gamma"] * jax.lax.rsqrt(p["rvar"] + _EPS)
    bn_shift = p["beta"] - p["rmean"] * bn_scale
    vec = jnp.stack([pad1(p["b1"]), pad1(bn_scale), pad1(bn_shift),
                     pad1(p["wm"]), pad1(p["ws"])], axis=0)                    # (5,Cp) f32
    return {"qk_w": qk_w.astype(_MXU_DTYPE), "wv_w": wv_w.astype(_MXU_DTYPE),
            "conv1_w": conv1_w.astype(_MXU_DTYPE),
            "conv2_w": conv2_w.astype(_MXU_DTYPE), "vec": vec}


def reference(src, trg, means, stds, p):
    """Pure-JAX f32 reference in PyTorch (B, C, T) layout for validation."""
    C = src.shape[1]
    temp = math.sqrt(float(C))

    def inorm(x):
        mu = jnp.mean(x, axis=-1, keepdims=True)
        var = jnp.sum((x - mu) ** 2, axis=-1, keepdims=True) / (x.shape[-1] - 1)
        return (x - mu) / jnp.sqrt(var + _EPS)

    def tinorm(x):
        mu = jnp.mean(x, axis=1, keepdims=True)
        var = jnp.sum((x - mu) ** 2, axis=1, keepdims=True) / (x.shape[1] - 1)
        return (x - mu) / jnp.sqrt(var + _EPS)

    def adaptive(norm_qk, wq, wk, wv):
        q = jnp.einsum('bct,cd->btd', norm_qk(src), wq)
        k = jnp.einsum('bct,cd->btd', norm_qk(trg), wk)
        v = jnp.einsum('bct,cd->btd', trg, wv)
        a = jax.nn.softmax(jnp.einsum('btd,bsd->bts', q / temp, k), axis=-1)
        mean = jnp.einsum('bts,bsd->btd', a, v)
        var = jax.nn.relu(jnp.einsum('bts,bsd->btd', a, v * v) - mean ** 2)
        mean_c = jnp.mean(mean, axis=1)[:, :, None]
        std_c = jnp.sqrt(jnp.mean(var, axis=1))[:, :, None]
        return std_c * inorm(src) + mean_c

    aw = p["attn_w"]
    src1 = adaptive(tinorm, aw[0], aw[1], aw[2])
    src2 = adaptive(inorm, aw[3], aw[4], aw[5])

    y = (jnp.einsum('bct,cd->bdt', src1, p["conv1_w"][0])
         + jnp.einsum('bct,cd->bdt', src2, p["conv1_w"][1])
         + p["b1"][None, :, None])

    T = y.shape[-1]
    yp = jnp.pad(y, ((0, 0), (0, 0), (1, 1)))
    z = (jnp.einsum('bct,cd->bdt', yp[:, :, 0:T], p["conv2_w"][0])
         + jnp.einsum('bct,cd->bdt', yp[:, :, 1:T + 1], p["conv2_w"][1])
         + jnp.einsum('bct,cd->bdt', yp[:, :, 2:T + 2], p["conv2_w"][2]))
    z = ((z - p["rmean"][None, :, None])
         / jnp.sqrt(p["rvar"][None, :, None] + _EPS)
         * p["gamma"][None, :, None] + p["beta"][None, :, None])
    z = jax.nn.relu(z)

    def sap(x, w):
        a = jax.nn.softmax(jnp.einsum('bnc,c->bn', x, w), axis=-1)
        return jnp.einsum('bnc,bn->bc', x, a)

    g_mean = sap(means, p["wm"])[:, :, None]
    g_std = sap(stds, p["ws"])[:, :, None]
    return inorm(z) * g_std + g_mean


if __name__ == "__main__":
    B, C, Ts, Tt, N = 2, 32, 16, 16, 8
    key = jax.random.PRNGKey(0)
    k_src, k_trg, k_mean, k_std, k_par = jax.random.split(key, 5)

    src = jax.random.normal(k_src, (B, C, Ts), jnp.float32)
    trg = jax.random.normal(k_trg, (B, C, Tt), jnp.float32)
    means = jax.random.normal(k_mean, (B, N, C), jnp.float32)
    stds = jnp.abs(jax.random.normal(k_std, (B, N, C), jnp.float32)) + 0.5
    params = make_params(k_par, C)
    kparams = prepare_params(params)   # one-time host-side weight prep

    out = jax.block_until_ready(triaan_block(src, trg, means, stds, kparams))
    ref = jax.block_until_ready(reference(src, trg, means, stds, params))

    # Accuracy/perf knob: bf16 MXU inputs + pl.reciprocal(approx=True) softmax
    # denominators give a few-percent end-to-end deviation vs. the exact f32
    # reference (set _MXU_DTYPE = jnp.float32 for ~1e-3 agreement).
    np.testing.assert_allclose(np.asarray(out), np.asarray(ref),
                               rtol=5e-2, atol=5e-2)

    print("KERNEL_OK")
</pallas_src>

<mosaic_0001>
module attributes {stable_mosaic.version = 11 : i64} {
  func.func @_triaan_kernel(%arg0: i32, %arg1: memref<1x16x128xf32, #tpu.memory_space<vmem>>, %arg2: memref<1x16x128xf32, #tpu.memory_space<vmem>>, %arg3: memref<1x8x128xf32, #tpu.memory_space<vmem>>, %arg4: memref<1x8x128xf32, #tpu.memory_space<vmem>>, %arg5: memref<4x128x128xbf16, #tpu.memory_space<vmem>>, %arg6: memref<128x256xbf16, #tpu.memory_space<vmem>>, %arg7: memref<256x128xbf16, #tpu.memory_space<vmem>>, %arg8: memref<384x128xbf16, #tpu.memory_space<vmem>>, %arg9: memref<5x128xf32, #tpu.memory_space<vmem>>, %arg10: memref<1x16x128xf32, #tpu.memory_space<vmem>>) attributes {dimension_semantics = [#tpu.dimension_semantics<parallel>], iteration_bounds = array<i64: 2>, scalar_prefetch = 0 : i64, scratch_operands = 0 : i64, tpu.core_type = #tpu.core_type<tc>, window_params = [{transform_indices = @transform_0, window_bounds = array<i64: 1, 16, 128>}, {transform_indices = @transform_1, window_bounds = array<i64: 1, 16, 128>}, {transform_indices = @transform_2, window_bounds = array<i64: 1, 8, 128>}, {transform_indices = @transform_3, window_bounds = array<i64: 1, 8, 128>}, {pipeline_mode = #tpu.pipeline_mode<synchronous>, transform_indices = @transform_4, window_bounds = array<i64: 4, 128, 128>}, {pipeline_mode = #tpu.pipeline_mode<synchronous>, transform_indices = @transform_5, window_bounds = array<i64: 128, 256>}, {pipeline_mode = #tpu.pipeline_mode<synchronous>, transform_indices = @transform_6, window_bounds = array<i64: 256, 128>}, {pipeline_mode = #tpu.pipeline_mode<synchronous>, transform_indices = @transform_7, window_bounds = array<i64: 384, 128>}, {pipeline_mode = #tpu.pipeline_mode<synchronous>, transform_indices = @transform_8, window_bounds = array<i64: 5, 128>}, {transform_indices = @transform_9, window_bounds = array<i64: 1, 16, 128>}]} {
    %c0 = arith.constant 0 : index
    %c0_0 = arith.constant 0 : index
    %c0_1 = arith.constant 0 : index
    %0 = vector.load %arg1[%c0, %c0_0, %c0_1] : memref<1x16x128xf32, #tpu.memory_space<vmem>>, vector<1x16x128xf32>
    %c0_2 = arith.constant 0 : index
    %c0_3 = arith.constant 0 : index
    %c0_4 = arith.constant 0 : index
    %1 = vector.load %arg2[%c0_2, %c0_3, %c0_4] : memref<1x16x128xf32, #tpu.memory_space<vmem>>, vector<1x16x128xf32>
    %2 = tpu.iota {dimensions = array<i32: 2>} : vector<1x1x128xi32>
    %c32_i32 = arith.constant 32 : i32
    %3 = vector.broadcast %c32_i32 : i32 to vector<1x1x128xi32>
    %4 = arith.cmpi slt, %2, %3 : vector<1x1x128xi32>
    %5 = arith.extui %4 : vector<1x1x128xi1> to vector<1x1x128xi32>
    %6 = arith.sitofp %5 : vector<1x1x128xi32> to vector<1x1x128xf32>
    %cst = arith.constant dense<0.000000e+00> : vector<1x128xf32>
    %7 = vector.multi_reduction <add>, %0, %cst [1] : vector<1x16x128xf32> to vector<1x128xf32>
    %8 = vector.shape_cast %7 : vector<1x128xf32> to vector<1x1x128xf32>
    %cst_5 = arith.constant 6.250000e-02 : f32
    %9 = vector.broadcast %cst_5 : f32 to vector<1x1x128xf32>
    %10 = arith.mulf %8, %9 : vector<1x1x128xf32>
    %11 = vector.broadcast %10 : vector<1x1x128xf32> to vector<1x16x128xf32>
    %12 = arith.subf %0, %11 : vector<1x16x128xf32>
    %13 = arith.mulf %12, %12 : vector<1x16x128xf32>
    %cst_6 = arith.constant dense<0.000000e+00> : vector<1x128xf32>
    %14 = vector.multi_reduction <add>, %13, %cst_6 [1] : vector<1x16x128xf32> to vector<1x128xf32>
    %15 = vector.shape_cast %14 : vector<1x128xf32> to vector<1x1x128xf32>
    %cst_7 = arith.constant 0.0666666701 : f32
    %16 = vector.broadcast %cst_7 : f32 to vector<1x1x128xf32>
    %17 = arith.mulf %15, %16 : vector<1x1x128xf32>
    %cst_8 = arith.constant 9.99999974E-6 : f32
    %18 = vector.broadcast %cst_8 : f32 to vector<1x1x128xf32>
    %19 = arith.addf %17, %18 : vector<1x1x128xf32>
    %20 = math.rsqrt %19 : vector<1x1x128xf32>
    %21 = vector.broadcast %20 : vector<1x1x128xf32> to vector<1x16x128xf32>
    %22 = arith.mulf %12, %21 : vector<1x16x128xf32>
    %cst_9 = arith.constant dense<0.000000e+00> : vector<1x128xf32>
    %23 = vector.multi_reduction <add>, %1, %cst_9 [1] : vector<1x16x128xf32> to vector<1x128xf32>
    %24 = vector.shape_cast %23 : vector<1x128xf32> to vector<1x1x128xf32>
    %cst_10 = arith.constant 6.250000e-02 : f32
    %25 = vector.broadcast %cst_10 : f32 to vector<1x1x128xf32>
    %26 = arith.mulf %24, %25 : vector<1x1x128xf32>
    %27 = vector.broadcast %26 : vector<1x1x128xf32> to vector<1x16x128xf32>
    %28 = arith.subf %1, %27 : vector<1x16x128xf32>
    %29 = arith.mulf %28, %28 : vector<1x16x128xf32>
    %cst_11 = arith.constant dense<0.000000e+00> : vector<1x128xf32>
    %30 = vector.multi_reduction <add>, %29, %cst_11 [1] : vector<1x16x128xf32> to vector<1x128xf32>
    %31 = vector.shape_cast %30 : vector<1x128xf32> to vector<1x1x128xf32>
    %cst_12 = arith.constant 0.0666666701 : f32
    %32 = vector.broadcast %cst_12 : f32 to vector<1x1x128xf32>
    %33 = arith.mulf %31, %32 : vector<1x1x128xf32>
    %cst_13 = arith.constant 9.99999974E-6 : f32
    %34 = vector.broadcast %cst_13 : f32 to vector<1x1x128xf32>
    %35 = arith.addf %33, %34 : vector<1x1x128xf32>
    %36 = math.rsqrt %35 : vector<1x1x128xf32>
    %37 = vector.broadcast %36 : vector<1x1x128xf32> to vector<1x16x128xf32>
    %38 = arith.mulf %28, %37 : vector<1x16x128xf32>
    %cst_14 = arith.constant dense<0.000000e+00> : vector<1x16xf32>
    %39 = vector.multi_reduction <add>, %0, %cst_14 [2] : vector<1x16x128xf32> to vector<1x16xf32>
    %40 = vector.shape_cast %39 : vector<1x16xf32> to vector<1x16x1xf32>
    %cst_15 = arith.constant 3.125000e-02 : f32
    %41 = vector.broadcast %cst_15 : f32 to vector<1x16x1xf32>
    %42 = arith.mulf %40, %41 : vector<1x16x1xf32>
    %43 = vector.broadcast %42 : vector<1x16x1xf32> to vector<1x16x128xf32>
    %44 = arith.subf %0, %43 : vector<1x16x128xf32>
    %45 = vector.broadcast %6 : vector<1x1x128xf32> to vector<1x16x128xf32>
    %46 = arith.mulf %44, %45 : vector<1x16x128xf32>
    %47 = arith.mulf %46, %46 : vector<1x16x128xf32>
    %cst_16 = arith.constant dense<0.000000e+00> : vector<1x16xf32>
    %48 = vector.multi_reduction <add>, %47, %cst_16 [2] : vector<1x16x128xf32> to vector<1x16xf32>
    %49 = vector.shape_cast %48 : vector<1x16xf32> to vector<1x16x1xf32>
    %cst_17 = arith.constant 0.0322580636 : f32
    %50 = vector.broadcast %cst_17 : f32 to vector<1x16x1xf32>
    %51 = arith.mulf %49, %50 : vector<1x16x1xf32>
    %cst_18 = arith.constant 9.99999974E-6 : f32
    %52 = vector.broadcast %cst_18 : f32 to vector<1x16x1xf32>
    %53 = arith.addf %51, %52 : vector<1x16x1xf32>
    %54 = math.rsqrt %53 : vector<1x16x1xf32>
    %55 = vector.broadcast %54 : vector<1x16x1xf32> to vector<1x16x128xf32>
    %56 = arith.mulf %46, %55 : vector<1x16x128xf32>
    %cst_19 = arith.constant dense<0.000000e+00> : vector<1x16xf32>
    %57 = vector.multi_reduction <add>, %1, %cst_19 [2] : vector<1x16x128xf32> to vector<1x16xf32>
    %58 = vector.shape_cast %57 : vector<1x16xf32> to vector<1x16x1xf32>
    %cst_20 = arith.constant 3.125000e-02 : f32
    %59 = vector.broadcast %cst_20 : f32 to vector<1x16x1xf32>
    %60 = arith.mulf %58, %59 : vector<1x16x1xf32>
    %61 = vector.broadcast %60 : vector<1x16x1xf32> to vector<1x16x128xf32>
    %62 = arith.subf %1, %61 : vector<1x16x128xf32>
    %63 = vector.broadcast %6 : vector<1x1x128xf32> to vector<1x16x128xf32>
    %64 = arith.mulf %62, %63 : vector<1x16x128xf32>
    %65 = arith.mulf %64, %64 : vector<1x16x128xf32>
    %cst_21 = arith.constant dense<0.000000e+00> : vector<1x16xf32>
    %66 = vector.multi_reduction <add>, %65, %cst_21 [2] : vector<1x16x128xf32> to vector<1x16xf32>
    %67 = vector.shape_cast %66 : vector<1x16xf32> to vector<1x16x1xf32>
    %cst_22 = arith.constant 0.0322580636 : f32
    %68 = vector.broadcast %cst_22 : f32 to vector<1x16x1xf32>
    %69 = arith.mulf %67, %68 : vector<1x16x1xf32>
    %cst_23 = arith.constant 9.99999974E-6 : f32
    %70 = vector.broadcast %cst_23 : f32 to vector<1x16x1xf32>
    %71 = arith.addf %69, %70 : vector<1x16x1xf32>
    %72 = math.rsqrt %71 : vector<1x16x1xf32>
    %73 = vector.broadcast %72 : vector<1x16x1xf32> to vector<1x16x128xf32>
    %74 = arith.mulf %64, %73 : vector<1x16x128xf32>
    %75 = vector.shape_cast %1 : vector<1x16x128xf32> to vector<16x128xf32>
    %76 = arith.truncf %75 : vector<16x128xf32> to vector<16x128xbf16>
    %c0_24 = arith.constant 0 : index
    %c0_25 = arith.constant 0 : index
    %77 = vector.load %arg6[%c0_24, %c0_25] : memref<128x256xbf16, #tpu.memory_space<vmem>>, vector<128x128xbf16>
    %cst_26 = arith.constant dense<0.000000e+00> : vector<16x128xf32>
    %78 = tpu.matmul %76, %77, %cst_26 {dimension_numbers = #tpu.dot_dimension_numbers<[1], [0], [0], [1], [0, 0, 1, 1], [], []>} : vector<16x128xbf16>, vector<128x128xbf16>, vector<16x128xf32> -> vector<16x128xf32>
    %79 = vector.shape_cast %78 : vector<16x128xf32> to vector<1x16x128xf32>
    %c0_27 = arith.constant 0 : index
    %c128 = arith.constant 128 : index
    %80 = vector.load %arg6[%c0_27, %c128] : memref<128x256xbf16, #tpu.memory_space<vmem>>, vector<128x128xbf16>
    %cst_28 = arith.constant dense<0.000000e+00> : vector<16x128xf32>
    %81 = tpu.matmul %76, %80, %cst_28 {dimension_numbers = #tpu.dot_dimension_numbers<[1], [0], [0], [1], [0, 0, 1, 1], [], []>} : vector<16x128xbf16>, vector<128x128xbf16>, vector<16x128xf32> -> vector<16x128xf32>
    %82 = vector.shape_cast %81 : vector<16x128xf32> to vector<1x16x128xf32>
    %c0_29 = arith.constant 0 : index
    %c0_30 = arith.constant 0 : index
    %c0_31 = arith.constant 0 : index
    %83 = vector.load %arg5[%c0_29, %c0_30, %c0_31] : memref<4x128x128xbf16, #tpu.memory_space<vmem>>, vector<1x128x128xbf16>
    %84 = vector.shape_cast %83 : vector<1x128x128xbf16> to vector<128x128xbf16>
    %c1 = arith.constant 1 : index
    %c0_32 = arith.constant 0 : index
    %c0_33 = arith.constant 0 : index
    %85 = vector.load %arg5[%c1, %c0_32, %c0_33] : memref<4x128x128xbf16, #tpu.memory_space<vmem>>, vector<1x128x128xbf16>
    %86 = vector.shape_cast %85 : vector<1x128x128xbf16> to vector<128x128xbf16>
    %87 = vector.shape_cast %56 : vector<1x16x128xf32> to vector<16x128xf32>
    %88 = arith.truncf %87 : vector<16x128xf32> to vector<16x128xbf16>
    %cst_34 = arith.constant dense<0.000000e+00> : vector<16x128xf32>
    %89 = tpu.matmul %88, %84, %cst_34 {dimension_numbers = #tpu.dot_dimension_numbers<[1], [0], [0], [1], [0, 0, 1, 1], [], []>} : vector<16x128xbf16>, vector<128x128xbf16>, vector<16x128xf32> -> vector<16x128xf32>
    %90 = vector.shape_cast %89 : vector<16x128xf32> to vector<1x16x128xf32>
    %91 = vector.shape_cast %74 : vector<1x16x128xf32> to vector<16x128xf32>
    %92 = arith.truncf %91 : vector<16x128xf32> to vector<16x128xbf16>
    %cst_35 = arith.constant dense<0.000000e+00> : vector<16x128xf32>
    %93 = tpu.matmul %92, %86, %cst_35 {dimension_numbers = #tpu.dot_dimension_numbers<[1], [0], [0], [1], [0, 0, 1, 1], [], []>} : vector<16x128xbf16>, vector<128x128xbf16>, vector<16x128xf32> -> vector<16x128xf32>
    %94 = vector.shape_cast %93 : vector<16x128xf32> to vector<1x16x128xf32>
    %95 = arith.truncf %90 : vector<1x16x128xf32> to vector<1x16x128xbf16>
    %96 = arith.truncf %94 : vector<1x16x128xf32> to vector<1x16x128xbf16>
    "tpu.trace_start"() <{level = 10 : i32, message = "bqc,bkc->bqk"}> : () -> ()
    %cst_36 = arith.constant dense<0.000000e+00> : vector<1x16x16xf32>
    %97 = tpu.matmul %95, %96, %cst_36 {dimension_numbers = #tpu.dot_dimension_numbers<[2], [2], [1], [1], [0, 0, 0, 1, 1, 1], [0], [0]>} : vector<1x16x128xbf16>, vector<1x16x128xbf16>, vector<1x16x16xf32> -> vector<1x16x16xf32>
    "tpu.trace_stop"() : () -> ()
    %cst_37 = arith.constant dense<0xFF800000> : vector<1x16xf32>
    %98 = vector.multi_reduction <maximumf>, %97, %cst_37 [2] : vector<1x16x16xf32> to vector<1x16xf32>
    %99 = vector.shape_cast %98 : vector<1x16xf32> to vector<1x16x1xf32>
    %100 = vector.broadcast %99 : vector<1x16x1xf32> to vector<1x16x16xf32>
    %101 = arith.subf %97, %100 : vector<1x16x16xf32>
    %102 = math.exp %101 : vector<1x16x16xf32>
    %cst_38 = arith.constant dense<0.000000e+00> : vector<1x16xf32>
    %103 = vector.multi_reduction <add>, %102, %cst_38 [2] : vector<1x16x16xf32> to vector<1x16xf32>
    %104 = vector.shape_cast %103 : vector<1x16xf32> to vector<1x16x1xf32>
    %105 = tpu.reciprocal %104 {approx = true} : vector<1x16x1xf32> -> vector<1x16x1xf32>
    %106 = vector.broadcast %105 : vector<1x16x1xf32> to vector<1x16x16xf32>
    %107 = arith.mulf %102, %106 : vector<1x16x16xf32>
    %108 = arith.truncf %79 : vector<1x16x128xf32> to vector<1x16x128xbf16>
    %109 = arith.mulf %79, %79 : vector<1x16x128xf32>
    %110 = arith.truncf %109 : vector<1x16x128xf32> to vector<1x16x128xbf16>
    %111 = tpu.concatenate %108, %110 in 2 : vector<1x16x128xbf16>, vector<1x16x128xbf16> -> vector<1x16x256xbf16>
    %112 = arith.truncf %107 : vector<1x16x16xf32> to vector<1x16x16xbf16>
    "tpu.trace_start"() <{level = 10 : i32, message = "bqk,bkc->bqc"}> : () -> ()
    %cst_39 = arith.constant dense<0.000000e+00> : vector<1x16x256xf32>
    %113 = tpu.matmul %112, %111, %cst_39 {dimension_numbers = #tpu.dot_dimension_numbers<[2], [1], [1], [2], [0, 0, 0, 1, 1, 2], [0], [0]>} : vector<1x16x16xbf16>, vector<1x16x256xbf16>, vector<1x16x256xf32> -> vector<1x16x256xf32>
    "tpu.trace_stop"() : () -> ()
    %114 = vector.extract_strided_slice %113 {offsets = [0, 0, 0], sizes = [1, 16, 128], strides = [1, 1, 1]} : vector<1x16x256xf32> to vector<1x16x128xf32>
    %115 = vector.extract_strided_slice %113 {offsets = [0, 0, 128], sizes = [1, 16, 128], strides = [1, 1, 1]} : vector<1x16x256xf32> to vector<1x16x128xf32>
    %116 = arith.mulf %114, %114 : vector<1x16x128xf32>
    %117 = arith.subf %115, %116 : vector<1x16x128xf32>
    %cst_40 = arith.constant 0.000000e+00 : f32
    %118 = vector.broadcast %cst_40 : f32 to vector<1x16x128xf32>
    %119 = arith.maximumf %117, %118 : vector<1x16x128xf32>
    %cst_41 = arith.constant dense<0.000000e+00> : vector<1x128xf32>
    %120 = vector.multi_reduction <add>, %114, %cst_41 [1] : vector<1x16x128xf32> to vector<1x128xf32>
    %121 = vector.shape_cast %120 : vector<1x128xf32> to vector<1x1x128xf32>
    %cst_42 = arith.constant 1.600000e+01 : f32
    %122 = vector.broadcast %cst_42 : f32 to vector<1x1x128xf32>
    %123 = arith.divf %121, %122 : vector<1x1x128xf32>
    %cst_43 = arith.constant dense<0.000000e+00> : vector<1x128xf32>
    %124 = vector.multi_reduction <add>, %119, %cst_43 [1] : vector<1x16x128xf32> to vector<1x128xf32>
    %125 = vector.shape_cast %124 : vector<1x128xf32> to vector<1x1x128xf32>
    %cst_44 = arith.constant 1.600000e+01 : f32
    %126 = vector.broadcast %cst_44 : f32 to vector<1x1x128xf32>
    %127 = arith.divf %125, %126 : vector<1x1x128xf32>
    %128 = math.sqrt %127 : vector<1x1x128xf32>
    %129 = vector.broadcast %128 : vector<1x1x128xf32> to vector<1x16x128xf32>
    %130 = arith.mulf %129, %22 : vector<1x16x128xf32>
    %131 = vector.broadcast %123 : vector<1x1x128xf32> to vector<1x16x128xf32>
    %132 = arith.addf %130, %131 : vector<1x16x128xf32>
    %c2 = arith.constant 2 : index
    %c0_45 = arith.constant 0 : index
    %c0_46 = arith.constant 0 : index
    %133 = vector.load %arg5[%c2, %c0_45, %c0_46] : memref<4x128x128xbf16, #tpu.memory_space<vmem>>, vector<1x128x128xbf16>
    %134 = vector.shape_cast %133 : vector<1x128x128xbf16> to vector<128x128xbf16>
    %c3 = arith.constant 3 : index
    %c0_47 = arith.constant 0 : index
    %c0_48 = arith.constant 0 : index
    %135 = vector.load %arg5[%c3, %c0_47, %c0_48] : memref<4x128x128xbf16, #tpu.memory_space<vmem>>, vector<1x128x128xbf16>
    %136 = vector.shape_cast %135 : vector<1x128x128xbf16> to vector<128x128xbf16>
    %137 = vector.shape_cast %22 : vector<1x16x128xf32> to vector<16x128xf32>
    %138 = arith.truncf %137 : vector<16x128xf32> to vector<16x128xbf16>
    %cst_49 = arith.constant dense<0.000000e+00> : vector<16x128xf32>
    %139 = tpu.matmul %138, %134, %cst_49 {dimension_numbers = #tpu.dot_dimension_numbers<[1], [0], [0], [1], [0, 0, 1, 1], [], []>} : vector<16x128xbf16>, vector<128x128xbf16>, vector<16x128xf32> -> vector<16x128xf32>
    %140 = vector.shape_cast %139 : vector<16x128xf32> to vector<1x16x128xf32>
    %141 = vector.shape_cast %38 : vector<1x16x128xf32> to vector<16x128xf32>
    %142 = arith.truncf %141 : vector<16x128xf32> to vector<16x128xbf16>
    %cst_50 = arith.constant dense<0.000000e+00> : vector<16x128xf32>
    %143 = tpu.matmul %142, %136, %cst_50 {dimension_numbers = #tpu.dot_dimension_numbers<[1], [0], [0], [1], [0, 0, 1, 1], [], []>} : vector<16x128xbf16>, vector<128x128xbf16>, vector<16x128xf32> -> vector<16x128xf32>
    %144 = vector.shape_cast %143 : vector<16x128xf32> to vector<1x16x128xf32>
    %145 = arith.truncf %140 : vector<1x16x128xf32> to vector<1x16x128xbf16>
    %146 = arith.truncf %144 : vector<1x16x128xf32> to vector<1x16x128xbf16>
    "tpu.trace_start"() <{level = 10 : i32, message = "bqc,bkc->bqk"}> : () -> ()
    %cst_51 = arith.constant dense<0.000000e+00> : vector<1x16x16xf32>
    %147 = tpu.matmul %145, %146, %cst_51 {dimension_numbers = #tpu.dot_dimension_numbers<[2], [2], [1], [1], [0, 0, 0, 1, 1, 1], [0], [0]>} : vector<1x16x128xbf16>, vector<1x16x128xbf16>, vector<1x16x16xf32> -> vector<1x16x16xf32>
    "tpu.trace_stop"() : () -> ()
    %cst_52 = arith.constant dense<0xFF800000> : vector<1x16xf32>
    %148 = vector.multi_reduction <maximumf>, %147, %cst_52 [2] : vector<1x16x16xf32> to vector<1x16xf32>
    %149 = vector.shape_cast %148 : vector<1x16xf32> to vector<1x16x1xf32>
    %150 = vector.broadcast %149 : vector<1x16x1xf32> to vector<1x16x16xf32>
    %151 = arith.subf %147, %150 : vector<1x16x16xf32>
    %152 = math.exp %151 : vector<1x16x16xf32>
    %cst_53 = arith.constant dense<0.000000e+00> : vector<1x16xf32>
    %153 = vector.multi_reduction <add>, %152, %cst_53 [2] : vector<1x16x16xf32> to vector<1x16xf32>
    %154 = vector.shape_cast %153 : vector<1x16xf32> to vector<1x16x1xf32>
    %155 = tpu.reciprocal %154 {approx = true} : vector<1x16x1xf32> -> vector<1x16x1xf32>
    %156 = vector.broadcast %155 : vector<1x16x1xf32> to vector<1x16x16xf32>
    %157 = arith.mulf %152, %156 : vector<1x16x16xf32>
    %158 = arith.truncf %82 : vector<1x16x128xf32> to vector<1x16x128xbf16>
    %159 = arith.mulf %82, %82 : vector<1x16x128xf32>
    %160 = arith.truncf %159 : vector<1x16x128xf32> to vector<1x16x128xbf16>
    %161 = tpu.concatenate %158, %160 in 2 : vector<1x16x128xbf16>, vector<1x16x128xbf16> -> vector<1x16x256xbf16>
    %162 = arith.truncf %157 : vector<1x16x16xf32> to vector<1x16x16xbf16>
    "tpu.trace_start"() <{level = 10 : i32, message = "bqk,bkc->bqc"}> : () -> ()
    %cst_54 = arith.constant dense<0.000000e+00> : vector<1x16x256xf32>
    %163 = tpu.matmul %162, %161, %cst_54 {dimension_numbers = #tpu.dot_dimension_numbers<[2], [1], [1], [2], [0, 0, 0, 1, 1, 2], [0], [0]>} : vector<1x16x16xbf16>, vector<1x16x256xbf16>, vector<1x16x256xf32> -> vector<1x16x256xf32>
    "tpu.trace_stop"() : () -> ()
    %164 = vector.extract_strided_slice %163 {offsets = [0, 0, 0], sizes = [1, 16, 128], strides = [1, 1, 1]} : vector<1x16x256xf32> to vector<1x16x128xf32>
    %165 = vector.extract_strided_slice %163 {offsets = [0, 0, 128], sizes = [1, 16, 128], strides = [1, 1, 1]} : vector<1x16x256xf32> to vector<1x16x128xf32>
    %166 = arith.mulf %164, %164 : vector<1x16x128xf32>
    %167 = arith.subf %165, %166 : vector<1x16x128xf32>
    %cst_55 = arith.constant 0.000000e+00 : f32
    %168 = vector.broadcast %cst_55 : f32 to vector<1x16x128xf32>
    %169 = arith.maximumf %167, %168 : vector<1x16x128xf32>
    %cst_56 = arith.constant dense<0.000000e+00> : vector<1x128xf32>
    %170 = vector.multi_reduction <add>, %164, %cst_56 [1] : vector<1x16x128xf32> to vector<1x128xf32>
    %171 = vector.shape_cast %170 : vector<1x128xf32> to vector<1x1x128xf32>
    %cst_57 = arith.constant 1.600000e+01 : f32
    %172 = vector.broadcast %cst_57 : f32 to vector<1x1x128xf32>
    %173 = arith.divf %171, %172 : vector<1x1x128xf32>
    %cst_58 = arith.constant dense<0.000000e+00> : vector<1x128xf32>
    %174 = vector.multi_reduction <add>, %169, %cst_58 [1] : vector<1x16x128xf32> to vector<1x128xf32>
    %175 = vector.shape_cast %174 : vector<1x128xf32> to vector<1x1x128xf32>
    %cst_59 = arith.constant 1.600000e+01 : f32
    %176 = vector.broadcast %cst_59 : f32 to vector<1x1x128xf32>
    %177 = arith.divf %175, %176 : vector<1x1x128xf32>
    %178 = math.sqrt %177 : vector<1x1x128xf32>
    %179 = vector.broadcast %178 : vector<1x1x128xf32> to vector<1x16x128xf32>
    %180 = arith.mulf %179, %22 : vector<1x16x128xf32>
    %181 = vector.broadcast %173 : vector<1x1x128xf32> to vector<1x16x128xf32>
    %182 = arith.addf %180, %181 : vector<1x16x128xf32>
    %c0_60 = arith.constant 0 : index
    %c0_61 = arith.constant 0 : index
    %183 = vector.load %arg9[%c0_60, %c0_61] : memref<5x128xf32, #tpu.memory_space<vmem>>, vector<5x128xf32>
    %184 = vector.extract_strided_slice %183 {offsets = [0, 0], sizes = [1, 128], strides = [1, 1]} : vector<5x128xf32> to vector<1x128xf32>
    %185 = vector.extract_strided_slice %183 {offsets = [1, 0], sizes = [1, 128], strides = [1, 1]} : vector<5x128xf32> to vector<1x128xf32>
    %186 = vector.extract_strided_slice %183 {offsets = [2, 0], sizes = [1, 128], strides = [1, 1]} : vector<5x128xf32> to vector<1x128xf32>
    %187 = vector.shape_cast %132 : vector<1x16x128xf32> to vector<16x128xf32>
    %188 = arith.truncf %187 : vector<16x128xf32> to vector<16x128xbf16>
    %c0_62 = arith.constant 0 : index
    %c0_63 = arith.constant 0 : index
    %189 = vector.load %arg7[%c0_62, %c0_63] : memref<256x128xbf16, #tpu.memory_space<vmem>>, vector<128x128xbf16>
    %cst_64 = arith.constant dense<0.000000e+00> : vector<16x128xf32>
    %190 = tpu.matmul %188, %189, %cst_64 {dimension_numbers = #tpu.dot_dimension_numbers<[1], [0], [0], [1], [0, 0, 1, 1], [], []>} : vector<16x128xbf16>, vector<128x128xbf16>, vector<16x128xf32> -> vector<16x128xf32>
    %191 = vector.shape_cast %182 : vector<1x16x128xf32> to vector<16x128xf32>
    %192 = arith.truncf %191 : vector<16x128xf32> to vector<16x128xbf16>
    %c128_65 = arith.constant 128 : index
    %c0_66 = arith.constant 0 : index
    %193 = vector.load %arg7[%c128_65, %c0_66] : memref<256x128xbf16, #tpu.memory_space<vmem>>, vector<128x128xbf16>
    %cst_67 = arith.constant dense<0.000000e+00> : vector<16x128xf32>
    %194 = tpu.matmul %192, %193, %cst_67 {dimension_numbers = #tpu.dot_dimension_numbers<[1], [0], [0], [1], [0, 0, 1, 1], [], []>} : vector<16x128xbf16>, vector<128x128xbf16>, vector<16x128xf32> -> vector<16x128xf32>
    %195 = arith.addf %190, %194 : vector<16x128xf32>
    %196 = vector.broadcast %184 : vector<1x128xf32> to vector<16x128xf32>
    %197 = arith.addf %195, %196 : vector<16x128xf32>
    %198 = tpu.iota {dimensions = array<i32: 0>} : vector<16x1xi32>
    %c16_i32 = arith.constant 16 : i32
    %c0_i32 = arith.constant 0 : i32
    %199 = arith.cmpi eq, %c16_i32, %c0_i32 : i32
    %c1_i32 = arith.constant 1 : i32
    %200 = arith.select %199, %c1_i32, %c16_i32 : i32
    %201 = vector.broadcast %200 : i32 to vector<16x1xi32>
    %202 = arith.remsi %198, %201 : vector<16x1xi32>
    %c0_i32_68 = arith.constant 0 : i32
    %203 = vector.broadcast %c0_i32_68 : i32 to vector<16x1xi32>
    %204 = arith.cmpi ne, %202, %203 : vector<16x1xi32>
    %c0_i32_69 = arith.constant 0 : i32
    %205 = vector.broadcast %c0_i32_69 : i32 to vector<16x1xi32>
    %206 = arith.cmpi slt, %202, %205 : vector<16x1xi32>
    %c0_i32_70 = arith.constant 0 : i32
    %207 = arith.cmpi slt, %200, %c0_i32_70 : i32
    %208 = vector.broadcast %207 : i1 to vector<16x1xi1>
    %209 = vector.broadcast %208 : vector<16x1xi1> to vector<16x1xi1>
    %210 = arith.xori %206, %209 : vector<16x1xi1>
    %211 = arith.andi %210, %204 : vector<16x1xi1>
    %212 = vector.broadcast %200 : i32 to vector<16x1xi32>
    %213 = arith.addi %202, %212 : vector<16x1xi32>
    %214 = arith.select %211, %213, %202 : vector<16x1xi1>, vector<16x1xi32>
    %c0_i32_71 = arith.constant 0 : i32
    %215 = vector.broadcast %c0_i32_71 : i32 to vector<16x1xi32>
    %216 = arith.cmpi eq, %214, %215 : vector<16x1xi32>
    %c1_i32_72 = arith.constant 1 : i32
    %217 = tpu.dynamic_rotate %197 by %c1_i32_72 dim 0 : vector<16x128xf32>, i32 -> vector<16x128xf32>
    %cst_73 = arith.constant 0.000000e+00 : f32
    %218 = vector.shape_cast %216 : vector<16x1xi1> to vector<16x1xi1>
    %219 = vector.broadcast %218 : vector<16x1xi1> to vector<16x128xi1>
    %220 = vector.broadcast %cst_73 : f32 to vector<16x128xf32>
    %221 = arith.select %219, %220, %217 : vector<16x128xi1>, vector<16x128xf32>
    %c15_i32 = arith.constant 15 : i32
    %222 = vector.broadcast %c15_i32 : i32 to vector<16x1xi32>
    %223 = arith.cmpi eq, %214, %222 : vector<16x1xi32>
    %c15_i32_74 = arith.constant 15 : i32
    %224 = tpu.dynamic_rotate %197 by %c15_i32_74 dim 0 : vector<16x128xf32>, i32 -> vector<16x128xf32>
    %cst_75 = arith.constant 0.000000e+00 : f32
    %225 = vector.shape_cast %223 : vector<16x1xi1> to vector<16x1xi1>
    %226 = vector.broadcast %225 : vector<16x1xi1> to vector<16x128xi1>
    %227 = vector.broadcast %cst_75 : f32 to vector<16x128xf32>
    %228 = arith.select %226, %227, %224 : vector<16x128xi1>, vector<16x128xf32>
    %229 = arith.truncf %221 : vector<16x128xf32> to vector<16x128xbf16>
    %c0_76 = arith.constant 0 : index
    %c0_77 = arith.constant 0 : index
    %230 = vector.load %arg8[%c0_76, %c0_77] : memref<384x128xbf16, #tpu.memory_space<vmem>>, vector<128x128xbf16>
    %cst_78 = arith.constant dense<0.000000e+00> : vector<16x128xf32>
    %231 = tpu.matmul %229, %230, %cst_78 {dimension_numbers = #tpu.dot_dimension_numbers<[1], [0], [0], [1], [0, 0, 1, 1], [], []>} : vector<16x128xbf16>, vector<128x128xbf16>, vector<16x128xf32> -> vector<16x128xf32>
    %232 = arith.truncf %197 : vector<16x128xf32> to vector<16x128xbf16>
    %c128_79 = arith.constant 128 : index
    %c0_80 = arith.constant 0 : index
    %233 = vector.load %arg8[%c128_79, %c0_80] : memref<384x128xbf16, #tpu.memory_space<vmem>>, vector<128x128xbf16>
    %cst_81 = arith.constant dense<0.000000e+00> : vector<16x128xf32>
    %234 = tpu.matmul %232, %233, %cst_81 {dimension_numbers = #tpu.dot_dimension_numbers<[1], [0], [0], [1], [0, 0, 1, 1], [], []>} : vector<16x128xbf16>, vector<128x128xbf16>, vector<16x128xf32> -> vector<16x128xf32>
    %235 = arith.addf %231, %234 : vector<16x128xf32>
    %236 = arith.truncf %228 : vector<16x128xf32> to vector<16x128xbf16>
    %c256 = arith.constant 256 : index
    %c0_82 = arith.constant 0 : index
    %237 = vector.load %arg8[%c256, %c0_82] : memref<384x128xbf16, #tpu.memory_space<vmem>>, vector<128x128xbf16>
    %cst_83 = arith.constant dense<0.000000e+00> : vector<16x128xf32>
    %238 = tpu.matmul %236, %237, %cst_83 {dimension_numbers = #tpu.dot_dimension_numbers<[1], [0], [0], [1], [0, 0, 1, 1], [], []>} : vector<16x128xbf16>, vector<128x128xbf16>, vector<16x128xf32> -> vector<16x128xf32>
    %239 = arith.addf %235, %238 : vector<16x128xf32>
    %240 = vector.broadcast %185 : vector<1x128xf32> to vector<16x128xf32>
    %241 = arith.mulf %239, %240 : vector<16x128xf32>
    %242 = vector.broadcast %186 : vector<1x128xf32> to vector<16x128xf32>
    %243 = arith.addf %241, %242 : vector<16x128xf32>
    %cst_84 = arith.constant 0.000000e+00 : f32
    %244 = vector.broadcast %cst_84 : f32 to vector<16x128xf32>
    %245 = arith.maximumf %243, %244 : vector<16x128xf32>
    %246 = vector.shape_cast %245 : vector<16x128xf32> to vector<1x16x128xf32>
    %c0_85 = arith.constant 0 : index
    %c0_86 = arith.constant 0 : index
    %c0_87 = arith.constant 0 : index
    %247 = vector.load %arg3[%c0_85, %c0_86, %c0_87] : memref<1x8x128xf32, #tpu.memory_space<vmem>>, vector<1x8x128xf32>
    %248 = vector.extract_strided_slice %183 {offsets = [3, 0], sizes = [1, 128], strides = [1, 1]} : vector<5x128xf32> to vector<1x128xf32>
    %249 = vector.shape_cast %248 : vector<1x128xf32> to vector<1x1x128xf32>
    %250 = vector.broadcast %249 : vector<1x1x128xf32> to vector<1x8x128xf32>
    %251 = arith.mulf %247, %250 : vector<1x8x128xf32>
    %cst_88 = arith.constant dense<0.000000e+00> : vector<1x8xf32>
    %252 = vector.multi_reduction <add>, %251, %cst_88 [2] : vector<1x8x128xf32> to vector<1x8xf32>
    %253 = vector.shape_cast %252 : vector<1x8xf32> to vector<1x8x1xf32>
    %cst_89 = arith.constant dense<0xFF800000> : vector<1x1xf32>
    %254 = vector.multi_reduction <maximumf>, %253, %cst_89 [1] : vector<1x8x1xf32> to vector<1x1xf32>
    %255 = vector.shape_cast %254 : vector<1x1xf32> to vector<1x1x1xf32>
    %256 = vector.broadcast %255 : vector<1x1x1xf32> to vector<1x8x1xf32>
    %257 = arith.subf %253, %256 : vector<1x8x1xf32>
    %258 = math.exp %257 : vector<1x8x1xf32>
    %cst_90 = arith.constant dense<0.000000e+00> : vector<1x1xf32>
    %259 = vector.multi_reduction <add>, %258, %cst_90 [1] : vector<1x8x1xf32> to vector<1x1xf32>
    %260 = vector.shape_cast %259 : vector<1x1xf32> to vector<1x1x1xf32>
    %261 = tpu.reciprocal %260 {approx = true} : vector<1x1x1xf32> -> vector<1x1x1xf32>
    %262 = vector.broadcast %261 : vector<1x1x1xf32> to vector<1x8x1xf32>
    %263 = arith.mulf %258, %262 : vector<1x8x1xf32>
    %264 = vector.broadcast %263 : vector<1x8x1xf32> to vector<1x8x128xf32>
    %265 = arith.mulf %247, %264 : vector<1x8x128xf32>
    %cst_91 = arith.constant dense<0.000000e+00> : vector<1x128xf32>
    %266 = vector.multi_reduction <add>, %265, %cst_91 [1] : vector<1x8x128xf32> to vector<1x128xf32>
    %267 = vector.shape_cast %266 : vector<1x128xf32> to vector<1x1x128xf32>
    %c0_92 = arith.constant 0 : index
    %c0_93 = arith.constant 0 : index
    %c0_94 = arith.constant 0 : index
    %268 = vector.load %arg4[%c0_92, %c0_93, %c0_94] : memref<1x8x128xf32, #tpu.memory_space<vmem>>, vector<1x8x128xf32>
    %269 = vector.extract_strided_slice %183 {offsets = [4, 0], sizes = [1, 128], strides = [1, 1]} : vector<5x128xf32> to vector<1x128xf32>
    %270 = vector.shape_cast %269 : vector<1x128xf32> to vector<1x1x128xf32>
    %271 = vector.broadcast %270 : vector<1x1x128xf32> to vector<1x8x128xf32>
    %272 = arith.mulf %268, %271 : vector<1x8x128xf32>
    %cst_95 = arith.constant dense<0.000000e+00> : vector<1x8xf32>
    %273 = vector.multi_reduction <add>, %272, %cst_95 [2] : vector<1x8x128xf32> to vector<1x8xf32>
    %274 = vector.shape_cast %273 : vector<1x8xf32> to vector<1x8x1xf32>
    %cst_96 = arith.constant dense<0xFF800000> : vector<1x1xf32>
    %275 = vector.multi_reduction <maximumf>, %274, %cst_96 [1] : vector<1x8x1xf32> to vector<1x1xf32>
    %276 = vector.shape_cast %275 : vector<1x1xf32> to vector<1x1x1xf32>
    %277 = vector.broadcast %276 : vector<1x1x1xf32> to vector<1x8x1xf32>
    %278 = arith.subf %274, %277 : vector<1x8x1xf32>
    %279 = math.exp %278 : vector<1x8x1xf32>
    %cst_97 = arith.constant dense<0.000000e+00> : vector<1x1xf32>
    %280 = vector.multi_reduction <add>, %279, %cst_97 [1] : vector<1x8x1xf32> to vector<1x1xf32>
    %281 = vector.shape_cast %280 : vector<1x1xf32> to vector<1x1x1xf32>
    %282 = tpu.reciprocal %281 {approx = true} : vector<1x1x1xf32> -> vector<1x1x1xf32>
    %283 = vector.broadcast %282 : vector<1x1x1xf32> to vector<1x8x1xf32>
    %284 = arith.mulf %279, %283 : vector<1x8x1xf32>
    %285 = vector.broadcast %284 : vector<1x8x1xf32> to vector<1x8x128xf32>
    %286 = arith.mulf %268, %285 : vector<1x8x128xf32>
    %cst_98 = arith.constant dense<0.000000e+00> : vector<1x128xf32>
    %287 = vector.multi_reduction <add>, %286, %cst_98 [1] : vector<1x8x128xf32> to vector<1x128xf32>
    %288 = vector.shape_cast %287 : vector<1x128xf32> to vector<1x1x128xf32>
    %cst_99 = arith.constant dense<0.000000e+00> : vector<1x128xf32>
    %289 = vector.multi_reduction <add>, %246, %cst_99 [1] : vector<1x16x128xf32> to vector<1x128xf32>
    %290 = vector.shape_cast %289 : vector<1x128xf32> to vector<1x1x128xf32>
    %cst_100 = arith.constant 6.250000e-02 : f32
    %291 = vector.broadcast %cst_100 : f32 to vector<1x1x128xf32>
    %292 = arith.mulf %290, %291 : vector<1x1x128xf32>
    %293 = vector.broadcast %292 : vector<1x1x128xf32> to vector<1x16x128xf32>
    %294 = arith.subf %246, %293 : vector<1x16x128xf32>
    %295 = arith.mulf %294, %294 : vector<1x16x128xf32>
    %cst_101 = arith.constant dense<0.000000e+00> : vector<1x128xf32>
    %296 = vector.multi_reduction <add>, %295, %cst_101 [1] : vector<1x16x128xf32> to vector<1x128xf32>
    %297 = vector.shape_cast %296 : vector<1x128xf32> to vector<1x1x128xf32>
    %cst_102 = arith.constant 0.0666666701 : f32
    %298 = vector.broadcast %cst_102 : f32 to vector<1x1x128xf32>
    %299 = arith.mulf %297, %298 : vector<1x1x128xf32>
    %cst_103 = arith.constant 9.99999974E-6 : f32
    %300 = vector.broadcast %cst_103 : f32 to vector<1x1x128xf32>
    %301 = arith.addf %299, %300 : vector<1x1x128xf32>
    %302 = math.rsqrt %301 : vector<1x1x128xf32>
    %303 = vector.broadcast %302 : vector<1x1x128xf32> to vector<1x16x128xf32>
    %304 = arith.mulf %294, %303 : vector<1x16x128xf32>
    %305 = vector.broadcast %288 : vector<1x1x128xf32> to vector<1x16x128xf32>
    %306 = arith.mulf %304, %305 : vector<1x16x128xf32>
    %307 = vector.broadcast %267 : vector<1x1x128xf32> to vector<1x16x128xf32>
    %308 = arith.addf %306, %307 : vector<1x16x128xf32>
    %c0_104 = arith.constant 0 : index
    %c0_105 = arith.constant 0 : index
    %c0_106 = arith.constant 0 : index
    %309 = vector.load %arg10[%c0_104, %c0_105, %c0_106] : memref<1x16x128xf32, #tpu.memory_space<vmem>>, vector<1x16x128xf32>
    tpu.vector_store %arg10[%c0_104, %c0_105, %c0_106], %308 {strides = array<i32>} : memref<1x16x128xf32, #tpu.memory_space<vmem>>, vector<1x16x128xf32>,
    return
  }
  func.func @transform_0(%arg0: i32) -> (i32, i32, i32) {
    %c0_i32 = arith.constant 0 : i32
    %c0_i32_0 = arith.constant 0 : i32
    %c0_i32_1 = arith.constant 0 : i32
    return %arg0, %c0_i32, %c0_i32_0 : i32, i32, i32
  }
  func.func @transform_1(%arg0: i32) -> (i32, i32, i32) {
    %c0_i32 = arith.constant 0 : i32
    %c0_i32_0 = arith.constant 0 : i32
    %c0_i32_1 = arith.constant 0 : i32
    return %arg0, %c0_i32, %c0_i32_0 : i32, i32, i32
  }
  func.func @transform_2(%arg0: i32) -> (i32, i32, i32) {
    %c0_i32 = arith.constant 0 : i32
    %c0_i32_0 = arith.constant 0 : i32
    %c0_i32_1 = arith.constant 0 : i32
    return %arg0, %c0_i32, %c0_i32_0 : i32, i32, i32
  }
  func.func @transform_3(%arg0: i32) -> (i32, i32, i32) {
    %c0_i32 = arith.constant 0 : i32
    %c0_i32_0 = arith.constant 0 : i32
    %c0_i32_1 = arith.constant 0 : i32
    return %arg0, %c0_i32, %c0_i32_0 : i32, i32, i32
  }
  func.func @transform_4(%arg0: i32) -> (i32, i32, i32) {
    %c0_i32 = arith.constant 0 : i32
    %c0_i32_0 = arith.constant 0 : i32
    %c0_i32_1 = arith.constant 0 : i32
    %c0_i32_2 = arith.constant 0 : i32
    return %c0_i32, %c0_i32_0, %c0_i32_1 : i32, i32, i32
  }
  func.func @transform_5(%arg0: i32) -> (i32, i32) {
    %c0_i32 = arith.constant 0 : i32
    %c0_i32_0 = arith.constant 0 : i32
    %c0_i32_1 = arith.constant 0 : i32
    return %c0_i32, %c0_i32_0 : i32, i32
  }
  func.func @transform_6(%arg0: i32) -> (i32, i32) {
    %c0_i32 = arith.constant 0 : i32
    %c0_i32_0 = arith.constant 0 : i32
    %c0_i32_1 = arith.constant 0 : i32
    return %c0_i32, %c0_i32_0 : i32, i32
  }
  func.func @transform_7(%arg0: i32) -> (i32, i32) {
    %c0_i32 = arith.constant 0 : i32
    %c0_i32_0 = arith.constant 0 : i32
    %c0_i32_1 = arith.constant 0 : i32
    return %c0_i32, %c0_i32_0 : i32, i32
  }
  func.func @transform_8(%arg0: i32) -> (i32, i32) {
    %c0_i32 = arith.constant 0 : i32
    %c0_i32_0 = arith.constant 0 : i32
    %c0_i32_1 = arith.constant 0 : i32
    return %c0_i32, %c0_i32_0 : i32, i32
  }
  func.func @transform_9(%arg0: i32) -> (i32, i32, i32) {
    %c0_i32 = arith.constant 0 : i32
    %c0_i32_0 = arith.constant 0 : i32
    %c0_i32_1 = arith.constant 0 : i32
    return %arg0, %c0_i32, %c0_i32_0 : i32, i32, i32
  }
}

module attributes {stable_mosaic.version = 11 : i64} {
  func.func @_triaan_kernel(%arg0: i32, %arg1: memref<1x16x128xf32, #tpu.memory_space<vmem>>, %arg2: memref<1x16x128xf32, #tpu.memory_space<vmem>>, %arg3: memref<1x8x128xf32, #tpu.memory_space<vmem>>, %arg4: memref<1x8x128xf32, #tpu.memory_space<vmem>>, %arg5: memref<4x128x128xbf16, #tpu.memory_space<vmem>>, %arg6: memref<128x256xbf16, #tpu.memory_space<vmem>>, %arg7: memref<256x128xbf16, #tpu.memory_space<vmem>>, %arg8: memref<384x128xbf16, #tpu.memory_space<vmem>>, %arg9: memref<5x128xf32, #tpu.memory_space<vmem>>, %arg10: memref<1x16x128xf32, #tpu.memory_space<vmem>>) attributes {dimension_semantics = [#tpu.dimension_semantics<parallel>], iteration_bounds = array<i64: 2>, scalar_prefetch = 0 : i64, scratch_operands = 0 : i64, tpu.core_type = #tpu.core_type<tc>, window_params = [{transform_indices = @transform_0, window_bounds = array<i64: 1, 16, 128>}, {transform_indices = @transform_1, window_bounds = array<i64: 1, 16, 128>}, {transform_indices = @transform_2, window_bounds = array<i64: 1, 8, 128>}, {transform_indices = @transform_3, window_bounds = array<i64: 1, 8, 128>}, {pipeline_mode = #tpu.pipeline_mode<synchronous>, transform_indices = @transform_4, window_bounds = array<i64: 4, 128, 128>}, {pipeline_mode = #tpu.pipeline_mode<synchronous>, transform_indices = @transform_5, window_bounds = array<i64: 128, 256>}, {pipeline_mode = #tpu.pipeline_mode<synchronous>, transform_indices = @transform_6, window_bounds = array<i64: 256, 128>}, {pipeline_mode = #tpu.pipeline_mode<synchronous>, transform_indices = @transform_7, window_bounds = array<i64: 384, 128>}, {pipeline_mode = #tpu.pipeline_mode<synchronous>, transform_indices = @transform_8, window_bounds = array<i64: 5, 128>}, {transform_indices = @transform_9, window_bounds = array<i64: 1, 16, 128>}]} {
    %c0 = arith.constant 0 : index
    %c0_0 = arith.constant 0 : index
    %c0_1 = arith.constant 0 : index
    %0 = vector.load %arg1[%c0, %c0_0, %c0_1] : memref<1x16x128xf32, #tpu.memory_space<vmem>>, vector<1x16x128xf32>
    %c0_2 = arith.constant 0 : index
    %c0_3 = arith.constant 0 : index
    %c0_4 = arith.constant 0 : index
    %1 = vector.load %arg2[%c0_2, %c0_3, %c0_4] : memref<1x16x128xf32, #tpu.memory_space<vmem>>, vector<1x16x128xf32>
    %2 = tpu.iota {dimensions = array<i32: 2>} : vector<1x1x128xi32>
    %c32_i32 = arith.constant 32 : i32
    %3 = vector.broadcast %c32_i32 : i32 to vector<1x1x128xi32>
    %4 = arith.cmpi slt, %2, %3 : vector<1x1x128xi32>
    %5 = arith.extui %4 : vector<1x1x128xi1> to vector<1x1x128xi32>
    %6 = arith.sitofp %5 : vector<1x1x128xi32> to vector<1x1x128xf32>
    %cst = arith.constant dense<0.000000e+00> : vector<1x128xf32>
    %7 = vector.multi_reduction <add>, %0, %cst [1] : vector<1x16x128xf32> to vector<1x128xf32>
    %8 = vector.shape_cast %7 : vector<1x128xf32> to vector<1x1x128xf32>
    %cst_5 = arith.constant 6.250000e-02 : f32
    %9 = vector.broadcast %cst_5 : f32 to vector<1x1x128xf32>
    %10 = arith.mulf %8, %9 : vector<1x1x128xf32>
    %11 = vector.broadcast %10 : vector<1x1x128xf32> to vector<1x16x128xf32>
    %12 = arith.subf %0, %11 : vector<1x16x128xf32>
    %13 = arith.mulf %12, %12 : vector<1x16x128xf32>
    %cst_6 = arith.constant dense<0.000000e+00> : vector<1x128xf32>
    %14 = vector.multi_reduction <add>, %13, %cst_6 [1] : vector<1x16x128xf32> to vector<1x128xf32>
    %15 = vector.shape_cast %14 : vector<1x128xf32> to vector<1x1x128xf32>
    %cst_7 = arith.constant 0.0666666701 : f32
    %16 = vector.broadcast %cst_7 : f32 to vector<1x1x128xf32>
    %17 = arith.mulf %15, %16 : vector<1x1x128xf32>
    %cst_8 = arith.constant 9.99999974E-6 : f32
    %18 = vector.broadcast %cst_8 : f32 to vector<1x1x128xf32>
    %19 = arith.addf %17, %18 : vector<1x1x128xf32>
    %20 = math.rsqrt %19 : vector<1x1x128xf32>
    %21 = vector.broadcast %20 : vector<1x1x128xf32> to vector<1x16x128xf32>
    %22 = arith.mulf %12, %21 : vector<1x16x128xf32>
    %cst_9 = arith.constant dense<0.000000e+00> : vector<1x128xf32>
    %23 = vector.multi_reduction <add>, %1, %cst_9 [1] : vector<1x16x128xf32> to vector<1x128xf32>
    %24 = vector.shape_cast %23 : vector<1x128xf32> to vector<1x1x128xf32>
    %cst_10 = arith.constant 6.250000e-02 : f32
    %25 = vector.broadcast %cst_10 : f32 to vector<1x1x128xf32>
    %26 = arith.mulf %24, %25 : vector<1x1x128xf32>
    %27 = vector.broadcast %26 : vector<1x1x128xf32> to vector<1x16x128xf32>
    %28 = arith.subf %1, %27 : vector<1x16x128xf32>
    %29 = arith.mulf %28, %28 : vector<1x16x128xf32>
    %cst_11 = arith.constant dense<0.000000e+00> : vector<1x128xf32>
    %30 = vector.multi_reduction <add>, %29, %cst_11 [1] : vector<1x16x128xf32> to vector<1x128xf32>
    %31 = vector.shape_cast %30 : vector<1x128xf32> to vector<1x1x128xf32>
    %cst_12 = arith.constant 0.0666666701 : f32
    %32 = vector.broadcast %cst_12 : f32 to vector<1x1x128xf32>
    %33 = arith.mulf %31, %32 : vector<1x1x128xf32>
    %cst_13 = arith.constant 9.99999974E-6 : f32
    %34 = vector.broadcast %cst_13 : f32 to vector<1x1x128xf32>
    %35 = arith.addf %33, %34 : vector<1x1x128xf32>
    %36 = math.rsqrt %35 : vector<1x1x128xf32>
    %37 = vector.broadcast %36 : vector<1x1x128xf32> to vector<1x16x128xf32>
    %38 = arith.mulf %28, %37 : vector<1x16x128xf32>
    %cst_14 = arith.constant dense<0.000000e+00> : vector<1x16xf32>
    %39 = vector.multi_reduction <add>, %0, %cst_14 [2] : vector<1x16x128xf32> to vector<1x16xf32>
    %40 = vector.shape_cast %39 : vector<1x16xf32> to vector<1x16x1xf32>
    %cst_15 = arith.constant 3.125000e-02 : f32
    %41 = vector.broadcast %cst_15 : f32 to vector<1x16x1xf32>
    %42 = arith.mulf %40, %41 : vector<1x16x1xf32>
    %43 = vector.broadcast %42 : vector<1x16x1xf32> to vector<1x16x128xf32>
    %44 = arith.subf %0, %43 : vector<1x16x128xf32>
    %45 = vector.broadcast %6 : vector<1x1x128xf32> to vector<1x16x128xf32>
    %46 = arith.mulf %44, %45 : vector<1x16x128xf32>
    %47 = arith.mulf %46, %46 : vector<1x16x128xf32>
    %cst_16 = arith.constant dense<0.000000e+00> : vector<1x16xf32>
    %48 = vector.multi_reduction <add>, %47, %cst_16 [2] : vector<1x16x128xf32> to vector<1x16xf32>
    %49 = vector.shape_cast %48 : vector<1x16xf32> to vector<1x16x1xf32>
    %cst_17 = arith.constant 0.0322580636 : f32
    %50 = vector.broadcast %cst_17 : f32 to vector<1x16x1xf32>
    %51 = arith.mulf %49, %50 : vector<1x16x1xf32>
    %cst_18 = arith.constant 9.99999974E-6 : f32
    %52 = vector.broadcast %cst_18 : f32 to vector<1x16x1xf32>
    %53 = arith.addf %51, %52 : vector<1x16x1xf32>
    %54 = math.rsqrt %53 : vector<1x16x1xf32>
    %55 = vector.broadcast %54 : vector<1x16x1xf32> to vector<1x16x128xf32>
    %56 = arith.mulf %46, %55 : vector<1x16x128xf32>
    %cst_19 = arith.constant dense<0.000000e+00> : vector<1x16xf32>
    %57 = vector.multi_reduction <add>, %1, %cst_19 [2] : vector<1x16x128xf32> to vector<1x16xf32>
    %58 = vector.shape_cast %57 : vector<1x16xf32> to vector<1x16x1xf32>
    %cst_20 = arith.constant 3.125000e-02 : f32
    %59 = vector.broadcast %cst_20 : f32 to vector<1x16x1xf32>
    %60 = arith.mulf %58, %59 : vector<1x16x1xf32>
    %61 = vector.broadcast %60 : vector<1x16x1xf32> to vector<1x16x128xf32>
    %62 = arith.subf %1, %61 : vector<1x16x128xf32>
    %63 = vector.broadcast %6 : vector<1x1x128xf32> to vector<1x16x128xf32>
    %64 = arith.mulf %62, %63 : vector<1x16x128xf32>
    %65 = arith.mulf %64, %64 : vector<1x16x128xf32>
    %cst_21 = arith.constant dense<0.000000e+00> : vector<1x16xf32>
    %66 = vector.multi_reduction <add>, %65, %cst_21 [2] : vector<1x16x128xf32> to vector<1x16xf32>
    %67 = vector.shape_cast %66 : vector<1x16xf32> to vector<1x16x1xf32>
    %cst_22 = arith.constant 0.0322580636 : f32
    %68 = vector.broadcast %cst_22 : f32 to vector<1x16x1xf32>
    %69 = arith.mulf %67, %68 : vector<1x16x1xf32>
    %cst_23 = arith.constant 9.99999974E-6 : f32
    %70 = vector.broadcast %cst_23 : f32 to vector<1x16x1xf32>
    %71 = arith.addf %69, %70 : vector<1x16x1xf32>
    %72 = math.rsqrt %71 : vector<1x16x1xf32>
    %73 = vector.broadcast %72 : vector<1x16x1xf32> to vector<1x16x128xf32>
    %74 = arith.mulf %64, %73 : vector<1x16x128xf32>
    %75 = vector.shape_cast %1 : vector<1x16x128xf32> to vector<16x128xf32>
    %76 = arith.truncf %75 : vector<16x128xf32> to vector<16x128xbf16>
    %c0_24 = arith.constant 0 : index
    %c0_25 = arith.constant 0 : index
    %77 = vector.load %arg6[%c0_24, %c0_25] : memref<128x256xbf16, #tpu.memory_space<vmem>>, vector<128x128xbf16>
    %cst_26 = arith.constant dense<0.000000e+00> : vector<16x128xf32>
    %78 = tpu.matmul %76, %77, %cst_26 {dimension_numbers = #tpu.dot_dimension_numbers<[1], [0], [0], [1], [0, 0, 1, 1], [], []>} : vector<16x128xbf16>, vector<128x128xbf16>, vector<16x128xf32> -> vector<16x128xf32>
    %79 = vector.shape_cast %78 : vector<16x128xf32> to vector<1x16x128xf32>
    %c0_27 = arith.constant 0 : index
    %c128 = arith.constant 128 : index
    %80 = vector.load %arg6[%c0_27, %c128] : memref<128x256xbf16, #tpu.memory_space<vmem>>, vector<128x128xbf16>
    %cst_28 = arith.constant dense<0.000000e+00> : vector<16x128xf32>
    %81 = tpu.matmul %76, %80, %cst_28 {dimension_numbers = #tpu.dot_dimension_numbers<[1], [0], [0], [1], [0, 0, 1, 1], [], []>} : vector<16x128xbf16>, vector<128x128xbf16>, vector<16x128xf32> -> vector<16x128xf32>
    %82 = vector.shape_cast %81 : vector<16x128xf32> to vector<1x16x128xf32>
    %c0_29 = arith.constant 0 : index
    %c0_30 = arith.constant 0 : index
    %c0_31 = arith.constant 0 : index
    %83 = vector.load %arg5[%c0_29, %c0_30, %c0_31] : memref<4x128x128xbf16, #tpu.memory_space<vmem>>, vector<1x128x128xbf16>
    %84 = vector.shape_cast %83 : vector<1x128x128xbf16> to vector<128x128xbf16>
    %c1 = arith.constant 1 : index
    %c0_32 = arith.constant 0 : index
    %c0_33 = arith.constant 0 : index
    %85 = vector.load %arg5[%c1, %c0_32, %c0_33] : memref<4x128x128xbf16, #tpu.memory_space<vmem>>, vector<1x128x128xbf16>
    %86 = vector.shape_cast %85 : vector<1x128x128xbf16> to vector<128x128xbf16>
    %87 = vector.shape_cast %56 : vector<1x16x128xf32> to vector<16x128xf32>
    %88 = arith.truncf %87 : vector<16x128xf32> to vector<16x128xbf16>
    %cst_34 = arith.constant dense<0.000000e+00> : vector<16x128xf32>
    %89 = tpu.matmul %88, %84, %cst_34 {dimension_numbers = #tpu.dot_dimension_numbers<[1], [0], [0], [1], [0, 0, 1, 1], [], []>} : vector<16x128xbf16>, vector<128x128xbf16>, vector<16x128xf32> -> vector<16x128xf32>
    %90 = vector.shape_cast %89 : vector<16x128xf32> to vector<1x16x128xf32>
    %91 = vector.shape_cast %74 : vector<1x16x128xf32> to vector<16x128xf32>
    %92 = arith.truncf %91 : vector<16x128xf32> to vector<16x128xbf16>
    %cst_35 = arith.constant dense<0.000000e+00> : vector<16x128xf32>
    %93 = tpu.matmul %92, %86, %cst_35 {dimension_numbers = #tpu.dot_dimension_numbers<[1], [0], [0], [1], [0, 0, 1, 1], [], []>} : vector<16x128xbf16>, vector<128x128xbf16>, vector<16x128xf32> -> vector<16x128xf32>
    %94 = vector.shape_cast %93 : vector<16x128xf32> to vector<1x16x128xf32>
    %95 = arith.truncf %90 : vector<1x16x128xf32> to vector<1x16x128xbf16>
    %96 = arith.truncf %94 : vector<1x16x128xf32> to vector<1x16x128xbf16>
    "tpu.trace_start"() <{level = 10 : i32, message = "bqc,bkc->bqk"}> : () -> ()
    %cst_36 = arith.constant dense<0.000000e+00> : vector<1x16x16xf32>
    %97 = tpu.matmul %95, %96, %cst_36 {dimension_numbers = #tpu.dot_dimension_numbers<[2], [2], [1], [1], [0, 0, 0, 1, 1, 1], [0], [0]>} : vector<1x16x128xbf16>, vector<1x16x128xbf16>, vector<1x16x16xf32> -> vector<1x16x16xf32>
    "tpu.trace_stop"() : () -> ()
    %cst_37 = arith.constant dense<0xFF800000> : vector<1x16xf32>
    %98 = vector.multi_reduction <maximumf>, %97, %cst_37 [2] : vector<1x16x16xf32> to vector<1x16xf32>
    %99 = vector.shape_cast %98 : vector<1x16xf32> to vector<1x16x1xf32>
    %100 = vector.broadcast %99 : vector<1x16x1xf32> to vector<1x16x16xf32>
    %101 = arith.subf %97, %100 : vector<1x16x16xf32>
    %102 = math.exp %101 : vector<1x16x16xf32>
    %cst_38 = arith.constant dense<0.000000e+00> : vector<1x16xf32>
    %103 = vector.multi_reduction <add>, %102, %cst_38 [2] : vector<1x16x16xf32> to vector<1x16xf32>
    %104 = vector.shape_cast %103 : vector<1x16xf32> to vector<1x16x1xf32>
    %105 = tpu.reciprocal %104 {approx = true} : vector<1x16x1xf32> -> vector<1x16x1xf32>
    %106 = vector.broadcast %105 : vector<1x16x1xf32> to vector<1x16x16xf32>
    %107 = arith.mulf %102, %106 : vector<1x16x16xf32>
    %108 = arith.truncf %79 : vector<1x16x128xf32> to vector<1x16x128xbf16>
    %109 = arith.mulf %79, %79 : vector<1x16x128xf32>
    %110 = arith.truncf %109 : vector<1x16x128xf32> to vector<1x16x128xbf16>
    %111 = tpu.concatenate %108, %110 in 2 : vector<1x16x128xbf16>, vector<1x16x128xbf16> -> vector<1x16x256xbf16>
    %112 = arith.truncf %107 : vector<1x16x16xf32> to vector<1x16x16xbf16>
    "tpu.trace_start"() <{level = 10 : i32, message = "bqk,bkc->bqc"}> : () -> ()
    %cst_39 = arith.constant dense<0.000000e+00> : vector<1x16x256xf32>
    %113 = tpu.matmul %112, %111, %cst_39 {dimension_numbers = #tpu.dot_dimension_numbers<[2], [1], [1], [2], [0, 0, 0, 1, 1, 2], [0], [0]>} : vector<1x16x16xbf16>, vector<1x16x256xbf16>, vector<1x16x256xf32> -> vector<1x16x256xf32>
    "tpu.trace_stop"() : () -> ()
    %114 = vector.extract_strided_slice %113 {offsets = [0, 0, 0], sizes = [1, 16, 128], strides = [1, 1, 1]} : vector<1x16x256xf32> to vector<1x16x128xf32>
    %115 = vector.extract_strided_slice %113 {offsets = [0, 0, 128], sizes = [1, 16, 128], strides = [1, 1, 1]} : vector<1x16x256xf32> to vector<1x16x128xf32>
    %116 = arith.mulf %114, %114 : vector<1x16x128xf32>
    %117 = arith.subf %115, %116 : vector<1x16x128xf32>
    %cst_40 = arith.constant 0.000000e+00 : f32
    %118 = vector.broadcast %cst_40 : f32 to vector<1x16x128xf32>
    %119 = arith.maximumf %117, %118 : vector<1x16x128xf32>
    %cst_41 = arith.constant dense<0.000000e+00> : vector<1x128xf32>
    %120 = vector.multi_reduction <add>, %114, %cst_41 [1] : vector<1x16x128xf32> to vector<1x128xf32>
    %121 = vector.shape_cast %120 : vector<1x128xf32> to vector<1x1x128xf32>
    %cst_42 = arith.constant 1.600000e+01 : f32
    %122 = vector.broadcast %cst_42 : f32 to vector<1x1x128xf32>
    %123 = arith.divf %121, %122 : vector<1x1x128xf32>
    %cst_43 = arith.constant dense<0.000000e+00> : vector<1x128xf32>
    %124 = vector.multi_reduction <add>, %119, %cst_43 [1] : vector<1x16x128xf32> to vector<1x128xf32>
    %125 = vector.shape_cast %124 : vector<1x128xf32> to vector<1x1x128xf32>
    %cst_44 = arith.constant 1.600000e+01 : f32
    %126 = vector.broadcast %cst_44 : f32 to vector<1x1x128xf32>
    %127 = arith.divf %125, %126 : vector<1x1x128xf32>
    %128 = math.sqrt %127 : vector<1x1x128xf32>
    %129 = vector.broadcast %128 : vector<1x1x128xf32> to vector<1x16x128xf32>
    %130 = arith.mulf %129, %22 : vector<1x16x128xf32>
    %131 = vector.broadcast %123 : vector<1x1x128xf32> to vector<1x16x128xf32>
    %132 = arith.addf %130, %131 : vector<1x16x128xf32>
    %c2 = arith.constant 2 : index
    %c0_45 = arith.constant 0 : index
    %c0_46 = arith.constant 0 : index
    %133 = vector.load %arg5[%c2, %c0_45, %c0_46] : memref<4x128x128xbf16, #tpu.memory_space<vmem>>, vector<1x128x128xbf16>
    %134 = vector.shape_cast %133 : vector<1x128x128xbf16> to vector<128x128xbf16>
    %c3 = arith.constant 3 : index
    %c0_47 = arith.constant 0 : index
    %c0_48 = arith.constant 0 : index
    %135 = vector.load %arg5[%c3, %c0_47, %c0_48] : memref<4x128x128xbf16, #tpu.memory_space<vmem>>, vector<1x128x128xbf16>
    %136 = vector.shape_cast %135 : vector<1x128x128xbf16> to vector<128x128xbf16>
    %137 = vector.shape_cast %22 : vector<1x16x128xf32> to vector<16x128xf32>
    %138 = arith.truncf %137 : vector<16x128xf32> to vector<16x128xbf16>
    %cst_49 = arith.constant dense<0.000000e+00> : vector<16x128xf32>
    %139 = tpu.matmul %138, %134, %cst_49 {dimension_numbers = #tpu.dot_dimension_numbers<[1], [0], [0], [1], [0, 0, 1, 1], [], []>} : vector<16x128xbf16>, vector<128x128xbf16>, vector<16x128xf32> -> vector<16x128xf32>
    %140 = vector.shape_cast %139 : vector<16x128xf32> to vector<1x16x128xf32>
    %141 = vector.shape_cast %38 : vector<1x16x128xf32> to vector<16x128xf32>
    %142 = arith.truncf %141 : vector<16x128xf32> to vector<16x128xbf16>
    %cst_50 = arith.constant dense<0.000000e+00> : vector<16x128xf32>
    %143 = tpu.matmul %142, %136, %cst_50 {dimension_numbers = #tpu.dot_dimension_numbers<[1], [0], [0], [1], [0, 0, 1, 1], [], []>} : vector<16x128xbf16>, vector<128x128xbf16>, vector<16x128xf32> -> vector<16x128xf32>
    %144 = vector.shape_cast %143 : vector<16x128xf32> to vector<1x16x128xf32>
    %145 = arith.truncf %140 : vector<1x16x128xf32> to vector<1x16x128xbf16>
    %146 = arith.truncf %144 : vector<1x16x128xf32> to vector<1x16x128xbf16>
    "tpu.trace_start"() <{level = 10 : i32, message = "bqc,bkc->bqk"}> : () -> ()
    %cst_51 = arith.constant dense<0.000000e+00> : vector<1x16x16xf32>
    %147 = tpu.matmul %145, %146, %cst_51 {dimension_numbers = #tpu.dot_dimension_numbers<[2], [2], [1], [1], [0, 0, 0, 1, 1, 1], [0], [0]>} : vector<1x16x128xbf16>, vector<1x16x128xbf16>, vector<1x16x16xf32> -> vector<1x16x16xf32>
    "tpu.trace_stop"() : () -> ()
    %cst_52 = arith.constant dense<0xFF800000> : vector<1x16xf32>
    %148 = vector.multi_reduction <maximumf>, %147, %cst_52 [2] : vector<1x16x16xf32> to vector<1x16xf32>
    %149 = vector.shape_cast %148 : vector<1x16xf32> to vector<1x16x1xf32>
    %150 = vector.broadcast %149 : vector<1x16x1xf32> to vector<1x16x16xf32>
    %151 = arith.subf %147, %150 : vector<1x16x16xf32>
    %152 = math.exp %151 : vector<1x16x16xf32>
    %cst_53 = arith.constant dense<0.000000e+00> : vector<1x16xf32>
    %153 = vector.multi_reduction <add>, %152, %cst_53 [2] : vector<1x16x16xf32> to vector<1x16xf32>
    %154 = vector.shape_cast %153 : vector<1x16xf32> to vector<1x16x1xf32>
    %155 = tpu.reciprocal %154 {approx = true} : vector<1x16x1xf32> -> vector<1x16x1xf32>
    %156 = vector.broadcast %155 : vector<1x16x1xf32> to vector<1x16x16xf32>
    %157 = arith.mulf %152, %156 : vector<1x16x16xf32>
    %158 = arith.truncf %82 : vector<1x16x128xf32> to vector<1x16x128xbf16>
    %159 = arith.mulf %82, %82 : vector<1x16x128xf32>
    %160 = arith.truncf %159 : vector<1x16x128xf32> to vector<1x16x128xbf16>
    %161 = tpu.concatenate %158, %160 in 2 : vector<1x16x128xbf16>, vector<1x16x128xbf16> -> vector<1x16x256xbf16>
    %162 = arith.truncf %157 : vector<1x16x16xf32> to vector<1x16x16xbf16>
    "tpu.trace_start"() <{level = 10 : i32, message = "bqk,bkc->bqc"}> : () -> ()
    %cst_54 = arith.constant dense<0.000000e+00> : vector<1x16x256xf32>
    %163 = tpu.matmul %162, %161, %cst_54 {dimension_numbers = #tpu.dot_dimension_numbers<[2], [1], [1], [2], [0, 0, 0, 1, 1, 2], [0], [0]>} : vector<1x16x16xbf16>, vector<1x16x256xbf16>, vector<1x16x256xf32> -> vector<1x16x256xf32>
    "tpu.trace_stop"() : () -> ()
    %164 = vector.extract_strided_slice %163 {offsets = [0, 0, 0], sizes = [1, 16, 128], strides = [1, 1, 1]} : vector<1x16x256xf32> to vector<1x16x128xf32>
    %165 = vector.extract_strided_slice %163 {offsets = [0, 0, 128], sizes = [1, 16, 128], strides = [1, 1, 1]} : vector<1x16x256xf32> to vector<1x16x128xf32>
    %166 = arith.mulf %164, %164 : vector<1x16x128xf32>
    %167 = arith.subf %165, %166 : vector<1x16x128xf32>
    %cst_55 = arith.constant 0.000000e+00 : f32
    %168 = vector.broadcast %cst_55 : f32 to vector<1x16x128xf32>
    %169 = arith.maximumf %167, %168 : vector<1x16x128xf32>
    %cst_56 = arith.constant dense<0.000000e+00> : vector<1x128xf32>
    %170 = vector.multi_reduction <add>, %164, %cst_56 [1] : vector<1x16x128xf32> to vector<1x128xf32>
    %171 = vector.shape_cast %170 : vector<1x128xf32> to vector<1x1x128xf32>
    %cst_57 = arith.constant 1.600000e+01 : f32
    %172 = vector.broadcast %cst_57 : f32 to vector<1x1x128xf32>
    %173 = arith.divf %171, %172 : vector<1x1x128xf32>
    %cst_58 = arith.constant dense<0.000000e+00> : vector<1x128xf32>
    %174 = vector.multi_reduction <add>, %169, %cst_58 [1] : vector<1x16x128xf32> to vector<1x128xf32>
    %175 = vector.shape_cast %174 : vector<1x128xf32> to vector<1x1x128xf32>
    %cst_59 = arith.constant 1.600000e+01 : f32
    %176 = vector.broadcast %cst_59 : f32 to vector<1x1x128xf32>
    %177 = arith.divf %175, %176 : vector<1x1x128xf32>
    %178 = math.sqrt %177 : vector<1x1x128xf32>
    %179 = vector.broadcast %178 : vector<1x1x128xf32> to vector<1x16x128xf32>
    %180 = arith.mulf %179, %22 : vector<1x16x128xf32>
    %181 = vector.broadcast %173 : vector<1x1x128xf32> to vector<1x16x128xf32>
    %182 = arith.addf %180, %181 : vector<1x16x128xf32>
    %c0_60 = arith.constant 0 : index
    %c0_61 = arith.constant 0 : index
    %183 = vector.load %arg9[%c0_60, %c0_61] : memref<5x128xf32, #tpu.memory_space<vmem>>, vector<5x128xf32>
    %184 = vector.extract_strided_slice %183 {offsets = [0, 0], sizes = [1, 128], strides = [1, 1]} : vector<5x128xf32> to vector<1x128xf32>
    %185 = vector.extract_strided_slice %183 {offsets = [1, 0], sizes = [1, 128], strides = [1, 1]} : vector<5x128xf32> to vector<1x128xf32>
    %186 = vector.extract_strided_slice %183 {offsets = [2, 0], sizes = [1, 128], strides = [1, 1]} : vector<5x128xf32> to vector<1x128xf32>
    %187 = vector.shape_cast %132 : vector<1x16x128xf32> to vector<16x128xf32>
    %188 = arith.truncf %187 : vector<16x128xf32> to vector<16x128xbf16>
    %c0_62 = arith.constant 0 : index
    %c0_63 = arith.constant 0 : index
    %189 = vector.load %arg7[%c0_62, %c0_63] : memref<256x128xbf16, #tpu.memory_space<vmem>>, vector<128x128xbf16>
    %cst_64 = arith.constant dense<0.000000e+00> : vector<16x128xf32>
    %190 = tpu.matmul %188, %189, %cst_64 {dimension_numbers = #tpu.dot_dimension_numbers<[1], [0], [0], [1], [0, 0, 1, 1], [], []>} : vector<16x128xbf16>, vector<128x128xbf16>, vector<16x128xf32> -> vector<16x128xf32>
    %191 = vector.shape_cast %182 : vector<1x16x128xf32> to vector<16x128xf32>
    %192 = arith.truncf %191 : vector<16x128xf32> to vector<16x128xbf16>
    %c128_65 = arith.constant 128 : index
    %c0_66 = arith.constant 0 : index
    %193 = vector.load %arg7[%c128_65, %c0_66] : memref<256x128xbf16, #tpu.memory_space<vmem>>, vector<128x128xbf16>
    %cst_67 = arith.constant dense<0.000000e+00> : vector<16x128xf32>
    %194 = tpu.matmul %192, %193, %cst_67 {dimension_numbers = #tpu.dot_dimension_numbers<[1], [0], [0], [1], [0, 0, 1, 1], [], []>} : vector<16x128xbf16>, vector<128x128xbf16>, vector<16x128xf32> -> vector<16x128xf32>
    %195 = arith.addf %190, %194 : vector<16x128xf32>
    %196 = vector.broadcast %184 : vector<1x128xf32> to vector<16x128xf32>
    %197 = arith.addf %195, %196 : vector<16x128xf32>
    %198 = tpu.iota {dimensions = array<i32: 0>} : vector<16x1xi32>
    %c16_i32 = arith.constant 16 : i32
    %c0_i32 = arith.constant 0 : i32
    %199 = arith.cmpi eq, %c16_i32, %c0_i32 : i32
    %c1_i32 = arith.constant 1 : i32
    %200 = arith.select %199, %c1_i32, %c16_i32 : i32
    %201 = vector.broadcast %200 : i32 to vector<16x1xi32>
    %202 = arith.remsi %198, %201 : vector<16x1xi32>
    %c0_i32_68 = arith.constant 0 : i32
    %203 = vector.broadcast %c0_i32_68 : i32 to vector<16x1xi32>
    %204 = arith.cmpi ne, %202, %203 : vector<16x1xi32>
    %c0_i32_69 = arith.constant 0 : i32
    %205 = vector.broadcast %c0_i32_69 : i32 to vector<16x1xi32>
    %206 = arith.cmpi slt, %202, %205 : vector<16x1xi32>
    %c0_i32_70 = arith.constant 0 : i32
    %207 = arith.cmpi slt, %200, %c0_i32_70 : i32
    %208 = vector.broadcast %207 : i1 to vector<16x1xi1>
    %209 = vector.broadcast %208 : vector<16x1xi1> to vector<16x1xi1>
    %210 = arith.xori %206, %209 : vector<16x1xi1>
    %211 = arith.andi %210, %204 : vector<16x1xi1>
    %212 = vector.broadcast %200 : i32 to vector<16x1xi32>
    %213 = arith.addi %202, %212 : vector<16x1xi32>
    %214 = arith.select %211, %213, %202 : vector<16x1xi1>, vector<16x1xi32>
    %c0_i32_71 = arith.constant 0 : i32
    %215 = vector.broadcast %c0_i32_71 : i32 to vector<16x1xi32>
    %216 = arith.cmpi eq, %214, %215 : vector<16x1xi32>
    %c1_i32_72 = arith.constant 1 : i32
    %217 = tpu.dynamic_rotate %197 by %c1_i32_72 dim 0 : vector<16x128xf32>, i32 -> vector<16x128xf32>
    %cst_73 = arith.constant 0.000000e+00 : f32
    %218 = vector.shape_cast %216 : vector<16x1xi1> to vector<16x1xi1>
    %219 = vector.broadcast %218 : vector<16x1xi1> to vector<16x128xi1>
    %220 = vector.broadcast %cst_73 : f32 to vector<16x128xf32>
    %221 = arith.select %219, %220, %217 : vector<16x128xi1>, vector<16x128xf32>
    %c15_i32 = arith.constant 15 : i32
    %222 = vector.broadcast %c15_i32 : i32 to vector<16x1xi32>
    %223 = arith.cmpi eq, %214, %222 : vector<16x1xi32>
    %c15_i32_74 = arith.constant 15 : i32
    %224 = tpu.dynamic_rotate %197 by %c15_i32_74 dim 0 : vector<16x128xf32>, i32 -> vector<16x128xf32>
    %cst_75 = arith.constant 0.000000e+00 : f32
    %225 = vector.shape_cast %223 : vector<16x1xi1> to vector<16x1xi1>
    %226 = vector.broadcast %225 : vector<16x1xi1> to vector<16x128xi1>
    %227 = vector.broadcast %cst_75 : f32 to vector<16x128xf32>
    %228 = arith.select %226, %227, %224 : vector<16x128xi1>, vector<16x128xf32>
    %229 = arith.truncf %221 : vector<16x128xf32> to vector<16x128xbf16>
    %c0_76 = arith.constant 0 : index
    %c0_77 = arith.constant 0 : index
    %230 = vector.load %arg8[%c0_76, %c0_77] : memref<384x128xbf16, #tpu.memory_space<vmem>>, vector<128x128xbf16>
    %cst_78 = arith.constant dense<0.000000e+00> : vector<16x128xf32>
    %231 = tpu.matmul %229, %230, %cst_78 {dimension_numbers = #tpu.dot_dimension_numbers<[1], [0], [0], [1], [0, 0, 1, 1], [], []>} : vector<16x128xbf16>, vector<128x128xbf16>, vector<16x128xf32> -> vector<16x128xf32>
    %232 = arith.truncf %197 : vector<16x128xf32> to vector<16x128xbf16>
    %c128_79 = arith.constant 128 : index
    %c0_80 = arith.constant 0 : index
    %233 = vector.load %arg8[%c128_79, %c0_80] : memref<384x128xbf16, #tpu.memory_space<vmem>>, vector<128x128xbf16>
    %cst_81 = arith.constant dense<0.000000e+00> : vector<16x128xf32>
    %234 = tpu.matmul %232, %233, %cst_81 {dimension_numbers = #tpu.dot_dimension_numbers<[1], [0], [0], [1], [0, 0, 1, 1], [], []>} : vector<16x128xbf16>, vector<128x128xbf16>, vector<16x128xf32> -> vector<16x128xf32>
    %235 = arith.addf %231, %234 : vector<16x128xf32>
    %236 = arith.truncf %228 : vector<16x128xf32> to vector<16x128xbf16>
    %c256 = arith.constant 256 : index
    %c0_82 = arith.constant 0 : index
    %237 = vector.load %arg8[%c256, %c0_82] : memref<384x128xbf16, #tpu.memory_space<vmem>>, vector<128x128xbf16>
    %cst_83 = arith.constant dense<0.000000e+00> : vector<16x128xf32>
    %238 = tpu.matmul %236, %237, %cst_83 {dimension_numbers = #tpu.dot_dimension_numbers<[1], [0], [0], [1], [0, 0, 1, 1], [], []>} : vector<16x128xbf16>, vector<128x128xbf16>, vector<16x128xf32> -> vector<16x128xf32>
    %239 = arith.addf %235, %238 : vector<16x128xf32>
    %240 = vector.broadcast %185 : vector<1x128xf32> to vector<16x128xf32>
    %241 = arith.mulf %239, %240 : vector<16x128xf32>
    %242 = vector.broadcast %186 : vector<1x128xf32> to vector<16x128xf32>
    %243 = arith.addf %241, %242 : vector<16x128xf32>
    %cst_84 = arith.constant 0.000000e+00 : f32
    %244 = vector.broadcast %cst_84 : f32 to vector<16x128xf32>
    %245 = arith.maximumf %243, %244 : vector<16x128xf32>
    %246 = vector.shape_cast %245 : vector<16x128xf32> to vector<1x16x128xf32>
    %c0_85 = arith.constant 0 : index
    %c0_86 = arith.constant 0 : index
    %c0_87 = arith.constant 0 : index
    %247 = vector.load %arg3[%c0_85, %c0_86, %c0_87] : memref<1x8x128xf32, #tpu.memory_space<vmem>>, vector<1x8x128xf32>
    %248 = vector.extract_strided_slice %183 {offsets = [3, 0], sizes = [1, 128], strides = [1, 1]} : vector<5x128xf32> to vector<1x128xf32>
    %249 = vector.shape_cast %248 : vector<1x128xf32> to vector<1x1x128xf32>
    %250 = vector.broadcast %249 : vector<1x1x128xf32> to vector<1x8x128xf32>
    %251 = arith.mulf %247, %250 : vector<1x8x128xf32>
    %cst_88 = arith.constant dense<0.000000e+00> : vector<1x8xf32>
    %252 = vector.multi_reduction <add>, %251, %cst_88 [2] : vector<1x8x128xf32> to vector<1x8xf32>
    %253 = vector.shape_cast %252 : vector<1x8xf32> to vector<1x8x1xf32>
    %cst_89 = arith.constant dense<0xFF800000> : vector<1x1xf32>
    %254 = vector.multi_reduction <maximumf>, %253, %cst_89 [1] : vector<1x8x1xf32> to vector<1x1xf32>
    %255 = vector.shape_cast %254 : vector<1x1xf32> to vector<1x1x1xf32>
    %256 = vector.broadcast %255 : vector<1x1x1xf32> to vector<1x8x1xf32>
    %257 = arith.subf %253, %256 : vector<1x8x1xf32>
    %258 = math.exp %257 : vector<1x8x1xf32>
    %cst_90 = arith.constant dense<0.000000e+00> : vector<1x1xf32>
    %259 = vector.multi_reduction <add>, %258, %cst_90 [1] : vector<1x8x1xf32> to vector<1x1xf32>
    %260 = vector.shape_cast %259 : vector<1x1xf32> to vector<1x1x1xf32>
    %261 = tpu.reciprocal %260 {approx = true} : vector<1x1x1xf32> -> vector<1x1x1xf32>
    %262 = vector.broadcast %261 : vector<1x1x1xf32> to vector<1x8x1xf32>
    %263 = arith.mulf %258, %262 : vector<1x8x1xf32>
    %264 = vector.broadcast %263 : vector<1x8x1xf32> to vector<1x8x128xf32>
    %265 = arith.mulf %247, %264 : vector<1x8x128xf32>
    %cst_91 = arith.constant dense<0.000000e+00> : vector<1x128xf32>
    %266 = vector.multi_reduction <add>, %265, %cst_91 [1] : vector<1x8x128xf32> to vector<1x128xf32>
    %267 = vector.shape_cast %266 : vector<1x128xf32> to vector<1x1x128xf32>
    %c0_92 = arith.constant 0 : index
    %c0_93 = arith.constant 0 : index
    %c0_94 = arith.constant 0 : index
    %268 = vector.load %arg4[%c0_92, %c0_93, %c0_94] : memref<1x8x128xf32, #tpu.memory_space<vmem>>, vector<1x8x128xf32>
    %269 = vector.extract_strided_slice %183 {offsets = [4, 0], sizes = [1, 128], strides = [1, 1]} : vector<5x128xf32> to vector<1x128xf32>
    %270 = vector.shape_cast %269 : vector<1x128xf32> to vector<1x1x128xf32>
    %271 = vector.broadcast %270 : vector<1x1x128xf32> to vector<1x8x128xf32>
    %272 = arith.mulf %268, %271 : vector<1x8x128xf32>
    %cst_95 = arith.constant dense<0.000000e+00> : vector<1x8xf32>
    %273 = vector.multi_reduction <add>, %272, %cst_95 [2] : vector<1x8x128xf32> to vector<1x8xf32>
    %274 = vector.shape_cast %273 : vector<1x8xf32> to vector<1x8x1xf32>
    %cst_96 = arith.constant dense<0xFF800000> : vector<1x1xf32>
    %275 = vector.multi_reduction <maximumf>, %274, %cst_96 [1] : vector<1x8x1xf32> to vector<1x1xf32>
    %276 = vector.shape_cast %275 : vector<1x1xf32> to vector<1x1x1xf32>
    %277 = vector.broadcast %276 : vector<1x1x1xf32> to vector<1x8x1xf32>
    %278 = arith.subf %274, %277 : vector<1x8x1xf32>
    %279 = math.exp %278 : vector<1x8x1xf32>
    %cst_97 = arith.constant dense<0.000000e+00> : vector<1x1xf32>
    %280 = vector.multi_reduction <add>, %279, %cst_97 [1] : vector<1x8x1xf32> to vector<1x1xf32>
    %281 = vector.shape_cast %280 : vector<1x1xf32> to vector<1x1x1xf32>
    %282 = tpu.reciprocal %281 {approx = true} : vector<1x1x1xf32> -> vector<1x1x1xf32>
    %283 = vector.broadcast %282 : vector<1x1x1xf32> to vector<1x8x1xf32>
    %284 = arith.mulf %279, %283 : vector<1x8x1xf32>
    %285 = vector.broadcast %284 : vector<1x8x1xf32> to vector<1x8x128xf32>
    %286 = arith.mulf %268, %285 : vector<1x8x128xf32>
    %cst_98 = arith.constant dense<0.000000e+00> : vector<1x128xf32>
    %287 = vector.multi_reduction <add>, %286, %cst_98 [1] : vector<1x8x128xf32> to vector<1x128xf32>
    %288 = vector.shape_cast %287 : vector<1x128xf32> to vector<1x1x128xf32>
    %cst_99 = arith.constant dense<0.000000e+00> : vector<1x128xf32>
    %289 = vector.multi_reduction <add>, %246, %cst_99 [1] : vector<1x16x128xf32> to vector<1x128xf32>
    %290 = vector.shape_cast %289 : vector<1x128xf32> to vector<1x1x128xf32>
    %cst_100 = arith.constant 6.250000e-02 : f32
    %291 = vector.broadcast %cst_100 : f32 to vector<1x1x128xf32>
    %292 = arith.mulf %290, %291 : vector<1x1x128xf32>
    %293 = vector.broadcast %292 : vector<1x1x128xf32> to vector<1x16x128xf32>
    %294 = arith.subf %246, %293 : vector<1x16x128xf32>
    %295 = arith.mulf %294, %294 : vector<1x16x128xf32>
    %cst_101 = arith.constant dense<0.000000e+00> : vector<1x128xf32>
    %296 = vector.multi_reduction <add>, %295, %cst_101 [1] : vector<1x16x128xf32> to vector<1x128xf32>
    %297 = vector.shape_cast %296 : vector<1x128xf32> to vector<1x1x128xf32>
    %cst_102 = arith.constant 0.0666666701 : f32
    %298 = vector.broadcast %cst_102 : f32 to vector<1x1x128xf32>
    %299 = arith.mulf %297, %298 : vector<1x1x128xf32>
    %cst_103 = arith.constant 9.99999974E-6 : f32
    %300 = vector.broadcast %cst_103 : f32 to vector<1x1x128xf32>
    %301 = arith.addf %299, %300 : vector<1x1x128xf32>
    %302 = math.rsqrt %301 : vector<1x1x128xf32>
    %303 = vector.broadcast %302 : vector<1x1x128xf32> to vector<1x16x128xf32>
    %304 = arith.mulf %294, %303 : vector<1x16x128xf32>
    %305 = vector.broadcast %288 : vector<1x1x128xf32> to vector<1x16x128xf32>
    %306 = arith.mulf %304, %305 : vector<1x16x128xf32>
    %307 = vector.broadcast %267 : vector<1x1x128xf32> to vector<1x16x128xf32>
    %308 = arith.addf %306, %307 : vector<1x16x128xf32>
    %c0_104 = arith.constant 0 : index
    %c0_105 = arith.constant 0 : index
    %c0_106 = arith.constant 0 : index
    %309 = vector.load %arg10[%c0_104, %c0_105, %c0_106] : memref<1x16x128xf32, #tpu.memory_space<vmem>>, vector<1x16x128xf32>
    tpu.vector_store %arg10[%c0_104, %c0_105, %c0_106], %308 {strides = array<i32>} : memref<1x16x128xf32, #tpu.memory_space<vmem>>, vector<1x16x128xf32>,
    return
  }
  func.func @transform_0(%arg0: i32) -> (i32, i32, i32) {
    %c0_i32 = arith.constant 0 : i32
    %c0_i32_0 = arith.constant 0 : i32
    %c0_i32_1 = arith.constant 0 : i32
    return %arg0, %c0_i32, %c0_i32_0 : i32, i32, i32
  }
  func.func @transform_1(%arg0: i32) -> (i32, i32, i32) {
    %c0_i32 = arith.constant 0 : i32
    %c0_i32_0 = arith.constant 0 : i32
    %c0_i32_1 = arith.constant 0 : i32
    return %arg0, %c0_i32, %c0_i32_0 : i32, i32, i32
  }
  func.func @transform_2(%arg0: i32) -> (i32, i32, i32) {
    %c0_i32 = arith.constant 0 : i32
    %c0_i32_0 = arith.constant 0 : i32
    %c0_i32_1 = arith.constant 0 : i32
    return %arg0, %c0_i32, %c0_i32_0 : i32, i32, i32
  }
  func.func @transform_3(%arg0: i32) -> (i32, i32, i32) {
    %c0_i32 = arith.constant 0 : i32
    %c0_i32_0 = arith.constant 0 : i32
    %c0_i32_1 = arith.constant 0 : i32
    return %arg0, %c0_i32, %c0_i32_0 : i32, i32, i32
  }
  func.func @transform_4(%arg0: i32) -> (i32, i32, i32) {
    %c0_i32 = arith.constant 0 : i32
    %c0_i32_0 = arith.constant 0 : i32
    %c0_i32_1 = arith.constant 0 : i32
    %c0_i32_2 = arith.constant 0 : i32
    return %c0_i32, %c0_i32_0, %c0_i32_1 : i32, i32, i32
  }
  func.func @transform_5(%arg0: i32) -> (i32, i32) {
    %c0_i32 = arith.constant 0 : i32
    %c0_i32_0 = arith.constant 0 : i32
    %c0_i32_1 = arith.constant 0 : i32
    return %c0_i32, %c0_i32_0 : i32, i32
  }
  func.func @transform_6(%arg0: i32) -> (i32, i32) {
    %c0_i32 = arith.constant 0 : i32
    %c0_i32_0 = arith.constant 0 : i32
    %c0_i32_1 = arith.constant 0 : i32
    return %c0_i32, %c0_i32_0 : i32, i32
  }
  func.func @transform_7(%arg0: i32) -> (i32, i32) {
    %c0_i32 = arith.constant 0 : i32
    %c0_i32_0 = arith.constant 0 : i32
    %c0_i32_1 = arith.constant 0 : i32
    return %c0_i32, %c0_i32_0 : i32, i32
  }
  func.func @transform_8(%arg0: i32) -> (i32, i32) {
    %c0_i32 = arith.constant 0 : i32
    %c0_i32_0 = arith.constant 0 : i32
    %c0_i32_1 = arith.constant 0 : i32
    return %c0_i32, %c0_i32_0 : i32, i32
  }
  func.func @transform_9(%arg0: i32) -> (i32, i32, i32) {
    %c0_i32 = arith.constant 0 : i32
    %c0_i32_0 = arith.constant 0 : i32
    %c0_i32_1 = arith.constant 0 : i32
    return %arg0, %c0_i32, %c0_i32_0 : i32, i32, i32
  }
}

</mosaic_0001>

<bundles_post_ra>
// kernel: tpu_custom_call.1
= control target key start
LH: loop header
LB: loop body
LE: loop exit
PB: predicated region body
PF: predicated region fallthrough
CT: control target
= control target key end

     0   :  { %s4243_s0 = inlined_call_operand.hbm [shape: f32[2,16,128], index: 0, kind: input, shape index: {}]   ;;  %s4244_s1 = inlined_call_operand.hbm [shape: f32[2,16,128], index: 1, kind: input, shape index: {}]   ;;  %s4245_s2 = inlined_call_operand.hbm [shape: f32[2,8,128], index: 2, kind: input, shape index: {}]   ;;  %s4246_s3 = inlined_call_operand.hbm [shape: f32[2,8,128], index: 3, kind: input, shape index: {}]   ;;  %s4247_s4 = inlined_call_operand.hbm [shape: bf16[4,128,128], index: 4, kind: input, shape index: {}]   ;;  %s4248_s5 = inlined_call_operand.hbm [shape: bf16[128,256], index: 5, kind: input, shape index: {}]   ;;  %s4249_s6 = inlined_call_operand.hbm [shape: bf16[256,128], index: 6, kind: input, shape index: {}]   ;;  %s4250_s7 = inlined_call_operand.hbm [shape: bf16[384,128], index: 7, kind: input, shape index: {}]   ;;  %s4251_s8 = inlined_call_operand.vmem [shape: f32[5,128], index: 8, kind: input, shape index: {}]   ;;  %s4252_s9 = inlined_call_operand.hbm [shape: f32[2,16,128], index: 9, kind: output, shape index: {}]  }
   0x1   :  { %4286 = sst [smem:[#allocation31_spill]] %s4244_s1 }
   0x2   :  { %4287 = sst [smem:[#allocation32_spill]] %s4247_s4 }
   0x3   :  { %4288 = sst [smem:[#allocation33_spill]] %s4248_s5 }
   0x4   :  { %4289 = sst [smem:[#allocation34_spill]] %s4251_s8 }
   0x5   :  { %4290 = sst [smem:[#allocation35_spill]] %s4252_s9 }
   0x6   :  { %14 = vsyncpa [#allocation3], 0 }
   0x7   :  { %16 = vsyncpa [#allocation3 + $0x1], 0 }
   0x8   :  { %17 = vsyncpa [#allocation6], 0 }
   0x9   :  { %19 = vsyncpa [#allocation6 + $0x1], 0 }
   0xa   :  { %20 = vsyncpa [#allocation9], 0 }
   0xb   :  { %22 = vsyncpa [#allocation9 + $0x1], 0 }
   0xc   :  { %23 = vsyncpa [#allocation12], 0 }
   0xd   :  { %24 = vsyncpa [#allocation15], 0 }
   0xe   :  { %25 = vsyncpa [#allocation4], 0 }
   0xf   :  { %27 = vsyncpa [#allocation4 + $0x1], 0  ;;  %s3565_s30 = smov 0   ;;  %s3567_s10 = smov 0  }
  0x10   :  { %s3569_s11 = smov 0   ;;  %s3571_s12 = smov 0  }
  0x11 LB: > { %4291 = sst [smem:[#allocation24_spill]] %s3482_s30  ;;  %s3586_s13 = sadd.s32 4294967295, %s3494_s12   ;;  %s3494_s12 = sphi %s3571_s12, %s4340_s12   ;;  %s3490_s11 = sphi %s3569_s11, %s4342_s11   ;;  %s3486_s10 = sphi %s3567_s10, %s4344_s10   ;;  %s3482_s30 = sphi %s3565_s30, %s4343_s30  }
  0x12   : > { %4292 = sst [smem:[#allocation25_spill]] %s3490_s11  ;;  %s2455_s14 = sadd.s32 4294967294, %s3494_s12  }
  0x13   : > { %4293 = sst [smem:[#allocation26_spill]] %s3586_s13  ;;  %p53_p0 = scmp.ne.s32.totalorder %s3486_s10, %s3482_s30 }
  0x14   : > { %p4253_p1 = scmp.eq.s32.totalorder %s3586_s13, 0  ;;  %p266_p3 = scmp.eq.s32.totalorder %s2455_s14, 1 }
  0x15   : > { %p2456_p5 = scmp.ge.s32.totalorder %s3494_s12, 1  ;;  %p273_p7 = scmp.lt.s32.totalorder %s3494_s12, 3 }
  0x16   : > { %p3595_p4 = por %p4253_p1, %p53_p0  ;;  %p3600_p6 = por %p266_p3, %p53_p0 }
  0x17   : > { %p3605_p8 = pnand %p2456_p5, %p273_p7  ;;  %s3496_s18 = smov [#allocation10]  }
  0x18   : > { %s4294_s15 = scalar_select %p3595_p4, 1, 0 }
  0x19   : > { %s4295_s16 = scalar_select %p3600_p6, 1, 0 }
  0x1a   : > { %s4297_s17 = scalar_select %p3605_p8, 1, 0 }
  0x1b   : > { %4296 = sst [smem:[#allocation27_spill]] %s4295_s16  ;;  %s285_s19 = sshll.u32 %s3496_s18, 4  ;;  %s3609_s19 = int_to_ptr.vmem [resolvable:$true] %s285_s19 }
  0x1c   : > { %p2960_p9 = pneg %p3605_p8  ;;  %s3497_s21 = smov [#allocation11]  }
  0x1d   : > { %s298_s22 = sshll.u32 %s3497_s21, 4  ;;  %s4299_s4 = sld [smem:[#allocation32_spill]]  ;;  %s3620_s22 = int_to_ptr.vmem [resolvable:$true] %s298_s22 }
  0x1e   : > { %p3616_p11 = pnand %p2960_p9, %p4253_p1 }
  0x20   : > { %s4298_s20 = scalar_select %p3616_p11, 1, 0 }
  0x21   : > { %p3630_p13 = pneg %p3616_p11 }
  0x23   : > { %s3176_s25 = scalar_lea.hbm %s4299_s4, 4096 }
  0x24   : > { %p3177_p12 = scmp.ne.s32.totalorder %s4299_s4, %s3176_s25  ;;  %p3183_p5 = scmp.lt.u32.totalorder %s3176_s25, %s4299_s4 }
  0x25   : > { %s4300_s28 = scalar_select %p3630_p13, 1, 0 }
  0x26   : > { %p3179_p0 = pnand %p3630_p13, %p3177_p12 }
  0x28   : > { %p3180_p3 = pneg %p3179_p0 }
  0x2a   : > { %p3185_p7 = pnand %p3183_p5, %p3180_p3 }
  0x2c   : > { %3188 = shalt.err (!%p3185_p7)
}
  0x2d   : > { %s3189_s18 = scalar_lea.vmem %s3609_s19, 4096  ;;  %p3197_p2 = scmp.lt.s32.totalorder %s3609_s19, %s3609_s19 }
  0x2e   : > { %p3190_p9 = scmp.ne.s32.totalorder %s3609_s19, %s3189_s18  ;;  %p3198_p6 = scmp.lt.s32.totalorder %s3189_s18, %s3189_s18 }
  0x30   : > { %p3192_p10 = pnand %p3190_p9, %p3630_p13  ;;  %p3199_p12 = por %p3198_p6, %p3197_p2 }
  0x32   : > { %p3193_p1 = pneg %p3192_p10 }
  0x34   : > { %p3200_p0 = pnand %p3199_p12, %p3193_p1 }
  0x36   : > { %3203 = shalt.err (!%p3200_p0)
}
  0x37   : > { %s4256_s21 = smov 64   ;;  %s4258_s23 = smov 4  }
  0x38   : > { %2963 = dma.hbm_to_vmem [thread:$0]  (!%p3616_p11), %s4299_s4, 4096, %s3609_s19, [#allocation9], %s4256_s21, %s4256_s21, %s4258_s23  }
  0x39   : > { %s4301_s5 = sld [smem:[#allocation33_spill]] }
  0x3f   : > { %s3204_s29 = scalar_lea.hbm %s4301_s5, 2048 }
  0x40   : > { %p3205_p1 = scmp.ne.s32.totalorder %s4301_s5, %s3204_s29  ;;  %p3211_p10 = scmp.lt.u32.totalorder %s3204_s29, %s4301_s5 }
  0x42   : > { %p3207_p2 = pnand %p3205_p1, %p3630_p13 }
  0x44   : > { %p3208_p6 = pneg %p3207_p2 }
  0x46   : > { %p3213_p3 = pnand %p3211_p10, %p3208_p6 }
  0x48   : > { %3216 = shalt.err (!%p3213_p3)
}
  0x49   : > { %s3217_s19 = scalar_lea.vmem %s3620_s22, 2048  ;;  %p3225_p12 = scmp.lt.s32.totalorder %s3620_s22, %s3620_s22 }
  0x4a   : > { %p3218_p5 = scmp.ne.s32.totalorder %s3620_s22, %s3217_s19  ;;  %p3226_p0 = scmp.lt.s32.totalorder %s3217_s19, %s3217_s19 }
  0x4c   : > { %p3220_p7 = pnand %p3218_p5, %p3630_p13  ;;  %p3227_p1 = por %p3226_p0, %p3225_p12 }
  0x4e   : > { %p3221_p9 = pneg %p3220_p7 }
  0x50   : > { %p3228_p2 = pnand %p3227_p1, %p3221_p9 }
  0x52   : > { %3231 = shalt.err (!%p3228_p2)
}
  0x53   : > { %s4260_s24 = smov 128   ;;  %s4262_s30 = smov 8  }
  0x54   : > { %2966 = dma.hbm_to_vmem [thread:$0]  (!%p3616_p11), %s4301_s5, 2048, %s3620_s22, [#allocation12], %s4260_s24, %s4260_s24, %s4262_s30  }
  0x55   : > { %s3681_s26 = sadd.s32 1, %s3494_s12   ;;  %s40_s29 = sadd.s32 1, %s3490_s11 }
  0x56   : > { %4302 = sst [smem:[#allocation28_spill]] %s3681_s26  ;;  %s37_s27 = ssub.s32 %s3494_s12, %s3681_s26 }
  0x57   : > { %p38_p6 = scmp.eq.s32.totalorder %s37_s27, 0  ;;  %p47_p10 = scmp.ne.s32.totalorder %s3490_s11, %s3486_s10 }
  0x58   : > { %p48_p3 = scmp.eq.s32.totalorder %s3494_s12, 0  ;;  %p4304_p7 = scmp.eq.s32.totalorder %s3586_s13, 1 }
  0x59   : > { %s3690_s14 = scalar_select %p38_p6, %s3490_s11, %s40_s29  }
  0x5a   : > { %p49_p5 = por %p48_p3, %p47_p10  ;;  %p3694_p9 = por %p4304_p7, %p47_p10 }
  0x5b   : > { %4303 = sst [smem:[#allocation29_spill]] %s3690_s14  ;;  %p2994_p12 = scmp.lt.s32.totalorder %s3494_s12, 2 }
  0x5c   : > { %s4305_s18 = scalar_select %p3694_p9, 1, 0 }
  0x5d   : > { %s3700_s22 = sand.u32 1, %s3490_s11   ;;  %s4266_s16 = sshll.u32 %s3494_s12, 8 }
  0x5e   : > { %4306 = sst [smem:[#allocation30_spill]] %s4305_s18  ;;  %s4265_s19 = sshll.u32 %s3700_s22, 4 }
  0x5f   : > { %p3704_p0 = pnand %p2994_p12, %p49_p5  ;;  %s4269_s27 = sand.u32 1, %s3494_s12  }
  0x60   : > { %s4308_s1 = sld [smem:[#allocation31_spill]]  ;;  %s366_s24 = scalar_lea.vmem [#allocation5], %s4265_s19 }
  0x61   : > { %s4307_s25 = scalar_select %p3704_p0, 1, 0 }
  0x62   : > { %s373_s30 = sshll.u32 %s366_s24, 4  ;;  %s3502_s4 = smov [#allocation13]   ;;  %s3718_s30 = int_to_ptr.vmem [resolvable:$true] %s373_s30 }
  0x63   : > { %s3720_s5 = sshll.u32 %s3502_s4, 4  ;;  %s3724_s14 = scalar_lea.sflag [#allocation6], %s4269_s27  ;;  %s312_s5 = int_to_ptr.vmem [resolvable:$true] %s3720_s5 }
  0x64   : > { %p3730_p2 = pneg %p3704_p0 }
  0x66   : > { %s3714_s23 = scalar_lea.hbm %s4308_s1, %s4266_s16  ;;  %s3237_s19 = scalar_lea.hbm %s4308_s1, 512 }
  0x67   : > { %s3232_s11 = scalar_lea.hbm %s3714_s23, 256  ;;  %p3238_p3 = scmp.lt.u32.totalorder %s3714_s23, %s4308_s1 }
  0x68   : > { %p3233_p1 = scmp.ne.s32.totalorder %s3714_s23, %s3232_s11  ;;  %p3239_p5 = scmp.lt.u32.totalorder %s3237_s19, %s3232_s11 }
  0x69   : > { %s4309_s21 = scalar_select %p3730_p2, 1, 0 }
  0x6a   : > { %p3235_p6 = pnand %p3730_p2, %p3233_p1  ;;  %p3240_p7 = por %p3239_p5, %p3238_p3 }
  0x6b   : > { %p3241_p12 = scmp.lt.u32.totalorder %s3232_s11, %s3714_s23 }
  0x6c   : > { %p3236_p10 = pneg %p3235_p6 }
  0x6d   : > { %p3242_p9 = por %p3241_p12, %p3240_p7 }
  0x6f   : > { %p3243_p4 = pnand %p3242_p9, %p3236_p10 }
  0x71   : > { %3246 = shalt.err (!%p3243_p4)
}
  0x72   : > { %s3247_s27 = scalar_lea.vmem %s3718_s30, 256  ;;  %s3503_s24 = smov [#allocation5]  }
  0x73   : > { %p3248_p1 = scmp.ne.s32.totalorder %s3718_s30, %s3247_s27  ;;  %s3252_s29 = sshll.u32 %s3503_s24, 4  ;;  %s3253_s29 = int_to_ptr.vmem [resolvable:$false] %s3252_s29 }
  0x74   : > { %s3254_s16 = scalar_lea.vmem %s3253_s29, 512  ;;  %p3255_p11 = scmp.lt.s32.totalorder %s3718_s30, %s3253_s29 }
  0x75   : > { %p3250_p6 = pnand %p3248_p1, %p3730_p2  ;;  %p3256_p13 = scmp.lt.s32.totalorder %s3254_s16, %s3247_s27 }
  0x77   : > { %p3251_p8 = pneg %p3250_p6  ;;  %p3257_p3 = por %p3256_p13, %p3255_p11 }
  0x79   : > { %p3258_p5 = pnand %p3257_p3, %p3251_p8 }
  0x7b   : > { %3261 = shalt.err (!%p3258_p5)
}
  0x7c   : > { %s4310_s11 = smov 8   ;;  %s4311_s19 = smov 128  }
  0x7d   : > { %2979 = dma.hbm_to_vmem [thread:$0]  (!%p3704_p0), %s3714_s23, 256, %s3718_s30, %s3724_s14, %s4311_s19, %s4311_s19, %s4310_s11  }
  0x7e   : > { %s3262_s29 = scalar_lea.hbm %s4249_s6, 2048  ;;  %p4312_p8 = scmp.ne.s32.totalorder %s4300_s28, 0 }
  0x7f   : > { %p3263_p4 = scmp.ne.s32.totalorder %s4249_s6, %s3262_s29  ;;  %p3269_p9 = scmp.lt.u32.totalorder %s3262_s29, %s4249_s6 }
  0x81   : > { %p3265_p11 = pnand %p3263_p4, %p4312_p8 }
  0x83   : > { %p3266_p13 = pneg %p3265_p11 }
  0x85   : > { %p3271_p10 = pnand %p3269_p9, %p3266_p13 }
  0x87   : > { %3274 = shalt.err (!%p3271_p10)
}
  0x88   : > { %s3275_s9 = scalar_lea.vmem %s312_s5, 2048  ;;  %p3283_p6 = scmp.lt.s32.totalorder %s312_s5, %s312_s5 }
  0x89   : > { %p3276_p7 = scmp.ne.s32.totalorder %s312_s5, %s3275_s9  ;;  %p3284_p3 = scmp.lt.s32.totalorder %s3275_s9, %s3275_s9 }
  0x8b   : > { %p3278_p12 = pnand %p3276_p7, %p4312_p8  ;;  %p3285_p5 = por %p3284_p3, %p3283_p6 }
  0x8d   : > { %p3279_p1 = pneg %p3278_p12 }
  0x8f   : > { %p3286_p0 = pnand %p3285_p5, %p3279_p1 }
  0x91   : > { %3289 = shalt.err (!%p3286_p0)
}
  0x92   : > { %p4313_p4 = scmp.ne.s32.totalorder %s4298_s20, 0  ;;  %s4314_s23 = smov 4  }
  0x93   : > { %s4315_s30 = smov 64   ;;  %s3504_s4 = smov [#allocation14]  }
  0x94   : > { %2969 = dma.hbm_to_vmem [thread:$0]  (!%p4313_p4), %s4249_s6, 2048, %s312_s5, [#allocation12], %s4315_s30, %s4315_s30, %s4314_s23  }
  0x95   : > { %s324_s24 = sshll.u32 %s3504_s4, 4  ;;  %s3290_s9 = scalar_lea.hbm %s4250_s7, 3072  ;;  %s325_s24 = int_to_ptr.vmem [resolvable:$true] %s324_s24 }
  0x96   : > { %p3291_p0 = scmp.ne.s32.totalorder %s4250_s7, %s3290_s9  ;;  %p3297_p9 = scmp.lt.u32.totalorder %s3290_s9, %s4250_s7 }
  0x98   : > { %p3293_p11 = pnand %p3291_p0, %p4312_p8 }
  0x9a   : > { %p3294_p13 = pneg %p3293_p11 }
  0x9c   : > { %p3299_p10 = pnand %p3297_p9, %p3294_p13 }
  0x9e   : > { %3302 = shalt.err (!%p3299_p10)
}
  0x9f   : > { %s3303_s5 = scalar_lea.vmem %s325_s24, 3072  ;;  %p3311_p6 = scmp.lt.s32.totalorder %s325_s24, %s325_s24 }
  0xa0   : > { %p3304_p7 = scmp.ne.s32.totalorder %s325_s24, %s3303_s5  ;;  %p3312_p3 = scmp.lt.s32.totalorder %s3303_s5, %s3303_s5 }
  0xa2   : > { %p3306_p12 = pnand %p3304_p7, %p4312_p8  ;;  %p3313_p5 = por %p3312_p3, %p3311_p6 }
  0xa4   : > { %p3307_p1 = pneg %p3306_p12 }
  0xa6   : > { %p3314_p2 = pnand %p3313_p5, %p3307_p1 }
  0xa8   : > { %3317 = shalt.err (!%p3314_p2)
}
  0xa9   : > { %2972 = dma.hbm_to_vmem [thread:$0]  (!%p4313_p4), %s4250_s7, 3072, %s325_s24, [#allocation15], %s4315_s30, %s4315_s30, %s4314_s23  }
  0xaa   : > { %s4316_s28 = sshll.u32 %s3494_s12, 8  ;;  %s4317_s4 = sshll.u32 %s3700_s22, 4 }
  0xab   : > { %s3805_s26 = scalar_lea.hbm %s4243_s0, %s4316_s28  ;;  %s345_s20 = scalar_lea.vmem [#allocation2], %s4317_s4 }
  0xac   : > { %s352_s29 = sshll.u32 %s345_s20, 4  ;;  %s2468_s27 = sshll.u32 %s3700_s22, 3  ;;  %s3809_s29 = int_to_ptr.vmem [resolvable:$true] %s352_s29 }
  0xad   : > { %s342_s9 = scalar_lea.sflag [#allocation3], %s3700_s22  ;;  %s3318_s16 = scalar_lea.hbm %s3805_s26, 256 }
  0xae   : > { %p3319_p2 = scmp.ne.s32.totalorder %s3805_s26, %s3318_s16  ;;  %p4318_p8 = scmp.ne.s32.totalorder %s4309_s21, 0 }
  0xaf   : > { %s3323_s24 = scalar_lea.hbm %s4243_s0, 512  ;;  %p3324_p11 = scmp.lt.u32.totalorder %s3805_s26, %s4243_s0 }
  0xb0   : > { %p3321_p4 = pnand %p3319_p2, %p4318_p8  ;;  %p3325_p13 = scmp.lt.u32.totalorder %s3323_s24, %s3318_s16 }
  0xb1   : > { %p3327_p10 = scmp.lt.u32.totalorder %s3318_s16, %s3805_s26 }
  0xb2   : > { %p3322_p0 = pneg %p3321_p4  ;;  %p3326_p9 = por %p3325_p13, %p3324_p11 }
  0xb4   : > { %p3328_p7 = por %p3327_p10, %p3326_p9 }
  0xb6   : > { %p3329_p12 = pnand %p3328_p7, %p3322_p0 }
  0xb8   : > { %3332 = shalt.err (!%p3329_p12)
}
  0xb9   : > { %s3333_s13 = scalar_lea.vmem %s3809_s29, 256  ;;  %s3505_s28 = smov [#allocation2]  }
  0xba   : > { %p3334_p1 = scmp.ne.s32.totalorder %s3809_s29, %s3333_s13  ;;  %s3338_s18 = sshll.u32 %s3505_s28, 4  ;;  %s3339_s18 = int_to_ptr.vmem [resolvable:$false] %s3338_s18 }
  0xbb   : > { %s3340_s1 = scalar_lea.vmem %s3339_s18, 512  ;;  %p3341_p5 = scmp.lt.s32.totalorder %s3809_s29, %s3339_s18 }
  0xbc   : > { %p3336_p6 = pnand %p3334_p1, %p4318_p8  ;;  %p3342_p2 = scmp.lt.s32.totalorder %s3340_s1, %s3333_s13 }
  0xbe   : > { %p3337_p3 = pneg %p3336_p6  ;;  %p3343_p4 = por %p3342_p2, %p3341_p5 }
  0xc0   : > { %p3344_p11 = pnand %p3343_p4, %p3337_p3 }
  0xc2   : > { %3347 = shalt.err (!%p3344_p11)
}
  0xc3   : > { %p4319_p0 = scmp.ne.s32.totalorder %s4307_s25, 0  ;;  %s2469_s4 = sshll.u32 %s3494_s12, 7 }
  0xc4   : > { %s3845_s23 = scalar_lea.hbm %s4245_s2, %s2469_s4  ;;  %s387_s30 = scalar_lea.vmem [#allocation7], %s2468_s27 }
  0xc5   : > { %2976 = dma.hbm_to_vmem [thread:$0]  (!%p4319_p0), %s3805_s26, 256, %s3809_s29, %s342_s9, %s4311_s19, %s4311_s19, %s4310_s11  }
  0xc6   : > { %s394_s24 = sshll.u32 %s387_s30, 4  ;;  %s3348_s5 = scalar_lea.hbm %s3845_s23, 128  ;;  %s395_s24 = int_to_ptr.vmem [resolvable:$true] %s394_s24 }
  0xc7   : > { %p3349_p13 = scmp.ne.s32.totalorder %s3845_s23, %s3348_s5  ;;  %s3353_s26 = scalar_lea.hbm %s4245_s2, 256 }
  0xc8   : > { %p3354_p7 = scmp.lt.u32.totalorder %s3845_s23, %s4245_s2  ;;  %p3355_p12 = scmp.lt.u32.totalorder %s3353_s26, %s3348_s5 }
  0xc9   : > { %p3351_p9 = pnand %p3349_p13, %p4318_p8  ;;  %p3357_p6 = scmp.lt.u32.totalorder %s3348_s5, %s3845_s23 }
  0xca   : > { %p3356_p1 = por %p3355_p12, %p3354_p7 }
  0xcb   : > { %p3352_p10 = pneg %p3351_p9 }
  0xcc   : > { %p3358_p3 = por %p3357_p6, %p3356_p1 }
  0xce   : > { %p3359_p5 = pnand %p3358_p3, %p3352_p10 }
  0xd0   : > { %3362 = shalt.err (!%p3359_p5)
}
  0xd1   : > { %s3363_s8 = scalar_lea.vmem %s395_s24, 128  ;;  %s3506_s13 = smov [#allocation7]  }
  0xd2   : > { %p3364_p2 = scmp.ne.s32.totalorder %s395_s24, %s3363_s8  ;;  %s3368_s28 = sshll.u32 %s3506_s13, 4  ;;  %s3369_s28 = int_to_ptr.vmem [resolvable:$false] %s3368_s28 }
  0xd3   : > { %s3370_s18 = scalar_lea.vmem %s3369_s28, 256  ;;  %p3371_p13 = scmp.lt.s32.totalorder %s395_s24, %s3369_s28 }
  0xd4   : > { %p3366_p4 = pnand %p3364_p2, %p4318_p8  ;;  %p3372_p9 = scmp.lt.s32.totalorder %s3370_s18, %s3363_s8 }
  0xd6   : > { %p3367_p11 = pneg %p3366_p4  ;;  %p3373_p0 = por %p3372_p9, %p3371_p13 }
  0xd8   : > { %p3374_p7 = pnand %p3373_p0, %p3367_p11 }
  0xda   : > { %3377 = shalt.err (!%p3374_p7)
}
  0xdb   : > { %p4320_p12 = scmp.ne.s32.totalorder %s4307_s25, 0  ;;  %s3872_s16 = scalar_lea.hbm %s4246_s3, %s2469_s4 }
  0xdc   : > { %s405_s30 = scalar_lea.vmem [#allocation8], %s2468_s27  ;;  %s4321_s11 = sand.u32 1, %s3494_s12  }
  0xdd   : > { %2982 = dma.hbm_to_vmem [thread:$0]  (!%p4320_p12), %s3845_s23, 128, %s395_s24, %s3724_s14  }
  0xde   : > { %s412_s5 = sshll.u32 %s405_s30, 4  ;;  %s402_s19 = scalar_lea.sflag [#allocation9], %s4321_s11  ;;  %s413_s5 = int_to_ptr.vmem [resolvable:$true] %s412_s5 }
  0xdf   : > { %s3378_s26 = scalar_lea.hbm %s3872_s16, 128  ;;  %s3383_s4 = scalar_lea.hbm %s4246_s3, 256 }
  0xe0   : > { %p3379_p0 = scmp.ne.s32.totalorder %s3872_s16, %s3378_s26  ;;  %p3384_p6 = scmp.lt.u32.totalorder %s3872_s16, %s4246_s3 }
  0xe1   : > { %p3385_p3 = scmp.lt.u32.totalorder %s3383_s4, %s3378_s26  ;;  %p3387_p2 = scmp.lt.u32.totalorder %s3378_s26, %s3872_s16 }
  0xe2   : > { %p3381_p10 = pnand %p3379_p0, %p4318_p8 }
  0xe3   : > { %p3386_p5 = por %p3385_p3, %p3384_p6 }
  0xe4   : > { %p3382_p1 = pneg %p3381_p10 }
  0xe5   : > { %p3388_p4 = por %p3387_p2, %p3386_p5 }
  0xe7   : > { %p3389_p11 = pnand %p3388_p4, %p3382_p1 }
  0xe9   : > { %3392 = shalt.err (!%p3389_p11)
}
  0xea   : > { %s3393_s27 = scalar_lea.vmem %s413_s5, 128  ;;  %s3507_s29 = smov [#allocation8]  }
  0xeb   : > { %p3394_p13 = scmp.ne.s32.totalorder %s413_s5, %s3393_s27  ;;  %s3398_s9 = sshll.u32 %s3507_s29, 4  ;;  %s3399_s9 = int_to_ptr.vmem [resolvable:$false] %s3398_s9 }
  0xec   : > { %s3400_s8 = scalar_lea.vmem %s3399_s9, 256  ;;  %p3401_p0 = scmp.lt.s32.totalorder %s413_s5, %s3399_s9 }
  0xed   : > { %p3396_p9 = pnand %p3394_p13, %p4318_p8  ;;  %p3402_p10 = scmp.lt.s32.totalorder %s3400_s8, %s3393_s27 }
  0xef   : > { %p3397_p7 = pneg %p3396_p9  ;;  %p3403_p12 = por %p3402_p10, %p3401_p0 }
  0xf1   : > { %p3404_p3 = pnand %p3403_p12, %p3397_p7 }
  0xf3   : > { %3407 = shalt.err (!%p3404_p3)
}
  0xf4   : > { %p4322_p6 = scmp.ne.s32.totalorder %s4307_s25, 0  ;;  %p4323_p1 = scmp.ne.s32.totalorder %s4297_s17, 0 }
  0xf5   : > { %s3898_s21 = sand.u32 (!%p4323_p1), 1, %s3486_s10   ;;  %p4324_p8 = scmp.ne.s32.totalorder (!%p4323_p1), %s4294_s15, 0 }
  0xf6   : > { %2985 = dma.hbm_to_vmem [thread:$0]  (!%p4322_p6), %s3872_s16, 128, %s413_s5, %s402_s19  }
  0xf7   : > { %421 = sbr.rel (%p4323_p1) target bundleno = 2962 (0xb92), region = 56  ;;  %s3901_s13 = sshll.u32 (!%p4323_p1), %s3898_s21, 4 }
  0xf8   : > { %s424_s28 = scalar_lea.sflag (!%p4323_p1), [#allocation3], %s3898_s21  ;;  %s427_s18 = scalar_lea.vmem (!%p4323_p1), [#allocation2], %s3901_s13 }
  0xfe   : > { %3453 = dma.done.wait (%p4324_p8), %s424_s28, 256  }
  0xff   : > { %3455 = vsyncadd (%p4324_p8), %s424_s28, 4294967040  ;;  %s4325_s25 = sld [smem:[#allocation26_spill]]  ;;  %s436_s20 = scalar_lea.vmem [#allocation5], %s3901_s13 }
 0x105   : > { %s432_s17 = sand.u32 1, %s4325_s25  }
 0x106   : > { %s433_s1 = scalar_lea.sflag [#allocation6], %s432_s17 }
 0x107   : > { %3457 = dma.done.wait (%p4324_p8), %s433_s1, 384  }
 0x108   : > { %3459 = vsyncadd (%p4324_p8), %s433_s1, 4294966912  ;;  %s2475_s16 = sshll.u32 %s3898_s21, 3  ;;  %s451_s5 = scalar_lea.sflag [#allocation9], %s432_s17 }
 0x109   : > { %s3916_s30 = scalar_lea.vmem [#allocation7], %s2475_s16  ;;  %s3918_s11 = scalar_lea.vmem [#allocation8], %s2475_s16 }
 0x10a   : > { %3461 = dma.done.wait (%p4324_p8), %s451_s5, 128  }
 0x10b   : > { %3463 = vsyncadd (%p4324_p8), %s451_s5, 4294967168  ;;  %p4326_p12 = scmp.eq.s32.totalorder %s4325_s25, 0 }
 0x10d   : > { %3465 = dma.done.wait (%p4326_p12), [#allocation9], 4096   ;;  %p4327_p5 = pmov %p4326_p12 }
 0x10f   : > { %3467 = vsyncadd (%p4327_p5), [#allocation9], 4294963200  ;;  %p4328_p2 = pmov %p4327_p5 }
 0x111   : > { %3469 = dma.done.wait (%p4328_p2), [#allocation12], 4096   ;;  %p4329_p4 = pmov %p4328_p2 }
 0x112   : > { %p4330_p11 = pmov %p4328_p2 }
 0x113   : > { %3471 = vsyncadd (%p4329_p4), [#allocation12], 4294963200 }
 0x114   : > { %3473 = dma.done.wait (%p4330_p11), [#allocation15], 3072   ;;  %p4331_p13 = pmov %p4328_p2 }
 0x115   : > { %v3936_v0 = vld [vmem:[%s436_s20] sm:$0xff]  ;;  %v3938_v1 = vld [vmem:[%s436_s20 + $0x8] sm:$0xff]  ;;  %v3508_v4 = vmov 0.0   ;;  %vm3509_vm0 = vmmov 0   ;;  %v525_v25 = vlaneseq  ;;  %vm1093_vm2 = vcmask 130048   ;;  %s4332_s26 = sld [smem:[#allocation34_spill]] }
 0x116   : > { %3475 = vsyncadd (%p4331_p13), [#allocation15], 4294964224  ;;  %v3940_v2 = vld [vmem:[%s427_s18] sm:$0xff]  ;;  %602 = vadd.xlane.f32.xlu0 %v3936_v0  ;;  %v3944_v3 = vld [vmem:[%s427_s18 + $0x8] sm:$0xff]  ;;  %2694 = vmatprep.subr.bf16.mxu1 %v3508_v4  ;;  %v626_v15 = vpack.c.bf16 %v3938_v1, %v3936_v0  ;;  %vm3511_vm10 = vmmov 1   ;;  %s4333_s14 = sld [smem:[#allocation30_spill]] }
 0x117   : > { %578 = vadd.xlane.f32.xlu1 %v3940_v2  ;;  %2734 = vmatprep.subr.bf16.mxu0 %v3508_v4  ;;  %v3046_v5 = vld [vmem:[#allocation11] ss:$8 sps:$4 sm:$0xff]   ;;  %v3047_v6 = vld [vmem:[#allocation11 + $0x10] ss:$8 sps:$4 sm:$0xff]   ;;  %v3054_v14 = vld [vmem:[#allocation11 + $0x4] ss:$8 sps:$4 sm:$0xff]  }
 0x118   : > { %2695 = vmatpush3.bf16.msra.mxu1 %v3046_v5  ;;  %2710 = vmatprep.mubr.msk.bf16.mxu1 %vm3509_vm0, %v3508_v4  ;;  %v3048_v7 = vld [vmem:[#allocation11 + $0x20] ss:$8 sps:$4 sm:$0xff]   ;;  %v3049_v9 = vld [vmem:[#allocation11 + $0x30] ss:$8 sps:$4 sm:$0xff]   ;;  %v3055_v16 = vld [vmem:[#allocation11 + $0x14] ss:$8 sps:$4 sm:$0xff]  }
 0x119   : > { %2696 = vmatprep.subr.bf16.mxu1 %v3508_v4  ;;  %2750 = vmatprep.mubr.msk.bf16.mxu0 %vm3509_vm0, %v3508_v4  ;;  %v3063_v8 = vld [vmem:[#allocation10] sm:$0xff]   ;;  %v3051_v11 = vld [vmem:[#allocation11 + $0x50] ss:$8 sps:$4 sm:$0xff]   ;;  %v3057_v18 = vld [vmem:[#allocation11 + $0x34] ss:$8 sps:$4 sm:$0xff]   ;;  %v526_v26 = vand.u32 127, %v525_v25 }
 0x11a   : > { %604 = vadd.xlane.f32.xlu0 %v3938_v1  ;;  %2735 = vmatpush3.bf16.msra.mxu0 %v3063_v8  ;;  %v3050_v10 = vld [vmem:[#allocation11 + $0x40] ss:$8 sps:$4 sm:$0xff]   ;;  %v3053_v13 = vld [vmem:[#allocation11 + $0x70] ss:$8 sps:$4 sm:$0xff]   ;;  %v3056_v17 = vld [vmem:[#allocation11 + $0x24] ss:$8 sps:$4 sm:$0xff]  }
 0x11b   : > { %580 = vadd.xlane.f32.xlu1 %v3944_v3  ;;  %2736 = vmatprep.subr.bf16.mxu0 %v3508_v4  ;;  %v3052_v12 = vld [vmem:[#allocation11 + $0x60] ss:$8 sps:$4 sm:$0xff]   ;;  %v3058_v19 = vld [vmem:[#allocation11 + $0x44] ss:$8 sps:$4 sm:$0xff]   ;;  %v3059_v20 = vld [vmem:[#allocation11 + $0x54] ss:$8 sps:$4 sm:$0xff]  }
 0x11c   : > { %2697 = vmatpush3.bf16.msra.mxu1 %v3047_v6  ;;  %v3060_v21 = vld [vmem:[#allocation11 + $0x64] ss:$8 sps:$4 sm:$0xff]   ;;  %v3061_v22 = vld [vmem:[#allocation11 + $0x74] ss:$8 sps:$4 sm:$0xff]   ;;  %vm527_vm1 = vcmp.lt.s32.totalorder %v526_v26, 32  ;;  %s2588_s23 = sshll.u32 %s4325_s25, 8 }
 0x11d   : > { %2698 = vmatprep.subr.bf16.mxu1 %v3508_v4  ;;  %v3062_v23 = vld [vmem:[#allocation10 + $0x40] sm:$0xff]   ;;  %v3064_v24 = vld [vmem:[#allocation10 + $0x48] sm:$0xff]   ;;  %v2482_v31 = vsel %vm527_vm1, 1.0, %v3508_v4  ;;  %v3066_v49 = vld [vmem:[#allocation10 + $0x50] sm:$0xff]   ;;  %s519_s4 = scalar_lea.vmem [#allocation16], %s3901_s13  ;;  %s4334_s29 = sld [smem:[#allocation35_spill]] }
 0x11e   : > { %v3065_v48 = vld [vmem:[#allocation10 + $0x8] sm:$0xff]   ;;  %v3067_v50 = vld [vmem:[#allocation10 + $0x10] sm:$0xff]   ;;  %v3068_v51 = vld [vmem:[#allocation10 + $0x58] sm:$0xff]   ;;  %s2278_s24 = sshll.u32 %s519_s4, 4  ;;  %s2265_s8 = scalar_lea.sflag [#allocation4], %s3898_s21  ;;  %s4199_s24 = int_to_ptr.vmem [resolvable:$true] %s2278_s24 }
 0x11f   : > { %2737 = vmatpush3.bf16.msra.mxu0 %v3065_v48  ;;  %v3069_v52 = vld [vmem:[#allocation10 + $0x18] sm:$0xff]   ;;  %v3070_v53 = vld [vmem:[#allocation10 + $0x60] sm:$0xff]   ;;  %v3072_v55 = vld [vmem:[#allocation10 + $0x68] sm:$0xff]   ;;  %s3408_s13 = scalar_lea.vmem %s4199_s24, 256  ;;  %p4335_p7 = scmp.ne.s32.totalorder %s4333_s14, 0 }
 0x120   : > { %2699 = vmatpush3.bf16.msra.mxu1 %v3048_v7  ;;  %2738 = vmatprep.subr.bf16.mxu0 %v3508_v4  ;;  %v3071_v54 = vld [vmem:[#allocation10 + $0x20] sm:$0xff]   ;;  %v3073_v56 = vld [vmem:[#allocation10 + $0x28] sm:$0xff]   ;;  %v3074_v57 = vld [vmem:[#allocation10 + $0x70] sm:$0xff]   ;;  %p3409_p9 = scmp.ne.s32.totalorder %s4199_s24, %s3408_s13  ;;  %s3512_s28 = smov [#allocation16]  }
 0x121   : > { %2700 = vmatprep.subr.bf16.mxu1 %v3508_v4  ;;  %v3075_v58 = vld [vmem:[#allocation10 + $0x30] sm:$0xff]   ;;  %v3076_v59 = vld [vmem:[#allocation10 + $0x78] sm:$0xff]   ;;  %s3412_s18 = sshll.u32 %s3512_s28, 4  ;;  %s3413_s18 = int_to_ptr.vmem [resolvable:$false] %s3412_s18 }
 0x122   : > { %v3077_v60 = vld [vmem:[#allocation10 + $0x38] sm:$0xff]   ;;  %p3410_p0 = pnand %p3409_p9, %p4335_p7  ;;  %s3414_s25 = scalar_lea.vmem %s3413_s18, 512 }
 0x123   : > { %2739 = vmatpush3.bf16.msra.mxu0 %v3067_v50  ;;  %s4197_s9 = scalar_lea.hbm %s4334_s29, %s2588_s23  ;;  %p3415_p3 = scmp.lt.s32.totalorder %s4199_s24, %s3413_s18 }
 0x124   : > { %2701 = vmatpush3.bf16.msra.mxu1 %v3049_v9  ;;  %2740 = vmatprep.subr.bf16.mxu0 %v3508_v4  ;;  %p3411_p10 = pneg %p3410_p0  ;;  %p3416_p6 = scmp.lt.s32.totalorder %s3414_s25, %s3408_s13 }
 0x125   : > { %2702 = vmatprep.subr.bf16.mxu1 %v3508_v4 }
 0x126   : > { %p3417_p1 = por %p3416_p6, %p3415_p3 }
 0x127   : > { %2741 = vmatpush3.bf16.msra.mxu0 %v3069_v52 }
 0x128   : > { %2703 = vmatpush3.bf16.msra.mxu1 %v3050_v10  ;;  %2742 = vmatprep.subr.bf16.mxu0 %v3508_v4  ;;  %p3418_p8 = pnand %p3417_p1, %p3411_p10 }
 0x129   : > { %2704 = vmatprep.subr.bf16.mxu1 %v3508_v4 }
 0x12b   : > { %2743 = vmatpush3.bf16.msra.mxu0 %v3071_v54 }
 0x12c   : > { %2705 = vmatpush3.bf16.msra.mxu1 %v3051_v11  ;;  %2744 = vmatprep.subr.bf16.mxu0 %v3508_v4 }
 0x12d   : > { %2706 = vmatprep.subr.bf16.mxu1 %v3508_v4 }
 0x12f   : > { %2745 = vmatpush3.bf16.msra.mxu0 %v3073_v56 }
 0x130   : > { %2707 = vmatpush3.bf16.msra.mxu1 %v3052_v12  ;;  %2746 = vmatprep.subr.bf16.mxu0 %v3508_v4 }
 0x131   : > { %2708 = vmatprep.subr.bf16.mxu1 %v3508_v4 }
 0x133   : > { %2747 = vmatpush3.bf16.msra.mxu0 %v3075_v58 }
 0x134   : > { %2709 = vmatpush3.bf16.msra.mxu1 %v3053_v13  ;;  %2748 = vmatprep.subr.bf16.mxu0 %v3508_v4 }
 0x135   : > { %2714 = vmatprep.subr.bf16.mxu1 %v3508_v4 }
 0x137   : > { %2711 = vmatmul.mubr.bf16.vlgmr.msra.gmra.mrb[0].mxu1 %v626_v15  ;;  %2749 = vmatpush3.bf16.msra.mxu0 %v3077_v60 }
 0x138   : > { %2715 = vmatpush3.bf16.msra.mxu1 %v3054_v14  ;;  %2730 = vmatprep.mubr.msk.bf16.mxu1 %vm3509_vm0, %v3508_v4 }
 0x139   : > { %2716 = vmatprep.subr.bf16.mxu1 %v3508_v4  ;;  %2780 = vmatprep.subr.bf16.mxu0 %v3508_v4 }
 0x13c   : > { %2717 = vmatpush3.bf16.msra.mxu1 %v3055_v16 }
 0x13d   : > { %2718 = vmatprep.subr.bf16.mxu1 %v3508_v4 }
 0x140   : > { %2719 = vmatpush3.bf16.msra.mxu1 %v3056_v17 }
 0x141   : > { %2720 = vmatprep.subr.bf16.mxu1 %v3508_v4 }
 0x144   : > { %2721 = vmatpush3.bf16.msra.mxu1 %v3057_v18 }
 0x145   : > { %2722 = vmatprep.subr.bf16.mxu1 %v3508_v4 }
 0x148   : > { %2723 = vmatpush3.bf16.msra.mxu1 %v3058_v19 }
 0x149   : > { %2724 = vmatprep.subr.bf16.mxu1 %v3508_v4 }
 0x14c   : > { %2725 = vmatpush3.bf16.msra.mxu1 %v3059_v20 }
 0x14d   : > { %2726 = vmatprep.subr.bf16.mxu1 %v3508_v4 }
 0x150   : > { %2727 = vmatpush3.bf16.msra.mxu1 %v3060_v21 }
 0x151   : > { %2728 = vmatprep.subr.bf16.mxu1 %v3508_v4 }
 0x154   : > { %2729 = vmatpush3.bf16.msra.mxu1 %v3061_v22 }
 0x155   : > { %2754 = vmatprep.subr.bf16.mxu1 %v3508_v4 }
 0x157   : > { %2731 = vmatmul.mubr.bf16.vlgmr.msra.gmra.mrb[4].mxu1 %v626_v15 }
 0x158   : > { %2755 = vmatpush3.bf16.msra.mxu1 %v3062_v23  ;;  %2770 = vmatprep.mubr.msk.bf16.mxu1 %vm3509_vm0, %v3508_v4 }
 0x159   : > { %2756 = vmatprep.subr.bf16.mxu1 %v3508_v4 }
 0x15c   : > { %2757 = vmatpush3.bf16.msra.mxu1 %v3064_v24 }
 0x15d   : > { %2758 = vmatprep.subr.bf16.mxu1 %v3508_v4 }
 0x160   : > { %2759 = vmatpush3.bf16.msra.mxu1 %v3066_v49 }
 0x161   : > { %2760 = vmatprep.subr.bf16.mxu1 %v3508_v4 }
 0x164   : > { %2761 = vmatpush3.bf16.msra.mxu1 %v3068_v51 }
 0x165   : > { %2762 = vmatprep.subr.bf16.mxu1 %v3508_v4 }
 0x168   : > { %2763 = vmatpush3.bf16.msra.mxu1 %v3070_v53 }
 0x169   : > { %2764 = vmatprep.subr.bf16.mxu1 %v3508_v4 }
 0x16c   : > { %2765 = vmatpush3.bf16.msra.mxu1 %v3072_v55 }
 0x16d   : > { %2766 = vmatprep.subr.bf16.mxu1 %v3508_v4 }
 0x170   : > { %2767 = vmatpush3.bf16.msra.mxu1 %v3074_v57  ;;  %v530_v57 = vadd.f32 %v3944_v3, %v3940_v2 }
 0x171   : > { %2768 = vmatprep.subr.bf16.mxu1 %v3508_v4 }
 0x172   : > { %v531_v58 = vrot.slane %v530_v57, 4 }
 0x174   : > { %2769 = vmatpush3.bf16.msra.mxu1 %v3076_v59  ;;  %v532_v59 = vadd.f32 %v531_v58, %v530_v57 }
 0x175   : > { %2774 = vmatprep.subr.bf16.mxu1 %v3508_v4 }
 0x1a3   : > { %v603_v27 = vpop.xlane.xlu0 %602 }
 0x1a4   : > { %v579_v28 = vpop.xlane.xlu1 %578  ;;  %v606_v29 = vmul.f32 0.03125, %v603_v27 }
 0x1a5   : > { %v582_v30 = vmul.f32 0.03125, %v579_v28 }
 0x1a6   : > { %v608_v32 = vsub.f32 %v3936_v0, %v606_v29 }
 0x1a7   : > { %v584_v33 = vsub.f32 %v3940_v2, %v582_v30  ;;  %v605_v34 = vpop.xlane.xlu0 %604 }
 0x1a8   : > { %v581_v35 = vpop.xlane.xlu1 %580  ;;  %v607_v36 = vmul.f32 0.03125, %v605_v34  ;;  %v3983_v38 = vmul.f32 %v2482_v31, %v608_v32 }
 0x1a9   : > { %v583_v37 = vmul.f32 0.03125, %v581_v35  ;;  %v3985_v39 = vmul.f32 %v2482_v31, %v584_v33 }
 0x1aa   : > { %v609_v40 = vsub.f32 %v3938_v1, %v607_v36  ;;  %v612_v42 = vmul.f32 %v3983_v38, %v3983_v38 }
 0x1ab   : > { %v585_v41 = vsub.f32 %v3944_v3, %v583_v37  ;;  %v588_v44 = vmul.f32 %v3985_v39, %v3985_v39 }
 0x1ac   : > { %614 = vadd.xlane.f32.xlu0 %v612_v42  ;;  %v3991_v43 = vmul.f32 %v2482_v31, %v609_v40 }
 0x1ad   : > { %v3995_v45 = vmul.f32 %v2482_v31, %v585_v41 }
 0x1ae   : > { %v613_v46 = vmul.f32 %v3991_v43, %v3991_v43 }
 0x1af   : > { %v589_v47 = vmul.f32 %v3995_v45, %v3995_v45 }
 0x1b0   : > { %616 = vadd.xlane.f32.xlu1 %v613_v46  ;;  %590 = vadd.xlane.f32.xlu0 %v588_v44 }
 0x1b4   : > { %592 = vadd.xlane.f32.xlu1 %v589_v47 }
 0x20a   : > { %v725_v61 = vpop.f32.mrb[0].mxu1 }
 0x20b   : > { %v1117_v62 = vmul.f32 %v725_v61, %v725_v61  ;;  %v2712_v63 = vpop.f32.mrb[1].mxu1 }
 0x20c   : > { %v728_v5 = vpop.f32.mrb[2].mxu1 }
 0x20d   : > { %v1116_v6 = vpack.c.bf16 %v728_v5, %v725_v61  ;;  %v1118_v7 = vmul.f32 %v728_v5, %v728_v5  ;;  %v2713_v8 = vpop.f32.mrb[3].mxu1  ;;  %v533_v61 = vrot.slane %v532_v59, 2 }
 0x20f   : > { %v1119_v9 = vpack.c.bf16 %v1118_v7, %v1117_v62  ;;  %v534_v7 = vadd.f32 %v533_v61, %v532_v59 }
 0x22a   : > { %v4014_v22 = vpop.f32.mrb[4].mxu1 }
 0x22b   : > { %v4018_v23 = vmul.f32 %v4014_v22, %v4014_v22  ;;  %v2732_v24 = vpop.f32.mrb[5].mxu1 }
 0x22c   : > { %v4020_v26 = vpop.f32.mrb[6].mxu1 }
 0x22d   : > { %v1480_v28 = vpack.c.bf16 %v4020_v26, %v4014_v22  ;;  %v4026_v29 = vmul.f32 %v4020_v26, %v4020_v26  ;;  %v2733_v30 = vpop.f32.mrb[7].mxu1 }
 0x22f   : > { %v1483_v32 = vpack.c.bf16 %v4026_v29, %v4018_v23 }
 0x239   : > { %v615_v10 = vpop.xlane.xlu0 %614 }
 0x23a   : > { %v618_v11 = vmul.f32 0.032258064, %v615_v10 }
 0x23c   : > { %v620_v12 = vadd.f32 1e-05, %v618_v11 }
 0x23d   : > { %v591_v13 = vpop.xlane.xlu0 %590  ;;  %v617_v14 = vpop.xlane.xlu1 %616 }
 0x23e   : > { %v594_v15 = vmul.f32 0.032258064, %v591_v13  ;;  %v619_v16 = vmul.f32 0.032258064, %v617_v14  ;;  %3134 = vrsqrt.f32 %v620_v12 }
 0x240   : > { %v596_v17 = vadd.f32 1e-05, %v594_v15  ;;  %v621_v18 = vadd.f32 1e-05, %v619_v16 }
 0x241   : > { %v593_v19 = vpop.xlane.xlu1 %592 }
 0x242   : > { %v595_v20 = vmul.f32 0.032258064, %v593_v19  ;;  %3136 = vrsqrt.f32 %v621_v18 }
 0x243   : > { %3138 = vrsqrt.f32 %v596_v17 }
 0x244   : > { %v597_v21 = vadd.f32 1e-05, %v595_v20 }
 0x246   : > { %3140 = vrsqrt.f32 %v597_v21 }
 0x248   : > { %v3135_v27 = vpop.eup %3134 }
 0x249   : > { %v624_v34 = vmul.f32 %v3135_v27, %v3983_v38 }
 0x24c   : > { %v3137_v31 = vpop.eup %3136 }
 0x24d   : > { %v3139_v33 = vpop.eup %3138  ;;  %v625_v35 = vmul.f32 %v3137_v31, %v3991_v43  ;;  %v3510_v31 = vmov 0  }
 0x24e   : > { %v600_v40 = vmul.f32 %v3139_v33, %v3985_v39 }
 0x24f   : > { %v960_v37 = vpack.c.bf16 %v625_v35, %v624_v34  ;;  %v3080_v34 = vld [vmem:[#allocation10 + $0x80] sm:$0xff]  }
 0x250   : > { %v3141_v36 = vpop.eup %3140 }
 0x251   : > { %v601_v41 = vmul.f32 %v3141_v36, %v3995_v45  ;;  %2771 = vmatmul.mubr.bf16.vlgmr.msra.gmra.mrb[8].mxu1 %v960_v37  ;;  %v3082_v36 = vld [vmem:[#allocation10 + $0x88] sm:$0xff]  }
 0x252   : > { %2776 = vmatprep.mubr.msk.bf16.mxu1 %vm3509_vm0, %v3508_v4 }
 0x253   : > { %v870_v42 = vpack.c.bf16 %v601_v41, %v600_v40  ;;  %v3086_v40 = vld [vmem:[#allocation10 + $0x98] sm:$0xff]   ;;  %v3088_v41 = vld [vmem:[#allocation10 + $0xa0] sm:$0xff]  }
 0x255   : > { %2751 = vmatmul.mubr.bf16.vlgmr.msra.gmra.mrb[0].mxu0 %v870_v42  ;;  %v3090_v42 = vld [vmem:[#allocation10 + $0xa8] sm:$0xff]  }
 0x256   : > { %2796 = vmatprep.mubr.msk.bf16.mxu0 %vm3509_vm0, %v3508_v4  ;;  %2781 = vmatpush3.bf16.msra.mxu0 %v3080_v34 }
 0x257   : > { %2782 = vmatprep.subr.bf16.mxu0 %v3508_v4 }
 0x25a   : > { %2783 = vmatpush3.bf16.msra.mxu0 %v3082_v36 }
 0x25b   : > { %2784 = vmatprep.subr.bf16.mxu0 %v3508_v4 }
 0x324   : > { %v1043_v44 = vpop.f32.mrb[8].mxu1 }
 0x325   : > { %v2772_v46 = vpop.f32.mrb[9].mxu1 }
 0x326   : > { %v1046_v38 = vpop.f32.mrb[10].mxu1  ;;  %v3092_v46 = vld [vmem:[#allocation10 + $0xb0] sm:$0xff]  }
 0x327   : > { %v1051_v47 = vpack.c.bf16 %v1046_v38, %v1043_v44  ;;  %v2773_v43 = vpop.f32.mrb[11].mxu1 }
 0x328   : > { %v953_v48 = vpop.f32.mrb[0].mxu0 }
 0x329   : > { %v2752_v49 = vpop.f32.mrb[1].mxu0  ;;  %2775 = vmatpush3.bf16.xpose.msra.mxu1 %v1051_v47  ;;  %v3093_v47 = vld [vmem:[#allocation10 + $0xb8] sm:$0xff]  }
 0x32a   : > { %v956_v39 = vpop.f32.mrb[2].mxu0  ;;  %1124 = vmatprep.subr.bf16.mxu1 %v1119_v9  ;;  %v535_v9 = vrot.slane %v534_v7, 1  ;;  %v554_v49 = vadd.f32 %v3938_v1, %v3936_v0 }
 0x32b   : > { %v1050_v50 = vpack.c.bf16 %v956_v39, %v953_v48  ;;  %v2753_v45 = vpop.f32.mrb[3].mxu0 }
 0x32c   : > { %v536_v10 = vadd.f32 %v535_v9, %v534_v7  ;;  %v555_v39 = vrot.slane %v554_v49, 4 }
 0x32e   : > { %v537_v14 = vmul.f32 0.0625, %v536_v10 }
 0x330   : > { %2777 = vmatmul.mubr.bf16.vlgmr.msra.gmra.mrb[12].mxu1 %v1050_v50  ;;  %v538_v16 = vsub.f32 %v3940_v2, %v537_v14  ;;  %v539_v17 = vsub.f32 %v3944_v3, %v537_v14  ;;  %v3084_v3 = vld [vmem:[#allocation10 + $0x90] sm:$0xff]   ;;  %v556_v50 = vadd.f32 %v555_v39, %v554_v49 }
 0x331   : > { %1125 = vmatpush1.bf16.msra.mxu1 %v1116_v6  ;;  %1156 = vmatprep.mubr.bf16.mxu1 %v3510_v31 }
 0x332   : > { %2800 = vmatprep.subr.bf16.mxu1 %v3508_v4  ;;  %v540_v18 = vmul.f32 %v538_v16, %v538_v16  ;;  %v541_v19 = vmul.f32 %v539_v17, %v539_v17  ;;  %2785 = vmatpush3.bf16.msra.mxu0 %v3084_v3  ;;  %v557_v45 = vrot.slane %v556_v50, 2 }
 0x333   : > { %2786 = vmatprep.subr.bf16.mxu0 %v3508_v4 }
 0x334   : > { %v542_v20 = vadd.f32 %v541_v19, %v540_v18  ;;  %v3085_v18 = vld [vmem:[#allocation10 + $0xe0] sm:$0xff]   ;;  %v3087_v19 = vld [vmem:[#allocation10 + $0xe8] sm:$0xff]  }
 0x336   : > { %v543_v21 = vrot.slane %v542_v20, 4  ;;  %2787 = vmatpush3.bf16.msra.mxu0 %v3086_v40 }
 0x337   : > { %2788 = vmatprep.subr.bf16.mxu0 %v3508_v4 }
 0x338   : > { %v544_v24 = vadd.f32 %v543_v21, %v542_v20  ;;  %v3089_v21 = vld [vmem:[#allocation10 + $0xf0] sm:$0xff]  }
 0x33a   : > { %v545_v27 = vrot.slane %v544_v24, 2  ;;  %2789 = vmatpush3.bf16.msra.mxu0 %v3088_v41 }
 0x33b   : > { %2790 = vmatprep.subr.bf16.mxu0 %v3508_v4 }
 0x33c   : > { %v546_v30 = vadd.f32 %v545_v27, %v544_v24 }
 0x33e   : > { %v547_v33 = vrot.slane %v546_v30, 1  ;;  %2791 = vmatpush3.bf16.msra.mxu0 %v3090_v42 }
 0x33f   : > { %2792 = vmatprep.subr.bf16.mxu0 %v3508_v4 }
 0x340   : > { %v548_v35 = vadd.f32 %v547_v33, %v546_v30  ;;  %v3091_v30 = vld [vmem:[#allocation10 + $0xf8] sm:$0xff]  }
 0x342   : > { %v549_v2 = vmul.f32 0.06666667, %v548_v35  ;;  %2793 = vmatpush3.bf16.msra.mxu0 %v3092_v46 }
 0x343   : > { %2794 = vmatprep.subr.bf16.mxu0 %v3508_v4 }
 0x344   : > { %v550_v37 = vadd.f32 1e-05, %v549_v2 }
 0x346   : > { %2795 = vmatpush3.bf16.msra.mxu0 %v3093_v47 }
 0x347   : > { %2826 = vmatprep.subr.bf16.mxu0 %v3508_v4 }
 0x403   : > { %v1086_v51 = vpop.f32.mrb[12].mxu1 }
 0x404   : > { %v2778_v52 = vpop.f32.mrb[13].mxu1  ;;  %v1094_v53 = vsel %vm1093_vm2, %v1086_v51, -inf }
 0x405   : > { %1095 = vmax.xlane.f32.xlu0 %v1094_v53  ;;  %v1089_v54 = vpop.f32.mrb[14].mxu1 }
 0x406   : > { %v2779_v55 = vpop.f32.mrb[15].mxu1  ;;  %v1097_v56 = vsel %vm1093_vm2, %v1089_v54, -inf }
 0x407   : > { %1098 = vmax.xlane.f32.xlu1 %v1097_v56 }
 0x492   : > { %v1096_v60 = vpop.xlane.xlu0 %1095 }
 0x493   : > { %v1100_v62 = vsub.f32 %v1086_v51, %v1096_v60  ;;  %v558_v51 = vadd.f32 %v557_v45, %v556_v50 }
 0x494   : > { %v1099_v63 = vpop.xlane.xlu1 %1098 }
 0x495   : > { %v1102_v5 = vmul.f32 1.442695, %v1100_v62  ;;  %v1101_v6 = vsub.f32 %v1089_v54, %v1099_v63  ;;  %v559_v52 = vrot.slane %v558_v51, 1 }
 0x497   : > { %3142 = vpow2.f32 %v1102_v5  ;;  %v1104_v8 = vmul.f32 1.442695, %v1101_v6  ;;  %v560_v53 = vadd.f32 %v559_v52, %v558_v51 }
 0x499   : > { %3144 = vpow2.f32 %v1104_v8  ;;  %v561_v54 = vmul.f32 0.0625, %v560_v53 }
 0x49a   : > { %3146 = vrsqrt.f32 %v550_v37 }
 0x49b   : > { %v562_v55 = vsub.f32 %v3936_v0, %v561_v54  ;;  %v563_v56 = vsub.f32 %v3938_v1, %v561_v54 }
 0x49d   : > { %v564_v57 = vmul.f32 %v562_v55, %v562_v55  ;;  %v565_v58 = vmul.f32 %v563_v56, %v563_v56 }
 0x49f   : > { %v566_v59 = vadd.f32 %v565_v58, %v564_v57 }
 0x4a1   : > { %v4043_v11 = vpop.eup %3142  ;;  %v567_v60 = vrot.slane %v566_v59, 4 }
 0x4a2   : > { %v1106_v12 = vsel %vm1093_vm2, %v4043_v11, 0.0 }
 0x4a3   : > { %v4047_v13 = vpop.eup %3144  ;;  %1107 = vadd.xlane.f32.xlu0 %v1106_v12  ;;  %v568_v62 = vadd.f32 %v567_v60, %v566_v59  ;;  %v3078_v12 = vld [vmem:[#allocation10 + $0xc0] sm:$0xff]  }
 0x4a4   : > { %v1109_v15 = vsel %vm1093_vm2, %v4047_v13, 0.0  ;;  %v3147_v44 = vpop.eup %3146 }
 0x4a5   : > { %1110 = vadd.xlane.f32.xlu1 %v1109_v15  ;;  %v4060_v38 = vmul.f32 %v3147_v44, %v539_v17  ;;  %v4063_v43 = vmul.f32 %v3147_v44, %v538_v16  ;;  %v569_v5 = vrot.slane %v568_v62, 2  ;;  %v3079_v15 = vld [vmem:[#allocation10 + $0xc8] sm:$0xff]   ;;  %v3081_v17 = vld [vmem:[#allocation10 + $0xd0] sm:$0xff]  }
 0x4a7   : > { %v1235_v48 = vpack.c.bf16 %v4060_v38, %v4063_v43  ;;  %v570_v6 = vadd.f32 %v569_v5, %v568_v62 }
 0x4a9   : > { %2797 = vmatmul.mubr.bf16.vlgmr.msra.gmra.mrb[4].mxu0 %v1235_v48  ;;  %v571_v9 = vrot.slane %v570_v6, 1 }
 0x4aa   : > { %2842 = vmatprep.mubr.msk.bf16.mxu0 %vm3509_vm0, %v3508_v4 }
 0x4ab   : > { %v572_v14 = vadd.f32 %v571_v9, %v570_v6 }
 0x4ad   : > { %v573_v16 = vmul.f32 0.06666667, %v572_v14 }
 0x530   : > { %v1108_v61 = vpop.xlane.xlu0 %1107 }
 0x531   : > { %3148 = vrcp.f32 %v1108_v61 }
 0x532   : > { %v1111_v63 = vpop.xlane.xlu1 %1110 }
 0x533   : > { %3150 = vrcp.f32 %v1111_v63 }
 0x53b   : > { %v3149_v7 = vpop.eup %3148 }
 0x53c   : > { %v1114_v10 = vmul.f32 %v3149_v7, %v4043_v11  ;;  %v574_v11 = vadd.f32 1e-05, %v573_v16 }
 0x53d   : > { %v3151_v8 = vpop.eup %3150 }
 0x53e   : > { %v1115_v0 = vmul.f32 %v3151_v8, %v4047_v13  ;;  %v3083_v13 = vld [vmem:[#allocation10 + $0xd8] sm:$0xff]   ;;  %3152 = vrsqrt.f32 %v574_v11 }
 0x540   : > { %v1120_v1 = vpack.c.bf16 %v1115_v0, %v1114_v10 }
 0x542   : > { %2515 = vmatmul.mubr.msk.bf16.vlgmr.msra.gmra.mrb[16].mxu1 %vm1093_vm2, %v1120_v1 }
 0x543   : > { %2801 = vmatpush3.bf16.msra.mxu1 %v3078_v12  ;;  %2816 = vmatprep.mubr.msk.bf16.mxu1 %vm3509_vm0, %v3508_v4 }
 0x544   : > { %2802 = vmatprep.subr.bf16.mxu1 %v3508_v4 }
 0x547   : > { %2803 = vmatpush3.bf16.msra.mxu1 %v3079_v15 }
 0x548   : > { %2804 = vmatprep.subr.bf16.mxu1 %v3508_v4  ;;  %v3153_v20 = vpop.eup %3152 }
 0x549   : > { %v576_v24 = vmul.f32 %v3153_v20, %v562_v55  ;;  %v577_v27 = vmul.f32 %v3153_v20, %v563_v56 }
 0x54b   : > { %2805 = vmatpush3.bf16.msra.mxu1 %v3081_v17  ;;  %v1325_v33 = vpack.c.bf16 %v577_v27, %v576_v24 }
 0x54c   : > { %2806 = vmatprep.subr.bf16.mxu1 %v3508_v4 }
 0x54f   : > { %2807 = vmatpush3.bf16.msra.mxu1 %v3083_v13 }
 0x550   : > { %2808 = vmatprep.subr.bf16.mxu1 %v3508_v4 }
 0x553   : > { %2809 = vmatpush3.bf16.msra.mxu1 %v3085_v18 }
 0x554   : > { %2810 = vmatprep.subr.bf16.mxu1 %v3508_v4 }
 0x557   : > { %2811 = vmatpush3.bf16.msra.mxu1 %v3087_v19 }
 0x558   : > { %2812 = vmatprep.subr.bf16.mxu1 %v3508_v4 }
 0x55b   : > { %2813 = vmatpush3.bf16.msra.mxu1 %v3089_v21 }
 0x55c   : > { %2814 = vmatprep.subr.bf16.mxu1 %v3508_v4 }
 0x55f   : > { %2815 = vmatpush3.bf16.msra.mxu1 %v3091_v30 }
 0x560   : > { %2820 = vmatprep.subr.bf16.mxu1 %v3508_v4 }
 0x562   : > { %2817 = vmatmul.mubr.bf16.vlgmr.msra.gmra.mrb[20].mxu1 %v1325_v33 }
 0x563   : > { %2822 = vmatprep.mubr.msk.bf16.mxu1 %vm3509_vm0, %v3508_v4 }
 0x57c   : > { %v1318_v34 = vpop.f32.mrb[4].mxu0 }
 0x57d   : > { %v2798_v35 = vpop.f32.mrb[5].mxu0 }
 0x57e   : > { %v1321_v36 = vpop.f32.mrb[6].mxu0 }
 0x57f   : > { %v1415_v2 = vpack.c.bf16 %v1321_v36, %v1318_v34  ;;  %v2799_v3 = vpop.f32.mrb[7].mxu0 }
 0x615   : > { %v1158_v37 = vpop.f32.mrb[16].mxu1 }
 0x616   : > { %v1167_v40 = vmul.f32 %v1158_v37, %v1158_v37  ;;  %v1160_v41 = vpop.f32.mrb[17].mxu1 }
 0x617   : > { %v1162_v42 = vpop.f32.mrb[18].mxu1 }
 0x618   : > { %v1169_v44 = vsub.f32 %v1160_v41, %v1167_v40  ;;  %v1168_v46 = vmul.f32 %v1162_v42, %v1162_v42  ;;  %v1173_v47 = vadd.f32 %v1162_v42, %v1158_v37  ;;  %v1164_v48 = vpop.f32.mrb[19].mxu1  ;;  %v3094_v42 = vld [vmem:[#allocation13] sm:$0xff]  }
 0x61a   : > { %v1170_v49 = vsub.f32 %v1164_v48, %v1168_v46  ;;  %v1171_v39 = vmax.f32 %v1169_v44, 0.0  ;;  %v1174_v54 = vrot.slane %v1173_v47, 4  ;;  %v3095_v46 = vld [vmem:[#allocation13 + $0x8] sm:$0xff]   ;;  %v3097_v48 = vld [vmem:[#allocation13 + $0x18] sm:$0xff]  }
 0x61c   : > { %v1172_v50 = vmax.f32 %v1170_v49, 0.0  ;;  %v1175_v57 = vadd.f32 %v1174_v54, %v1173_v47  ;;  %v3096_v47 = vld [vmem:[#allocation13 + $0x10] sm:$0xff]   ;;  %v3098_v49 = vld [vmem:[#allocation13 + $0x20] sm:$0xff]   ;;  %v3105_v54 = vld [vmem:[#allocation13 + $0x58] sm:$0xff]  }
 0x61e   : > { %v1182_v45 = vadd.f32 %v1172_v50, %v1171_v39  ;;  %v1176_v60 = vrot.slane %v1175_v57, 2  ;;  %v3099_v39 = vld [vmem:[#allocation13 + $0x28] sm:$0xff]   ;;  %v3100_v50 = vld [vmem:[#allocation13 + $0x30] sm:$0xff]  }
 0x620   : > { %v1183_v51 = vrot.slane %v1182_v45, 4  ;;  %v1177_v61 = vadd.f32 %v1176_v60, %v1175_v57  ;;  %v3108_v57 = vld [vmem:[#allocation13 + $0x70] sm:$0xff]  }
 0x622   : > { %v1184_v52 = vadd.f32 %v1183_v51, %v1182_v45  ;;  %v1178_v62 = vrot.slane %v1177_v61, 1  ;;  %v3101_v45 = vld [vmem:[#allocation13 + $0x38] sm:$0xff]   ;;  %v3102_v51 = vld [vmem:[#allocation13 + $0x40] sm:$0xff]  }
 0x623   : > { %2827 = vmatpush3.bf16.msra.mxu0 %v3102_v51 }
 0x624   : > { %v1185_v53 = vrot.slane %v1184_v52, 2  ;;  %v1179_v10 = vadd.f32 %v1178_v62, %v1177_v61  ;;  %2828 = vmatprep.subr.bf16.mxu0 %v3508_v4 }
 0x626   : > { %v1186_v55 = vadd.f32 %v1185_v53, %v1184_v52  ;;  %v1181_v15 = vmul.f32 0.0625, %v1179_v10  ;;  %v3103_v52 = vld [vmem:[#allocation13 + $0x48] sm:$0xff]   ;;  %v3104_v53 = vld [vmem:[#allocation13 + $0x50] sm:$0xff]  }
 0x627   : > { %2829 = vmatpush3.bf16.msra.mxu0 %v3103_v52 }
 0x628   : > { %v1187_v56 = vrot.slane %v1186_v55, 1  ;;  %2830 = vmatprep.subr.bf16.mxu0 %v3508_v4 }
 0x62a   : > { %v1188_v58 = vadd.f32 %v1187_v56, %v1186_v55  ;;  %v3106_v55 = vld [vmem:[#allocation13 + $0x60] sm:$0xff]   ;;  %v3107_v56 = vld [vmem:[#allocation13 + $0x68] sm:$0xff]  }
 0x62b   : > { %2831 = vmatpush3.bf16.msra.mxu0 %v3104_v53 }
 0x62c   : > { %v1189_v59 = vmul.f32 0.0625, %v1188_v58  ;;  %2832 = vmatprep.subr.bf16.mxu0 %v3508_v4  ;;  %v3109_v58 = vld [vmem:[#allocation13 + $0x78] sm:$0xff]  }
 0x62e   : > { %3154 = vrsqrt.f32 %v1189_v59  ;;  %vm1192_vm3 = vcmp.eq.f32.partialorder %v1189_v59, inf  ;;  %v1195_v12 = vand.u32 2147483648, %v1189_v59  ;;  %vm1194_vm4 = vcmp.eq.f32.partialorder %v1189_v59, 0.0 }
 0x62f   : > { %2833 = vmatpush3.bf16.msra.mxu0 %v3105_v54 }
 0x630   : > { %2834 = vmatprep.subr.bf16.mxu0 %v3508_v4 }
 0x633   : > { %2835 = vmatpush3.bf16.msra.mxu0 %v3106_v55 }
 0x634   : > { %2836 = vmatprep.subr.bf16.mxu0 %v3508_v4 }
 0x635   : > { %v1408_v63 = vpop.f32.mrb[20].mxu1 }
 0x636   : > { %v2818_v5 = vpop.f32.mrb[21].mxu1 }
 0x637   : > { %v1411_v6 = vpop.f32.mrb[22].mxu1  ;;  %2837 = vmatpush3.bf16.msra.mxu0 %v3107_v56 }
 0x638   : > { %v3155_v7 = vpop.eup %3154  ;;  %v1416_v8 = vpack.c.bf16 %v1411_v6, %v1408_v63  ;;  %v2819_v9 = vpop.f32.mrb[23].mxu1  ;;  %2838 = vmatprep.subr.bf16.mxu0 %v3508_v4 }
 0x639   : > { %v1191_v0 = vmul.f32 %v3155_v7, %v1189_v59 }
 0x63a   : > { %2821 = vmatpush3.bf16.xpose.msra.mxu1 %v1416_v8 }
 0x63b   : > { %1488 = vmatprep.subr.bf16.mxu1 %v1483_v32  ;;  %v1193_v1 = vsel %vm1192_vm3, %v1189_v59, %v1191_v0  ;;  %2839 = vmatpush3.bf16.msra.mxu0 %v3108_v57 }
 0x63c   : > { %v1196_v14 = vsel %vm1194_vm4, %v1195_v12, %v1193_v1  ;;  %2840 = vmatprep.subr.bf16.mxu0 %v3508_v4 }
 0x63d   : > { %v1197_v16 = vmul.f32 %v1196_v14, %v4063_v43  ;;  %v1198_v17 = vmul.f32 %v1196_v14, %v4060_v38 }
 0x63f   : > { %v4094_v11 = vadd.f32 %v1197_v16, %v1181_v15  ;;  %v1200_v13 = vadd.f32 %v1198_v17, %v1181_v15  ;;  %2841 = vmatpush3.bf16.msra.mxu0 %v3109_v58 }
 0x640   : > { %2866 = vmatprep.subr.bf16.mxu0 %v3508_v4 }
 0x641   : > { %2823 = vmatmul.mubr.bf16.vlgmr.msra.gmra.mrb[24].mxu1 %v1415_v2  ;;  %v1565_v18 = vpack.c.bf16 %v1200_v13, %v4094_v11 }
 0x642   : > { %1489 = vmatpush1.bf16.msra.mxu1 %v1480_v28  ;;  %1520 = vmatprep.mubr.bf16.mxu1 %v3510_v31 }
 0x643   : > { %2846 = vmatprep.subr.bf16.mxu1 %v3508_v4 }
 0x714   : > { %v1451_v23 = vpop.f32.mrb[24].mxu1 }
 0x715   : > { %v2824_v29 = vpop.f32.mrb[25].mxu1  ;;  %v1458_v32 = vsel %vm1093_vm2, %v1451_v23, -inf }
 0x716   : > { %1459 = vmax.xlane.f32.xlu0 %v1458_v32  ;;  %v1454_v19 = vpop.f32.mrb[26].mxu1 }
 0x717   : > { %v2825_v20 = vpop.f32.mrb[27].mxu1  ;;  %v1461_v21 = vsel %vm1093_vm2, %v1454_v19, -inf }
 0x718   : > { %1462 = vmax.xlane.f32.xlu1 %v1461_v21 }
 0x7a3   : > { %v1460_v24 = vpop.xlane.xlu0 %1459 }
 0x7a4   : > { %v1464_v27 = vsub.f32 %v1451_v23, %v1460_v24 }
 0x7a5   : > { %v1463_v30 = vpop.xlane.xlu1 %1462 }
 0x7a6   : > { %v1466_v33 = vmul.f32 1.442695, %v1464_v27  ;;  %v1465_v22 = vsub.f32 %v1454_v19, %v1463_v30 }
 0x7a8   : > { %3156 = vpow2.f32 %v1466_v33  ;;  %v1468_v26 = vmul.f32 1.442695, %v1465_v22 }
 0x7aa   : > { %3158 = vpow2.f32 %v1468_v26 }
 0x7b2   : > { %v3157_v28 = vpop.eup %3156 }
 0x7b3   : > { %v1470_v31 = vsel %vm1093_vm2, %v3157_v28, 0.0 }
 0x7b4   : > { %v3159_v34 = vpop.eup %3158  ;;  %1471 = vadd.xlane.f32.xlu0 %v1470_v31 }
 0x7b5   : > { %v1473_v35 = vsel %vm1093_vm2, %v3159_v34, 0.0 }
 0x7b6   : > { %1474 = vadd.xlane.f32.xlu1 %v1473_v35 }
 0x841   : > { %v1472_v36 = vpop.xlane.xlu0 %1471 }
 0x842   : > { %3160 = vrcp.f32 %v1472_v36 }
 0x843   : > { %v1475_v2 = vpop.xlane.xlu1 %1474 }
 0x844   : > { %3162 = vrcp.f32 %v1475_v2 }
 0x84c   : > { %v3161_v3 = vpop.eup %3160 }
 0x84d   : > { %v1478_v40 = vmul.f32 %v3161_v3, %v3157_v28  ;;  %v3110_v3 = vld [vmem:[#allocation14 + $0x40] sm:$0xff]  }
 0x84e   : > { %v3163_v37 = vpop.eup %3162 }
 0x84f   : > { %v1479_v41 = vmul.f32 %v3163_v37, %v3159_v34 }
 0x851   : > { %v1484_v44 = vpack.c.bf16 %v1479_v41, %v1478_v40  ;;  %v3111_v40 = vld [vmem:[#allocation14 + $0x48] sm:$0xff]   ;;  %v3112_v41 = vld [vmem:[#allocation14 + $0x50] sm:$0xff]  }
 0x853   : > { %2532 = vmatmul.mubr.msk.bf16.vlgmr.msra.gmra.mrb[28].mxu1 %vm1093_vm2, %v1484_v44  ;;  %v3116_v44 = vld [vmem:[#allocation14 + $0x70] sm:$0xff]  }
 0x854   : > { %2847 = vmatpush3.bf16.msra.mxu1 %v3094_v42  ;;  %2862 = vmatprep.mubr.msk.bf16.mxu1 %vm3509_vm0, %v3508_v4  ;;  %v3115_v42 = vld [vmem:[#allocation14 + $0x68] sm:$0xff]  }
 0x855   : > { %2848 = vmatprep.subr.bf16.mxu1 %v3508_v4 }
 0x858   : > { %2849 = vmatpush3.bf16.msra.mxu1 %v3095_v46  ;;  %v3117_v46 = vld [vmem:[#allocation14 + $0x78] sm:$0xff]  }
 0x859   : > { %2850 = vmatprep.subr.bf16.mxu1 %v3508_v4 }
 0x85c   : > { %2851 = vmatpush3.bf16.msra.mxu1 %v3096_v47  ;;  %v4137_v47 = vshrl.u32 %v525_v25, 7 }
 0x85d   : > { %2852 = vmatprep.subr.bf16.mxu1 %v3508_v4 }
 0x85e   : > { %v1779_v54 = vsub.s32 0, %v4137_v47  ;;  %vm1814_vm7 = vcmp.lt.s32.totalorder %v4137_v47, 1  ;;  %vm1827_vm8 = vcmp.lt.s32.totalorder %v4137_v47, 7 }
 0x860   : > { %2853 = vmatpush3.bf16.msra.mxu1 %v3097_v48  ;;  %v2205_v48 = vsub.s32 4, %v4137_v47 }
 0x861   : > { %2854 = vmatprep.subr.bf16.mxu1 %v3508_v4 }
 0x864   : > { %2855 = vmatpush3.bf16.msra.mxu1 %v3098_v49  ;;  %v2173_v49 = vsub.s32 3, %v4137_v47 }
 0x865   : > { %2856 = vmatprep.subr.bf16.mxu1 %v3508_v4 }
 0x868   : > { %2857 = vmatpush3.bf16.msra.mxu1 %v3099_v39  ;;  %v4144_v39 = vld [vmem:[%s4332_s26] sm:$0x1f] }
 0x869   : > { %2858 = vmatprep.subr.bf16.mxu1 %v3508_v4  ;;  %v2206_v51 = vrot.slane %v4144_v39, %v2205_v48  ;;  %v2174_v52 = vrot.slane %v4144_v39, %v2173_v49  ;;  %v1780_v55 = vrot.slane %v4144_v39, %v1779_v54 }
 0x86c   : > { %2859 = vmatpush3.bf16.msra.mxu1 %v3100_v50  ;;  %v4147_v50 = vld [vmem:[%s3918_s11] sm:$0xff] }
 0x86d   : > { %2860 = vmatprep.subr.bf16.mxu1 %v3508_v4  ;;  %v2207_v25 = vmul.f32 %v2206_v51, %v4147_v50 }
 0x86f   : > { %2208 = vadd.xlane.f32.xlu0 %v2207_v25 }
 0x870   : > { %2861 = vmatpush3.bf16.msra.mxu1 %v3101_v45  ;;  %v4150_v45 = vld [vmem:[%s3916_s30] sm:$0xff] }
 0x871   : > { %v2175_v53 = vmul.f32 %v2174_v52, %v4150_v45 }
 0x873   : > { %2863 = vmatmul.mubr.bf16.vlgmr.msra.gmra.mrb[32].mxu1 %v1565_v18  ;;  %2176 = vadd.xlane.f32.xlu1 %v2175_v53 }
 0x926   : > { %v1522_v59 = vpop.f32.mrb[28].mxu1 }
 0x927   : > { %v1531_v60 = vmul.f32 %v1522_v59, %v1522_v59  ;;  %v1524_v61 = vpop.f32.mrb[29].mxu1 }
 0x928   : > { %v1526_v62 = vpop.f32.mrb[30].mxu1 }
 0x929   : > { %v1533_v63 = vsub.f32 %v1524_v61, %v1531_v60  ;;  %v1532_v5 = vmul.f32 %v1526_v62, %v1526_v62  ;;  %v1537_v6 = vadd.f32 %v1526_v62, %v1522_v59  ;;  %v1528_v7 = vpop.f32.mrb[31].mxu1 }
 0x92b   : > { %v1534_v8 = vsub.f32 %v1528_v7, %v1532_v5  ;;  %v1535_v9 = vmax.f32 %v1533_v63, 0.0  ;;  %v1538_v15 = vrot.slane %v1537_v6, 4 }
 0x92d   : > { %v1536_v10 = vmax.f32 %v1534_v8, 0.0  ;;  %v1539_v11 = vadd.f32 %v1538_v15, %v1537_v6  ;;  %v3118_v6 = vld [vmem:[#allocation14] sm:$0xff]   ;;  %v3119_v15 = vld [vmem:[#allocation14 + $0x8] sm:$0xff]  }
 0x92f   : > { %v1545_v0 = vadd.f32 %v1536_v10, %v1535_v9  ;;  %v1540_v23 = vrot.slane %v1539_v11, 2 }
 0x931   : > { %v1546_v12 = vrot.slane %v1545_v0, 4  ;;  %v1541_v29 = vadd.f32 %v1540_v23, %v1539_v11  ;;  %v3120_v11 = vld [vmem:[#allocation14 + $0x10] sm:$0xff]   ;;  %v3123_v23 = vld [vmem:[#allocation14 + $0x28] sm:$0xff]  }
 0x933   : > { %v1547_v1 = vadd.f32 %v1546_v12, %v1545_v0  ;;  %v1542_v32 = vrot.slane %v1541_v29, 1 }
 0x935   : > { %v1548_v14 = vrot.slane %v1547_v1, 2  ;;  %v1543_v30 = vadd.f32 %v1542_v32, %v1541_v29  ;;  %v3124_v29 = vld [vmem:[#allocation14 + $0x30] sm:$0xff]   ;;  %v1790_v32 = vand.u32 15, %v4137_v47 }
 0x937   : > { %v1549_v16 = vadd.f32 %v1548_v14, %v1547_v1  ;;  %v1544_v31 = vmul.f32 0.0625, %v1543_v30  ;;  %vm2589_vm9 = vcmp.ne.s32.totalorder %v1790_v32, 0  ;;  %v3130_v30 = vld [vmem:[#allocation14 + $0xa0] sm:$0xff]  }
 0x938   : > { %vm2566_vm11 = vmpackc.low %vm3511_vm10, %vm2589_vm9 }
 0x939   : > { %v1550_v17 = vrot.slane %v1549_v16, 1 }
 0x93b   : > { %v1551_v13 = vadd.f32 %v1550_v17, %v1549_v16 }
 0x93d   : > { %v1552_v18 = vmul.f32 0.0625, %v1551_v13  ;;  %v3121_v13 = vld [vmem:[#allocation14 + $0x18] sm:$0xff]  }
 0x93f   : > { %3164 = vrsqrt.f32 %v1552_v18  ;;  %vm1555_vm5 = vcmp.eq.f32.partialorder %v1552_v18, inf  ;;  %v1558_v22 = vand.u32 2147483648, %v1552_v18  ;;  %vm1557_vm6 = vcmp.eq.f32.partialorder %v1552_v18, 0.0 }
 0x946   : > { %v1770_v19 = vpop.f32.mrb[32].mxu1 }
 0x947   : > { %v2864_v20 = vpop.f32.mrb[33].mxu1 }
 0x948   : > { %v1773_v21 = vpop.f32.mrb[34].mxu1  ;;  %v3126_v20 = vld [vmem:[#allocation14 + $0x80] sm:$0xff]  }
 0x949   : > { %v3165_v24 = vpop.eup %3164  ;;  %v2865_v27 = vpop.f32.mrb[35].mxu1 }
 0x94a   : > { %v1554_v33 = vmul.f32 %v3165_v24, %v1552_v18  ;;  %v3128_v24 = vld [vmem:[#allocation14 + $0x90] sm:$0xff]   ;;  %v3129_v27 = vld [vmem:[#allocation14 + $0x98] sm:$0xff]  }
 0x94c   : > { %v1556_v26 = vsel %vm1555_vm5, %v1552_v18, %v1554_v33  ;;  %v3122_v18 = vld [vmem:[#allocation14 + $0x20] sm:$0xff]   ;;  %v3131_v33 = vld [vmem:[#allocation14 + $0xa8] sm:$0xff]  }
 0x94d   : > { %v1559_v28 = vsel %vm1557_vm6, %v1558_v22, %v1556_v26  ;;  %v1785_v22 = vadd.s32 8, %v4137_v47  ;;  %v3132_v26 = vld [vmem:[#allocation14 + $0xb0] sm:$0xff]  }
 0x94e   : > { %v1560_v34 = vmul.f32 %v1559_v28, %v4063_v43  ;;  %v1561_v35 = vmul.f32 %v1559_v28, %v4060_v38  ;;  %v3113_v43 = vld [vmem:[#allocation14 + $0x58] sm:$0xff]   ;;  %v3114_v38 = vld [vmem:[#allocation14 + $0x60] sm:$0xff]  }
 0x94f   : > { %v1797_v28 = vand.u32 15, %v1785_v22 }
 0x950   : > { %v1562_v36 = vadd.f32 %v1560_v34, %v1544_v31  ;;  %v1563_v2 = vadd.f32 %v1561_v35, %v1544_v31  ;;  %v3133_v31 = vld [vmem:[#allocation14 + $0xb8] sm:$0xff]   ;;  %v2209_v34 = vpop.xlane.xlu0 %2208  ;;  %v2177_v35 = vpop.xlane.xlu1 %2176 }
 0x951   : > { %vm2590_vm12 = vcmp.ne.s32.totalorder %v1797_v28, 15 }
 0x952   : > { %v1582_v37 = vpack.c.bf16 %v1563_v2, %v1562_v36  ;;  %vm2578_vm13 = vmpackc.low %vm2590_vm12, %vm3511_vm10  ;;  %v2210_v36 = vrot.slane %v2209_v34, 4  ;;  %v2178_v2 = vrot.slane %v2177_v35, 4 }
 0x954   : > { %2843 = vmatmul.mubr.bf16.vlgmr.msra.gmra.mrb[8].mxu0 %v1582_v37  ;;  %v2179_v37 = vmax.f32 %v2177_v35, %v2178_v2 }
 0x955   : > { %2867 = vmatpush3.bf16.msra.mxu0 %v3110_v3  ;;  %2882 = vmatprep.mubr.msk.bf16.mxu0 %vm3509_vm0, %v3508_v4  ;;  %v2211_v3 = vmax.f32 %v2209_v34, %v2210_v36 }
 0x956   : > { %2868 = vmatprep.subr.bf16.mxu0 %v3508_v4 }
 0x959   : > { %2869 = vmatpush3.bf16.msra.mxu0 %v3111_v40  ;;  %v2212_v40 = vrot.slane %v2211_v3, 2 }
 0x95a   : > { %2870 = vmatprep.subr.bf16.mxu0 %v3508_v4 }
 0x95d   : > { %2871 = vmatpush3.bf16.msra.mxu0 %v3112_v41  ;;  %v2180_v41 = vrot.slane %v2179_v37, 2 }
 0x95e   : > { %2872 = vmatprep.subr.bf16.mxu0 %v3508_v4 }
 0x961   : > { %2873 = vmatpush3.bf16.msra.mxu0 %v3113_v43  ;;  %v2213_v43 = vmax.f32 %v2211_v3, %v2212_v40 }
 0x962   : > { %2874 = vmatprep.subr.bf16.mxu0 %v3508_v4 }
 0x965   : > { %2875 = vmatpush3.bf16.msra.mxu0 %v3114_v38  ;;  %v2181_v38 = vmax.f32 %v2179_v37, %v2180_v41 }
 0x966   : > { %2876 = vmatprep.subr.bf16.mxu0 %v3508_v4 }
 0x969   : > { %2877 = vmatpush3.bf16.msra.mxu0 %v3115_v42  ;;  %v2214_v42 = vrot.slane %v2213_v43, 1 }
 0x96a   : > { %2878 = vmatprep.subr.bf16.mxu0 %v3508_v4 }
 0x96d   : > { %2879 = vmatpush3.bf16.msra.mxu0 %v3116_v44  ;;  %v2182_v44 = vrot.slane %v2181_v38, 1 }
 0x96e   : > { %2880 = vmatprep.subr.bf16.mxu0 %v3508_v4 }
 0x96f   : > { %v2183_v48 = vmax.f32 %v2181_v38, %v2182_v44 }
 0x971   : > { %2881 = vmatpush3.bf16.msra.mxu0 %v3117_v46  ;;  %v2215_v46 = vmax.f32 %v2213_v43, %v2214_v42  ;;  %v2184_v49 = vsub.f32 %v2177_v35, %v2183_v48 }
 0x972   : > { %2886 = vmatprep.subr.bf16.mxu0 %v3508_v4 }
 0x973   : > { %v2185_v52 = vmul.f32 1.442695, %v2184_v49 }
 0xa27   : > { %v1681_v56 = vpop.f32.mrb[8].mxu0 }
 0xa28   : > { %v1771_v57 = vadd.f32 %v1770_v19, %v1681_v56  ;;  %v2844_v58 = vpop.f32.mrb[9].mxu0  ;;  %v3125_v19 = vld [vmem:[#allocation14 + $0x38] sm:$0xff]  }
 0xa29   : > { %v1684_v59 = vpop.f32.mrb[10].mxu0 }
 0xa2a   : > { %v1781_v60 = vadd.f32 %v1780_v55, %v1771_v57  ;;  %v1774_v61 = vadd.f32 %v1773_v21, %v1684_v59  ;;  %v2845_v62 = vpop.f32.mrb[11].mxu0  ;;  %v3127_v21 = vld [vmem:[#allocation14 + $0x88] sm:$0xff]   ;;  %v2164_v57 = vsub.s32 2, %v4137_v47 }
 0xa2c   : > { %v1782_v63 = vadd.f32 %v1780_v55, %v1774_v61  ;;  %v1812_v5 = vrot.slane %v1781_v60, 7  ;;  %v1825_v7 = vrot.slane %v1781_v60, 1  ;;  %v2158_v55 = vsub.s32 1, %v4137_v47 }
 0xa2d   : > { %v2165_v61 = vrot.slane %v4144_v39, %v2164_v57 }
 0xa2e   : > { %v1813_v8 = vrot.slane %v1782_v63, 7  ;;  %v1826_v9 = vrot.slane %v1782_v63, 1  ;;  %v1853_v10 = vpack.c.bf16 %v1782_v63, %v1781_v60  ;;  %v2159_v59 = vrot.slane %v4144_v39, %v2158_v55 }
 0xa30   : > { %v1815_v0 = vsel %vm1814_vm7, %v1812_v5, %v1813_v8  ;;  %v1816_v12 = vsel %vm1814_vm7, %v1813_v8, %v1812_v5  ;;  %v4160_v1 = vsel %vm1827_vm8, %v1825_v7, %v1826_v9  ;;  %v1829_v14 = vsel %vm1827_vm8, %v1826_v9, %v1825_v7  ;;  %2883 = vmatmul.mubr.bf16.vlgmr.msra.gmra.mrb[12].mxu0 %v1853_v10 }
 0xa31   : > { %2887 = vmatpush3.bf16.msra.mxu0 %v3118_v6  ;;  %2902 = vmatprep.mubr.msk.bf16.mxu0 %vm3509_vm0, %v3508_v4  ;;  %v2567_v16 = vpack.c.bf16 %v1815_v0, %v1816_v12  ;;  %v2579_v17 = vpack.c.bf16 %v1829_v14, %v4160_v1 }
 0xa32   : > { %2888 = vmatprep.subr.bf16.mxu0 %v3508_v4 }
 0xa35   : > { %2889 = vmatpush3.bf16.msra.mxu0 %v3119_v15 }
 0xa36   : > { %2890 = vmatprep.subr.bf16.mxu0 %v3508_v4 }
 0xa39   : > { %2891 = vmatpush3.bf16.msra.mxu0 %v3120_v11 }
 0xa3a   : > { %2892 = vmatprep.subr.bf16.mxu0 %v3508_v4 }
 0xa3d   : > { %2893 = vmatpush3.bf16.msra.mxu0 %v3121_v13 }
 0xa3e   : > { %2894 = vmatprep.subr.bf16.mxu0 %v3508_v4 }
 0xa41   : > { %2895 = vmatpush3.bf16.msra.mxu0 %v3122_v18 }
 0xa42   : > { %2896 = vmatprep.subr.bf16.mxu0 %v3508_v4 }
 0xa45   : > { %2897 = vmatpush3.bf16.msra.mxu0 %v3123_v23 }
 0xa46   : > { %2898 = vmatprep.subr.bf16.mxu0 %v3508_v4 }
 0xa49   : > { %2899 = vmatpush3.bf16.msra.mxu0 %v3124_v29 }
 0xa4a   : > { %2900 = vmatprep.subr.bf16.mxu0 %v3508_v4 }
 0xa4d   : > { %2901 = vmatpush3.bf16.msra.mxu0 %v3125_v19 }
 0xa4e   : > { %2906 = vmatprep.subr.bf16.mxu0 %v3508_v4 }
 0xa50   : > { %2903 = vmatmul.mubr.msk.bf16.vlgmr.msra.gmra.mrb[12].mxu0 %vm2566_vm11, %v2567_v16 }
 0xa51   : > { %2907 = vmatpush3.bf16.msra.mxu0 %v3126_v20  ;;  %2922 = vmatprep.mubr.msk.bf16.mxu0 %vm3509_vm0, %v3508_v4 }
 0xa52   : > { %2908 = vmatprep.subr.bf16.mxu0 %v3508_v4 }
 0xa55   : > { %2909 = vmatpush3.bf16.msra.mxu0 %v3127_v21 }
 0xa56   : > { %2910 = vmatprep.subr.bf16.mxu0 %v3508_v4 }
 0xa59   : > { %2911 = vmatpush3.bf16.msra.mxu0 %v3128_v24 }
 0xa5a   : > { %2912 = vmatprep.subr.bf16.mxu0 %v3508_v4 }
 0xa5d   : > { %2913 = vmatpush3.bf16.msra.mxu0 %v3129_v27 }
 0xa5e   : > { %2914 = vmatprep.subr.bf16.mxu0 %v3508_v4 }
 0xa61   : > { %2915 = vmatpush3.bf16.msra.mxu0 %v3130_v30 }
 0xa62   : > { %2916 = vmatprep.subr.bf16.mxu0 %v3508_v4 }
 0xa65   : > { %2917 = vmatpush3.bf16.msra.mxu0 %v3131_v33 }
 0xa66   : > { %2918 = vmatprep.subr.bf16.mxu0 %v3508_v4 }
 0xa69   : > { %2919 = vmatpush3.bf16.msra.mxu0 %v3132_v26 }
 0xa6a   : > { %2920 = vmatprep.subr.bf16.mxu0 %v3508_v4  ;;  %v2216_v4 = vsub.f32 %v2209_v34, %v2215_v46 }
 0xa6c   : > { %v2217_v51 = vmul.f32 1.442695, %v2216_v4 }
 0xa6d   : > { %2921 = vmatpush3.bf16.msra.mxu0 %v3133_v31 }
 0xa6e   : > { %3166 = vpow2.f32 %v2217_v51 }
 0xa6f   : > { %3168 = vpow2.f32 %v2185_v52 }
 0xa70   : > { %2923 = vmatmul.mubr.msk.bf16.vlgmr.msra.gmra.mrb[12].mxu0 %vm2578_vm13, %v2579_v17 }
 0xa78   : > { %v3167_v25 = vpop.eup %3166 }
 0xa79   : > { %v3169_v53 = vpop.eup %3168  ;;  %v2219_v54 = vrot.slane %v3167_v25, 4 }
 0xa7a   : > { %v2187_v56 = vrot.slane %v3169_v53, 4 }
 0xa7b   : > { %v2220_v58 = vadd.f32 %v3167_v25, %v2219_v54 }
 0xa7c   : > { %v2188_v60 = vadd.f32 %v3169_v53, %v2187_v56 }
 0xa7d   : > { %v2221_v63 = vrot.slane %v2220_v58, 2 }
 0xa7e   : > { %v2189_v8 = vrot.slane %v2188_v60, 2 }
 0xa7f   : > { %v2222_v12 = vadd.f32 %v2221_v63, %v2220_v58 }
 0xa80   : > { %v2190_v14 = vadd.f32 %v2189_v8, %v2188_v60 }
 0xa81   : > { %v2223_v16 = vrot.slane %v2222_v12, 1 }
 0xa82   : > { %v2191_v11 = vrot.slane %v2190_v14, 1 }
 0xa83   : > { %v2224_v18 = vadd.f32 %v2223_v16, %v2222_v12 }
 0xa84   : > { %v2192_v23 = vadd.f32 %v2191_v11, %v2190_v14 }
 0xa85   : > { %3170 = vrcp.f32 %v2224_v18 }
 0xa86   : > { %3172 = vrcp.f32 %v2192_v23 }
 0xa8f   : > { %v3171_v30 = vpop.eup %3170 }
 0xa90   : > { %v3173_v26 = vpop.eup %3172  ;;  %v2226_v31 = vmul.f32 %v3171_v30, %v3167_v25 }
 0xa91   : > { %v2194_v35 = vmul.f32 %v3173_v26, %v3169_v53 }
 0xa92   : > { %v2227_v2 = vmul.f32 %v2226_v31, %v4147_v50 }
 0xa93   : > { %v2195_v37 = vmul.f32 %v2194_v35, %v4150_v45 }
 0xa94   : > { %v2228_v41 = vrot.slane %v2227_v2, 4 }
 0xa95   : > { %v2196_v38 = vrot.slane %v2195_v37, 4 }
 0xa96   : > { %v2229_v44 = vadd.f32 %v2228_v41, %v2227_v2 }
 0xa97   : > { %v2197_v48 = vadd.f32 %v2196_v38, %v2195_v37 }
 0xa98   : > { %v2230_v49 = vrot.slane %v2229_v44, 2 }
 0xa99   : > { %v2198_v51 = vrot.slane %v2197_v48, 2 }
 0xa9a   : > { %v2231_v52 = vadd.f32 %v2230_v49, %v2229_v44 }
 0xa9b   : > { %v2199_v25 = vadd.f32 %v2198_v51, %v2197_v48 }
 0xa9c   : > { %v2232_v50 = vrot.slane %v2231_v52, 1 }
 0xa9d   : > { %v2200_v53 = vrot.slane %v2199_v25, 1 }
 0xa9e   : > { %v2233_v45 = vadd.f32 %v2232_v50, %v2231_v52 }
 0xa9f   : > { %v2201_v57 = vadd.f32 %v2200_v53, %v2199_v25 }
 0xb43   : > { %v2147_v62 = vpop.f32.mrb[12].mxu0 }
 0xb44   : > { %v2160_v5 = vmul.f32 %v2159_v59, %v2147_v62  ;;  %v2924_v6 = vpop.f32.mrb[13].mxu0 }
 0xb45   : > { %v2150_v7 = vpop.f32.mrb[14].mxu0 }
 0xb46   : > { %v2166_v9 = vadd.f32 %v2165_v61, %v2160_v5  ;;  %v2161_v10 = vmul.f32 %v2159_v59, %v2150_v7  ;;  %v2925_v0 = vpop.f32.mrb[15].mxu0 }
 0xb48   : > { %v2167_v1 = vadd.f32 %v2165_v61, %v2161_v10  ;;  %v2168_v15 = vmax.f32 %v2166_v9, 0.0 }
 0xb4a   : > { %v2169_v47 = vmax.f32 %v2167_v1, 0.0 }
 0xb4c   : > { %v2234_v17 = vadd.f32 %v2169_v47, %v2168_v15 }
 0xb4e   : > { %v2235_v13 = vrot.slane %v2234_v17, 4 }
 0xb50   : > { %v2236_v39 = vadd.f32 %v2235_v13, %v2234_v17 }
 0xb52   : > { %v2237_v29 = vrot.slane %v2236_v39, 2 }
 0xb54   : > { %v2238_v32 = vadd.f32 %v2237_v29, %v2236_v39 }
 0xb56   : > { %v2239_v19 = vrot.slane %v2238_v32, 1 }
 0xb58   : > { %v2240_v20 = vadd.f32 %v2239_v19, %v2238_v32 }
 0xb5a   : > { %v2241_v21 = vmul.f32 0.0625, %v2240_v20 }
 0xb5c   : > { %v2242_v24 = vsub.f32 %v2168_v15, %v2241_v21  ;;  %v2243_v27 = vsub.f32 %v2169_v47, %v2241_v21 }
 0xb5e   : > { %v2244_v33 = vmul.f32 %v2242_v24, %v2242_v24  ;;  %v2245_v22 = vmul.f32 %v2243_v27, %v2243_v27 }
 0xb60   : > { %v2246_v28 = vadd.f32 %v2245_v22, %v2244_v33 }
 0xb62   : > { %v2247_v34 = vrot.slane %v2246_v28, 4 }
 0xb64   : > { %v2248_v36 = vadd.f32 %v2247_v34, %v2246_v28 }
 0xb66   : > { %v2249_v3 = vrot.slane %v2248_v36, 2 }
 0xb68   : > { %v2250_v40 = vadd.f32 %v2249_v3, %v2248_v36 }
 0xb6a   : > { %v2251_v43 = vrot.slane %v2250_v40, 1 }
 0xb6c   : > { %v2252_v42 = vadd.f32 %v2251_v43, %v2250_v40 }
 0xb6e   : > { %v2253_v46 = vmul.f32 0.06666667, %v2252_v42 }
 0xb70   : > { %v2254_v4 = vadd.f32 1e-05, %v2253_v46 }
 0xb72   : > { %3174 = vrsqrt.f32 %v2254_v4 }
 0xb7c   : > { %v3175_v54 = vpop.eup %3174 }
 0xb7d   : > { %v2256_v55 = vmul.f32 %v3175_v54, %v2242_v24  ;;  %v2257_v56 = vmul.f32 %v3175_v54, %v2243_v27 }
 0xb7f   : > { %v2258_v58 = vmul.f32 %v2256_v55, %v2233_v45  ;;  %v2259_v59 = vmul.f32 %v2257_v56, %v2233_v45 }
 0xb81   : > { %v2260_v60 = vadd.f32 %v2258_v58, %v2201_v57  ;;  %v2261_v61 = vadd.f32 %v2259_v59, %v2201_v57 }
 0xb83   : > { %2262 = vst [vmem:[%s519_s4] sm:$0xff] %v2260_v60  ;;  %2263 = vst [vmem:[%s519_s4 + $0x8] sm:$0xff] %v2261_v61 }
 0xb84   : > { %3421 = shalt.err (!%p3418_p8)
}
 0xb85   : > { %s3422_s17 = scalar_lea.hbm %s4197_s9, 256  ;;  %s3426_s16 = scalar_lea.hbm %s4334_s29, 512 }
 0xb86   : > { %p3423_p12 = scmp.ne.s32.totalorder %s4197_s9, %s3422_s17  ;;  %p3427_p4 = scmp.lt.u32.totalorder %s4197_s9, %s4334_s29 }
 0xb87   : > { %p3428_p11 = scmp.lt.u32.totalorder %s3426_s16, %s3422_s17  ;;  %p3430_p9 = scmp.lt.u32.totalorder %s3422_s17, %s4197_s9 }
 0xb88   : > { %p3424_p5 = pnand %p3423_p12, %p4335_p7 }
 0xb89   : > { %p3429_p13 = por %p3428_p11, %p3427_p4 }
 0xb8a   : > { %p3425_p2 = pneg %p3424_p5 }
 0xb8b   : > { %p3431_p0 = por %p3430_p9, %p3429_p13 }
 0xb8d   : > { %p3432_p10 = pnand %p3431_p0, %p3425_p2 }
 0xb8f   : > { %3435 = shalt.err (!%p3432_p10)
}
 0xb90   : > { %s3513_s11 = smov 128   ;;  %s3514_s15 = smov 8  }
 0xb91   : > { %2958 = dma.vmem_to_hbm [thread:$0]  (%p4335_p7), %s4199_s24, 256, %s4197_s9, %s2265_s8, %s3513_s11, %s3513_s11, %s3514_s15  }
 0xb92 PF: > { %s4336_s19 = sld [smem:[#allocation24_spill]]  ;;  %s4337_s26 = sld [smem:[#allocation27_spill]] }
 0xb93   : > { %p4339_p6 = scmp.ge.s32.totalorder %s3494_s12, 2 }
 0xb98   : > { %s2293_s23 = sand.u32 1, %s4336_s19   ;;  %p4338_p3 = scmp.ne.s32.totalorder %s4337_s26, 0 }
 0xb99   : > { %s2294_s4 = scalar_lea.sflag [#allocation4], %s2293_s23 }
 0xb9a   : > { %p2987_p1 = pnand %p4339_p6, %p4338_p3 }
 0xb9c   : > { %3477 = dma.done.wait (!%p2987_p1), %s2294_s4, 256  }
 0xb9d   : > { %3479 = vsyncadd (!%p2987_p1), %s2294_s4, 4294967040  ;;  %s4340_s12 = sld [smem:[#allocation28_spill]]  ;;  %s4341_s22 = sld [smem:[#allocation25_spill]] }
 0xb9e   : > { %s4342_s11 = sld [smem:[#allocation29_spill]]  ;;  %s4343_s30 = smov %s3486_s10 }
 0xba3   : > { %p30_p8 = scmp.ge.s32.totalorder %s4340_s12, 4   ;;  %s4344_s10 = smov %s4341_s22 }
 0xba5   :  { %32 = sbr.rel (!%p30_p8) target bundleno = 17 (0x11), region = 157 }
 0xbac   :  { %2299 = vsyncpa [#allocation3], 1 }
 0xbad   :  { %2301 = vsyncpa [#allocation3 + $0x1], 1 }
 0xbae   :  { %2302 = vsyncpa [#allocation6], 1 }
 0xbaf   :  { %2304 = vsyncpa [#allocation6 + $0x1], 1 }
 0xbb0   :  { %2305 = vsyncpa [#allocation9], 1 }
 0xbb1   :  { %2307 = vsyncpa [#allocation9 + $0x1], 1 }
 0xbb2   :  { %2308 = vsyncpa [#allocation12], 1 }
 0xbb3   :  { %2309 = vsyncpa [#allocation15], 1 }
 0xbb4   :  { %2310 = vsyncpa [#allocation4], 1 }
 0xbb5   :  { %2312 = vsyncpa [#allocation4 + $0x1], 1 }

// kernel: tpu_custom_call.1
= control target key start
LH: loop header
LB: loop body
LE: loop exit
PB: predicated region body
PF: predicated region fallthrough
CT: control target
= control target key end

     0   :  { %s4243_s0 = inlined_call_operand.hbm [shape: f32[2,16,128], index: 0, kind: input, shape index: {}]   ;;  %s4244_s1 = inlined_call_operand.hbm [shape: f32[2,16,128], index: 1, kind: input, shape index: {}]   ;;  %s4245_s2 = inlined_call_operand.hbm [shape: f32[2,8,128], index: 2, kind: input, shape index: {}]   ;;  %s4246_s3 = inlined_call_operand.hbm [shape: f32[2,8,128], index: 3, kind: input, shape index: {}]   ;;  %s4247_s4 = inlined_call_operand.hbm [shape: bf16[4,128,128], index: 4, kind: input, shape index: {}]   ;;  %s4248_s5 = inlined_call_operand.hbm [shape: bf16[128,256], index: 5, kind: input, shape index: {}]   ;;  %s4249_s6 = inlined_call_operand.hbm [shape: bf16[256,128], index: 6, kind: input, shape index: {}]   ;;  %s4250_s7 = inlined_call_operand.hbm [shape: bf16[384,128], index: 7, kind: input, shape index: {}]   ;;  %s4251_s8 = inlined_call_operand.vmem [shape: f32[5,128], index: 8, kind: input, shape index: {}]   ;;  %s4252_s9 = inlined_call_operand.hbm [shape: f32[2,16,128], index: 9, kind: output, shape index: {}]  }
   0x1   :  { %4286 = sst [smem:[#allocation31_spill]] %s4244_s1 }
   0x2   :  { %4287 = sst [smem:[#allocation32_spill]] %s4247_s4 }
   0x3   :  { %4288 = sst [smem:[#allocation33_spill]] %s4248_s5 }
   0x4   :  { %4289 = sst [smem:[#allocation34_spill]] %s4251_s8 }
   0x5   :  { %4290 = sst [smem:[#allocation35_spill]] %s4252_s9 }
   0x6   :  { %14 = vsyncpa [#allocation3], 0 }
   0x7   :  { %16 = vsyncpa [#allocation3 + $0x1], 0 }
   0x8   :  { %17 = vsyncpa [#allocation6], 0 }
   0x9   :  { %19 = vsyncpa [#allocation6 + $0x1], 0 }
   0xa   :  { %20 = vsyncpa [#allocation9], 0 }
   0xb   :  { %22 = vsyncpa [#allocation9 + $0x1], 0 }
   0xc   :  { %23 = vsyncpa [#allocation12], 0 }
   0xd   :  { %24 = vsyncpa [#allocation15], 0 }
   0xe   :  { %25 = vsyncpa [#allocation4], 0 }
   0xf   :  { %27 = vsyncpa [#allocation4 + $0x1], 0  ;;  %s3565_s30 = smov 0   ;;  %s3567_s10 = smov 0  }
  0x10   :  { %s3569_s11 = smov 0   ;;  %s3571_s12 = smov 0  }
  0x11 LB: > { %4291 = sst [smem:[#allocation24_spill]] %s3482_s30  ;;  %s3586_s13 = sadd.s32 4294967295, %s3494_s12   ;;  %s3494_s12 = sphi %s3571_s12, %s4340_s12   ;;  %s3490_s11 = sphi %s3569_s11, %s4342_s11   ;;  %s3486_s10 = sphi %s3567_s10, %s4344_s10   ;;  %s3482_s30 = sphi %s3565_s30, %s4343_s30  }
  0x12   : > { %4292 = sst [smem:[#allocation25_spill]] %s3490_s11  ;;  %s2455_s14 = sadd.s32 4294967294, %s3494_s12  }
  0x13   : > { %4293 = sst [smem:[#allocation26_spill]] %s3586_s13  ;;  %p53_p0 = scmp.ne.s32.totalorder %s3486_s10, %s3482_s30 }
  0x14   : > { %p4253_p1 = scmp.eq.s32.totalorder %s3586_s13, 0  ;;  %p266_p3 = scmp.eq.s32.totalorder %s2455_s14, 1 }
  0x15   : > { %p2456_p5 = scmp.ge.s32.totalorder %s3494_s12, 1  ;;  %p273_p7 = scmp.lt.s32.totalorder %s3494_s12, 3 }
  0x16   : > { %p3595_p4 = por %p4253_p1, %p53_p0  ;;  %p3600_p6 = por %p266_p3, %p53_p0 }
  0x17   : > { %p3605_p8 = pnand %p2456_p5, %p273_p7  ;;  %s3496_s18 = smov [#allocation10]  }
  0x18   : > { %s4294_s15 = scalar_select %p3595_p4, 1, 0 }
  0x19   : > { %s4295_s16 = scalar_select %p3600_p6, 1, 0 }
  0x1a   : > { %s4297_s17 = scalar_select %p3605_p8, 1, 0 }
  0x1b   : > { %4296 = sst [smem:[#allocation27_spill]] %s4295_s16  ;;  %s285_s19 = sshll.u32 %s3496_s18, 4  ;;  %s3609_s19 = int_to_ptr.vmem [resolvable:$true] %s285_s19 }
  0x1c   : > { %p2960_p9 = pneg %p3605_p8  ;;  %s3497_s21 = smov [#allocation11]  }
  0x1d   : > { %s298_s22 = sshll.u32 %s3497_s21, 4  ;;  %s4299_s4 = sld [smem:[#allocation32_spill]]  ;;  %s3620_s22 = int_to_ptr.vmem [resolvable:$true] %s298_s22 }
  0x1e   : > { %p3616_p11 = pnand %p2960_p9, %p4253_p1 }
  0x20   : > { %s4298_s20 = scalar_select %p3616_p11, 1, 0 }
  0x21   : > { %p3630_p13 = pneg %p3616_p11 }
  0x23   : > { %s3176_s25 = scalar_lea.hbm %s4299_s4, 4096 }
  0x24   : > { %p3177_p12 = scmp.ne.s32.totalorder %s4299_s4, %s3176_s25  ;;  %p3183_p5 = scmp.lt.u32.totalorder %s3176_s25, %s4299_s4 }
  0x25   : > { %s4300_s28 = scalar_select %p3630_p13, 1, 0 }
  0x26   : > { %p3179_p0 = pnand %p3630_p13, %p3177_p12 }
  0x28   : > { %p3180_p3 = pneg %p3179_p0 }
  0x2a   : > { %p3185_p7 = pnand %p3183_p5, %p3180_p3 }
  0x2c   : > { %3188 = shalt.err (!%p3185_p7)
}
  0x2d   : > { %s3189_s18 = scalar_lea.vmem %s3609_s19, 4096  ;;  %p3197_p2 = scmp.lt.s32.totalorder %s3609_s19, %s3609_s19 }
  0x2e   : > { %p3190_p9 = scmp.ne.s32.totalorder %s3609_s19, %s3189_s18  ;;  %p3198_p6 = scmp.lt.s32.totalorder %s3189_s18, %s3189_s18 }
  0x30   : > { %p3192_p10 = pnand %p3190_p9, %p3630_p13  ;;  %p3199_p12 = por %p3198_p6, %p3197_p2 }
  0x32   : > { %p3193_p1 = pneg %p3192_p10 }
  0x34   : > { %p3200_p0 = pnand %p3199_p12, %p3193_p1 }
  0x36   : > { %3203 = shalt.err (!%p3200_p0)
}
  0x37   : > { %s4256_s21 = smov 64   ;;  %s4258_s23 = smov 4  }
  0x38   : > { %2963 = dma.hbm_to_vmem [thread:$0]  (!%p3616_p11), %s4299_s4, 4096, %s3609_s19, [#allocation9], %s4256_s21, %s4256_s21, %s4258_s23  }
  0x39   : > { %s4301_s5 = sld [smem:[#allocation33_spill]] }
  0x3f   : > { %s3204_s29 = scalar_lea.hbm %s4301_s5, 2048 }
  0x40   : > { %p3205_p1 = scmp.ne.s32.totalorder %s4301_s5, %s3204_s29  ;;  %p3211_p10 = scmp.lt.u32.totalorder %s3204_s29, %s4301_s5 }
  0x42   : > { %p3207_p2 = pnand %p3205_p1, %p3630_p13 }
  0x44   : > { %p3208_p6 = pneg %p3207_p2 }
  0x46   : > { %p3213_p3 = pnand %p3211_p10, %p3208_p6 }
  0x48   : > { %3216 = shalt.err (!%p3213_p3)
}
  0x49   : > { %s3217_s19 = scalar_lea.vmem %s3620_s22, 2048  ;;  %p3225_p12 = scmp.lt.s32.totalorder %s3620_s22, %s3620_s22 }
  0x4a   : > { %p3218_p5 = scmp.ne.s32.totalorder %s3620_s22, %s3217_s19  ;;  %p3226_p0 = scmp.lt.s32.totalorder %s3217_s19, %s3217_s19 }
  0x4c   : > { %p3220_p7 = pnand %p3218_p5, %p3630_p13  ;;  %p3227_p1 = por %p3226_p0, %p3225_p12 }
  0x4e   : > { %p3221_p9 = pneg %p3220_p7 }
  0x50   : > { %p3228_p2 = pnand %p3227_p1, %p3221_p9 }
  0x52   : > { %3231 = shalt.err (!%p3228_p2)
}
  0x53   : > { %s4260_s24 = smov 128   ;;  %s4262_s30 = smov 8  }
  0x54   : > { %2966 = dma.hbm_to_vmem [thread:$0]  (!%p3616_p11), %s4301_s5, 2048, %s3620_s22, [#allocation12], %s4260_s24, %s4260_s24, %s4262_s30  }
  0x55   : > { %s3681_s26 = sadd.s32 1, %s3494_s12   ;;  %s40_s29 = sadd.s32 1, %s3490_s11 }
  0x56   : > { %4302 = sst [smem:[#allocation28_spill]] %s3681_s26  ;;  %s37_s27 = ssub.s32 %s3494_s12, %s3681_s26 }
  0x57   : > { %p38_p6 = scmp.eq.s32.totalorder %s37_s27, 0  ;;  %p47_p10 = scmp.ne.s32.totalorder %s3490_s11, %s3486_s10 }
  0x58   : > { %p48_p3 = scmp.eq.s32.totalorder %s3494_s12, 0  ;;  %p4304_p7 = scmp.eq.s32.totalorder %s3586_s13, 1 }
  0x59   : > { %s3690_s14 = scalar_select %p38_p6, %s3490_s11, %s40_s29  }
  0x5a   : > { %p49_p5 = por %p48_p3, %p47_p10  ;;  %p3694_p9 = por %p4304_p7, %p47_p10 }
  0x5b   : > { %4303 = sst [smem:[#allocation29_spill]] %s3690_s14  ;;  %p2994_p12 = scmp.lt.s32.totalorder %s3494_s12, 2 }
  0x5c   : > { %s4305_s18 = scalar_select %p3694_p9, 1, 0 }
  0x5d   : > { %s3700_s22 = sand.u32 1, %s3490_s11   ;;  %s4266_s16 = sshll.u32 %s3494_s12, 8 }
  0x5e   : > { %4306 = sst [smem:[#allocation30_spill]] %s4305_s18  ;;  %s4265_s19 = sshll.u32 %s3700_s22, 4 }
  0x5f   : > { %p3704_p0 = pnand %p2994_p12, %p49_p5  ;;  %s4269_s27 = sand.u32 1, %s3494_s12  }
  0x60   : > { %s4308_s1 = sld [smem:[#allocation31_spill]]  ;;  %s366_s24 = scalar_lea.vmem [#allocation5], %s4265_s19 }
  0x61   : > { %s4307_s25 = scalar_select %p3704_p0, 1, 0 }
  0x62   : > { %s373_s30 = sshll.u32 %s366_s24, 4  ;;  %s3502_s4 = smov [#allocation13]   ;;  %s3718_s30 = int_to_ptr.vmem [resolvable:$true] %s373_s30 }
  0x63   : > { %s3720_s5 = sshll.u32 %s3502_s4, 4  ;;  %s3724_s14 = scalar_lea.sflag [#allocation6], %s4269_s27  ;;  %s312_s5 = int_to_ptr.vmem [resolvable:$true] %s3720_s5 }
  0x64   : > { %p3730_p2 = pneg %p3704_p0 }
  0x66   : > { %s3714_s23 = scalar_lea.hbm %s4308_s1, %s4266_s16  ;;  %s3237_s19 = scalar_lea.hbm %s4308_s1, 512 }
  0x67   : > { %s3232_s11 = scalar_lea.hbm %s3714_s23, 256  ;;  %p3238_p3 = scmp.lt.u32.totalorder %s3714_s23, %s4308_s1 }
  0x68   : > { %p3233_p1 = scmp.ne.s32.totalorder %s3714_s23, %s3232_s11  ;;  %p3239_p5 = scmp.lt.u32.totalorder %s3237_s19, %s3232_s11 }
  0x69   : > { %s4309_s21 = scalar_select %p3730_p2, 1, 0 }
  0x6a   : > { %p3235_p6 = pnand %p3730_p2, %p3233_p1  ;;  %p3240_p7 = por %p3239_p5, %p3238_p3 }
  0x6b   : > { %p3241_p12 = scmp.lt.u32.totalorder %s3232_s11, %s3714_s23 }
  0x6c   : > { %p3236_p10 = pneg %p3235_p6 }
  0x6d   : > { %p3242_p9 = por %p3241_p12, %p3240_p7 }
  0x6f   : > { %p3243_p4 = pnand %p3242_p9, %p3236_p10 }
  0x71   : > { %3246 = shalt.err (!%p3243_p4)
}
  0x72   : > { %s3247_s27 = scalar_lea.vmem %s3718_s30, 256  ;;  %s3503_s24 = smov [#allocation5]  }
  0x73   : > { %p3248_p1 = scmp.ne.s32.totalorder %s3718_s30, %s3247_s27  ;;  %s3252_s29 = sshll.u32 %s3503_s24, 4  ;;  %s3253_s29 = int_to_ptr.vmem [resolvable:$false] %s3252_s29 }
  0x74   : > { %s3254_s16 = scalar_lea.vmem %s3253_s29, 512  ;;  %p3255_p11 = scmp.lt.s32.totalorder %s3718_s30, %s3253_s29 }
  0x75   : > { %p3250_p6 = pnand %p3248_p1, %p3730_p2  ;;  %p3256_p13 = scmp.lt.s32.totalorder %s3254_s16, %s3247_s27 }
  0x77   : > { %p3251_p8 = pneg %p3250_p6  ;;  %p3257_p3 = por %p3256_p13, %p3255_p11 }
  0x79   : > { %p3258_p5 = pnand %p3257_p3, %p3251_p8 }
  0x7b   : > { %3261 = shalt.err (!%p3258_p5)
}
  0x7c   : > { %s4310_s11 = smov 8   ;;  %s4311_s19 = smov 128  }
  0x7d   : > { %2979 = dma.hbm_to_vmem [thread:$0]  (!%p3704_p0), %s3714_s23, 256, %s3718_s30, %s3724_s14, %s4311_s19, %s4311_s19, %s4310_s11  }
  0x7e   : > { %s3262_s29 = scalar_lea.hbm %s4249_s6, 2048  ;;  %p4312_p8 = scmp.ne.s32.totalorder %s4300_s28, 0 }
  0x7f   : > { %p3263_p4 = scmp.ne.s32.totalorder %s4249_s6, %s3262_s29  ;;  %p3269_p9 = scmp.lt.u32.totalorder %s3262_s29, %s4249_s6 }
  0x81   : > { %p3265_p11 = pnand %p3263_p4, %p4312_p8 }
  0x83   : > { %p3266_p13 = pneg %p3265_p11 }
  0x85   : > { %p3271_p10 = pnand %p3269_p9, %p3266_p13 }
  0x87   : > { %3274 = shalt.err (!%p3271_p10)
}
  0x88   : > { %s3275_s9 = scalar_lea.vmem %s312_s5, 2048  ;;  %p3283_p6 = scmp.lt.s32.totalorder %s312_s5, %s312_s5 }
  0x89   : > { %p3276_p7 = scmp.ne.s32.totalorder %s312_s5, %s3275_s9  ;;  %p3284_p3 = scmp.lt.s32.totalorder %s3275_s9, %s3275_s9 }
  0x8b   : > { %p3278_p12 = pnand %p3276_p7, %p4312_p8  ;;  %p3285_p5 = por %p3284_p3, %p3283_p6 }
  0x8d   : > { %p3279_p1 = pneg %p3278_p12 }
  0x8f   : > { %p3286_p0 = pnand %p3285_p5, %p3279_p1 }
  0x91   : > { %3289 = shalt.err (!%p3286_p0)
}
  0x92   : > { %p4313_p4 = scmp.ne.s32.totalorder %s4298_s20, 0  ;;  %s4314_s23 = smov 4  }
  0x93   : > { %s4315_s30 = smov 64   ;;  %s3504_s4 = smov [#allocation14]  }
  0x94   : > { %2969 = dma.hbm_to_vmem [thread:$0]  (!%p4313_p4), %s4249_s6, 2048, %s312_s5, [#allocation12], %s4315_s30, %s4315_s30, %s4314_s23  }
  0x95   : > { %s324_s24 = sshll.u32 %s3504_s4, 4  ;;  %s3290_s9 = scalar_lea.hbm %s4250_s7, 3072  ;;  %s325_s24 = int_to_ptr.vmem [resolvable:$true] %s324_s24 }
  0x96   : > { %p3291_p0 = scmp.ne.s32.totalorder %s4250_s7, %s3290_s9  ;;  %p3297_p9 = scmp.lt.u32.totalorder %s3290_s9, %s4250_s7 }
  0x98   : > { %p3293_p11 = pnand %p3291_p0, %p4312_p8 }
  0x9a   : > { %p3294_p13 = pneg %p3293_p11 }
  0x9c   : > { %p3299_p10 = pnand %p3297_p9, %p3294_p13 }
  0x9e   : > { %3302 = shalt.err (!%p3299_p10)
}
  0x9f   : > { %s3303_s5 = scalar_lea.vmem %s325_s24, 3072  ;;  %p3311_p6 = scmp.lt.s32.totalorder %s325_s24, %s325_s24 }
  0xa0   : > { %p3304_p7 = scmp.ne.s32.totalorder %s325_s24, %s3303_s5  ;;  %p3312_p3 = scmp.lt.s32.totalorder %s3303_s5, %s3303_s5 }
  0xa2   : > { %p3306_p12 = pnand %p3304_p7, %p4312_p8  ;;  %p3313_p5 = por %p3312_p3, %p3311_p6 }
  0xa4   : > { %p3307_p1 = pneg %p3306_p12 }
  0xa6   : > { %p3314_p2 = pnand %p3313_p5, %p3307_p1 }
  0xa8   : > { %3317 = shalt.err (!%p3314_p2)
}
  0xa9   : > { %2972 = dma.hbm_to_vmem [thread:$0]  (!%p4313_p4), %s4250_s7, 3072, %s325_s24, [#allocation15], %s4315_s30, %s4315_s30, %s4314_s23  }
  0xaa   : > { %s4316_s28 = sshll.u32 %s3494_s12, 8  ;;  %s4317_s4 = sshll.u32 %s3700_s22, 4 }
  0xab   : > { %s3805_s26 = scalar_lea.hbm %s4243_s0, %s4316_s28  ;;  %s345_s20 = scalar_lea.vmem [#allocation2], %s4317_s4 }
  0xac   : > { %s352_s29 = sshll.u32 %s345_s20, 4  ;;  %s2468_s27 = sshll.u32 %s3700_s22, 3  ;;  %s3809_s29 = int_to_ptr.vmem [resolvable:$true] %s352_s29 }
  0xad   : > { %s342_s9 = scalar_lea.sflag [#allocation3], %s3700_s22  ;;  %s3318_s16 = scalar_lea.hbm %s3805_s26, 256 }
  0xae   : > { %p3319_p2 = scmp.ne.s32.totalorder %s3805_s26, %s3318_s16  ;;  %p4318_p8 = scmp.ne.s32.totalorder %s4309_s21, 0 }
  0xaf   : > { %s3323_s24 = scalar_lea.hbm %s4243_s0, 512  ;;  %p3324_p11 = scmp.lt.u32.totalorder %s3805_s26, %s4243_s0 }
  0xb0   : > { %p3321_p4 = pnand %p3319_p2, %p4318_p8  ;;  %p3325_p13 = scmp.lt.u32.totalorder %s3323_s24, %s3318_s16 }
  0xb1   : > { %p3327_p10 = scmp.lt.u32.totalorder %s3318_s16, %s3805_s26 }
  0xb2   : > { %p3322_p0 = pneg %p3321_p4  ;;  %p3326_p9 = por %p3325_p13, %p3324_p11 }
  0xb4   : > { %p3328_p7 = por %p3327_p10, %p3326_p9 }
  0xb6   : > { %p3329_p12 = pnand %p3328_p7, %p3322_p0 }
  0xb8   : > { %3332 = shalt.err (!%p3329_p12)
}
  0xb9   : > { %s3333_s13 = scalar_lea.vmem %s3809_s29, 256  ;;  %s3505_s28 = smov [#allocation2]  }
  0xba   : > { %p3334_p1 = scmp.ne.s32.totalorder %s3809_s29, %s3333_s13  ;;  %s3338_s18 = sshll.u32 %s3505_s28, 4  ;;  %s3339_s18 = int_to_ptr.vmem [resolvable:$false] %s3338_s18 }
  0xbb   : > { %s3340_s1 = scalar_lea.vmem %s3339_s18, 512  ;;  %p3341_p5 = scmp.lt.s32.totalorder %s3809_s29, %s3339_s18 }
  0xbc   : > { %p3336_p6 = pnand %p3334_p1, %p4318_p8  ;;  %p3342_p2 = scmp.lt.s32.totalorder %s3340_s1, %s3333_s13 }
  0xbe   : > { %p3337_p3 = pneg %p3336_p6  ;;  %p3343_p4 = por %p3342_p2, %p3341_p5 }
  0xc0   : > { %p3344_p11 = pnand %p3343_p4, %p3337_p3 }
  0xc2   : > { %3347 = shalt.err (!%p3344_p11)
}
  0xc3   : > { %p4319_p0 = scmp.ne.s32.totalorder %s4307_s25, 0  ;;  %s2469_s4 = sshll.u32 %s3494_s12, 7 }
  0xc4   : > { %s3845_s23 = scalar_lea.hbm %s4245_s2, %s2469_s4  ;;  %s387_s30 = scalar_lea.vmem [#allocation7], %s2468_s27 }
  0xc5   : > { %2976 = dma.hbm_to_vmem [thread:$0]  (!%p4319_p0), %s3805_s26, 256, %s3809_s29, %s342_s9, %s4311_s19, %s4311_s19, %s4310_s11  }
  0xc6   : > { %s394_s24 = sshll.u32 %s387_s30, 4  ;;  %s3348_s5 = scalar_lea.hbm %s3845_s23, 128  ;;  %s395_s24 = int_to_ptr.vmem [resolvable:$true] %s394_s24 }
  0xc7   : > { %p3349_p13 = scmp.ne.s32.totalorder %s3845_s23, %s3348_s5  ;;  %s3353_s26 = scalar_lea.hbm %s4245_s2, 256 }
  0xc8   : > { %p3354_p7 = scmp.lt.u32.totalorder %s3845_s23, %s4245_s2  ;;  %p3355_p12 = scmp.lt.u32.totalorder %s3353_s26, %s3348_s5 }
  0xc9   : > { %p3351_p9 = pnand %p3349_p13, %p4318_p8  ;;  %p3357_p6 = scmp.lt.u32.totalorder %s3348_s5, %s3845_s23 }
  0xca   : > { %p3356_p1 = por %p3355_p12, %p3354_p7 }
  0xcb   : > { %p3352_p10 = pneg %p3351_p9 }
  0xcc   : > { %p3358_p3 = por %p3357_p6, %p3356_p1 }
  0xce   : > { %p3359_p5 = pnand %p3358_p3, %p3352_p10 }
  0xd0   : > { %3362 = shalt.err (!%p3359_p5)
}
  0xd1   : > { %s3363_s8 = scalar_lea.vmem %s395_s24, 128  ;;  %s3506_s13 = smov [#allocation7]  }
  0xd2   : > { %p3364_p2 = scmp.ne.s32.totalorder %s395_s24, %s3363_s8  ;;  %s3368_s28 = sshll.u32 %s3506_s13, 4  ;;  %s3369_s28 = int_to_ptr.vmem [resolvable:$false] %s3368_s28 }
  0xd3   : > { %s3370_s18 = scalar_lea.vmem %s3369_s28, 256  ;;  %p3371_p13 = scmp.lt.s32.totalorder %s395_s24, %s3369_s28 }
  0xd4   : > { %p3366_p4 = pnand %p3364_p2, %p4318_p8  ;;  %p3372_p9 = scmp.lt.s32.totalorder %s3370_s18, %s3363_s8 }
  0xd6   : > { %p3367_p11 = pneg %p3366_p4  ;;  %p3373_p0 = por %p3372_p9, %p3371_p13 }
  0xd8   : > { %p3374_p7 = pnand %p3373_p0, %p3367_p11 }
  0xda   : > { %3377 = shalt.err (!%p3374_p7)
}
  0xdb   : > { %p4320_p12 = scmp.ne.s32.totalorder %s4307_s25, 0  ;;  %s3872_s16 = scalar_lea.hbm %s4246_s3, %s2469_s4 }
  0xdc   : > { %s405_s30 = scalar_lea.vmem [#allocation8], %s2468_s27  ;;  %s4321_s11 = sand.u32 1, %s3494_s12  }
  0xdd   : > { %2982 = dma.hbm_to_vmem [thread:$0]  (!%p4320_p12), %s3845_s23, 128, %s395_s24, %s3724_s14  }
  0xde   : > { %s412_s5 = sshll.u32 %s405_s30, 4  ;;  %s402_s19 = scalar_lea.sflag [#allocation9], %s4321_s11  ;;  %s413_s5 = int_to_ptr.vmem [resolvable:$true] %s412_s5 }
  0xdf   : > { %s3378_s26 = scalar_lea.hbm %s3872_s16, 128  ;;  %s3383_s4 = scalar_lea.hbm %s4246_s3, 256 }
  0xe0   : > { %p3379_p0 = scmp.ne.s32.totalorder %s3872_s16, %s3378_s26  ;;  %p3384_p6 = scmp.lt.u32.totalorder %s3872_s16, %s4246_s3 }
  0xe1   : > { %p3385_p3 = scmp.lt.u32.totalorder %s3383_s4, %s3378_s26  ;;  %p3387_p2 = scmp.lt.u32.totalorder %s3378_s26, %s3872_s16 }
  0xe2   : > { %p3381_p10 = pnand %p3379_p0, %p4318_p8 }
  0xe3   : > { %p3386_p5 = por %p3385_p3, %p3384_p6 }
  0xe4   : > { %p3382_p1 = pneg %p3381_p10 }
  0xe5   : > { %p3388_p4 = por %p3387_p2, %p3386_p5 }
  0xe7   : > { %p3389_p11 = pnand %p3388_p4, %p3382_p1 }
  0xe9   : > { %3392 = shalt.err (!%p3389_p11)
}
  0xea   : > { %s3393_s27 = scalar_lea.vmem %s413_s5, 128  ;;  %s3507_s29 = smov [#allocation8]  }
  0xeb   : > { %p3394_p13 = scmp.ne.s32.totalorder %s413_s5, %s3393_s27  ;;  %s3398_s9 = sshll.u32 %s3507_s29, 4  ;;  %s3399_s9 = int_to_ptr.vmem [resolvable:$false] %s3398_s9 }
  0xec   : > { %s3400_s8 = scalar_lea.vmem %s3399_s9, 256  ;;  %p3401_p0 = scmp.lt.s32.totalorder %s413_s5, %s3399_s9 }
  0xed   : > { %p3396_p9 = pnand %p3394_p13, %p4318_p8  ;;  %p3402_p10 = scmp.lt.s32.totalorder %s3400_s8, %s3393_s27 }
  0xef   : > { %p3397_p7 = pneg %p3396_p9  ;;  %p3403_p12 = por %p3402_p10, %p3401_p0 }
  0xf1   : > { %p3404_p3 = pnand %p3403_p12, %p3397_p7 }
  0xf3   : > { %3407 = shalt.err (!%p3404_p3)
}
  0xf4   : > { %p4322_p6 = scmp.ne.s32.totalorder %s4307_s25, 0  ;;  %p4323_p1 = scmp.ne.s32.totalorder %s4297_s17, 0 }
  0xf5   : > { %s3898_s21 = sand.u32 (!%p4323_p1), 1, %s3486_s10   ;;  %p4324_p8 = scmp.ne.s32.totalorder (!%p4323_p1), %s4294_s15, 0 }
  0xf6   : > { %2985 = dma.hbm_to_vmem [thread:$0]  (!%p4322_p6), %s3872_s16, 128, %s413_s5, %s402_s19  }
  0xf7   : > { %421 = sbr.rel (%p4323_p1) target bundleno = 2962 (0xb92), region = 56  ;;  %s3901_s13 = sshll.u32 (!%p4323_p1), %s3898_s21, 4 }
  0xf8   : > { %s424_s28 = scalar_lea.sflag (!%p4323_p1), [#allocation3], %s3898_s21  ;;  %s427_s18 = scalar_lea.vmem (!%p4323_p1), [#allocation2], %s3901_s13 }
  0xfe   : > { %3453 = dma.done.wait (%p4324_p8), %s424_s28, 256  }
  0xff   : > { %3455 = vsyncadd (%p4324_p8), %s424_s28, 4294967040  ;;  %s4325_s25 = sld [smem:[#allocation26_spill]]  ;;  %s436_s20 = scalar_lea.vmem [#allocation5], %s3901_s13 }
 0x105   : > { %s432_s17 = sand.u32 1, %s4325_s25  }
 0x106   : > { %s433_s1 = scalar_lea.sflag [#allocation6], %s432_s17 }
 0x107   : > { %3457 = dma.done.wait (%p4324_p8), %s433_s1, 384  }
 0x108   : > { %3459 = vsyncadd (%p4324_p8), %s433_s1, 4294966912  ;;  %s2475_s16 = sshll.u32 %s3898_s21, 3  ;;  %s451_s5 = scalar_lea.sflag [#allocation9], %s432_s17 }
 0x109   : > { %s3916_s30 = scalar_lea.vmem [#allocation7], %s2475_s16  ;;  %s3918_s11 = scalar_lea.vmem [#allocation8], %s2475_s16 }
 0x10a   : > { %3461 = dma.done.wait (%p4324_p8), %s451_s5, 128  }
 0x10b   : > { %3463 = vsyncadd (%p4324_p8), %s451_s5, 4294967168  ;;  %p4326_p12 = scmp.eq.s32.totalorder %s4325_s25, 0 }
 0x10d   : > { %3465 = dma.done.wait (%p4326_p12), [#allocation9], 4096   ;;  %p4327_p5 = pmov %p4326_p12 }
 0x10f   : > { %3467 = vsyncadd (%p4327_p5), [#allocation9], 4294963200  ;;  %p4328_p2 = pmov %p4327_p5 }
 0x111   : > { %3469 = dma.done.wait (%p4328_p2), [#allocation12], 4096   ;;  %p4329_p4 = pmov %p4328_p2 }
 0x112   : > { %p4330_p11 = pmov %p4328_p2 }
 0x113   : > { %3471 = vsyncadd (%p4329_p4), [#allocation12], 4294963200 }
 0x114   : > { %3473 = dma.done.wait (%p4330_p11), [#allocation15], 3072   ;;  %p4331_p13 = pmov %p4328_p2 }
 0x115   : > { %v3936_v0 = vld [vmem:[%s436_s20] sm:$0xff]  ;;  %v3938_v1 = vld [vmem:[%s436_s20 + $0x8] sm:$0xff]  ;;  %v3508_v4 = vmov 0.0   ;;  %vm3509_vm0 = vmmov 0   ;;  %v525_v25 = vlaneseq  ;;  %vm1093_vm2 = vcmask 130048   ;;  %s4332_s26 = sld [smem:[#allocation34_spill]] }
 0x116   : > { %3475 = vsyncadd (%p4331_p13), [#allocation15], 4294964224  ;;  %v3940_v2 = vld [vmem:[%s427_s18] sm:$0xff]  ;;  %602 = vadd.xlane.f32.xlu0 %v3936_v0  ;;  %v3944_v3 = vld [vmem:[%s427_s18 + $0x8] sm:$0xff]  ;;  %2694 = vmatprep.subr.bf16.mxu1 %v3508_v4  ;;  %v626_v15 = vpack.c.bf16 %v3938_v1, %v3936_v0  ;;  %vm3511_vm10 = vmmov 1   ;;  %s4333_s14 = sld [smem:[#allocation30_spill]] }
 0x117   : > { %578 = vadd.xlane.f32.xlu1 %v3940_v2  ;;  %2734 = vmatprep.subr.bf16.mxu0 %v3508_v4  ;;  %v3046_v5 = vld [vmem:[#allocation11] ss:$8 sps:$4 sm:$0xff]   ;;  %v3047_v6 = vld [vmem:[#allocation11 + $0x10] ss:$8 sps:$4 sm:$0xff]   ;;  %v3054_v14 = vld [vmem:[#allocation11 + $0x4] ss:$8 sps:$4 sm:$0xff]  }
 0x118   : > { %2695 = vmatpush3.bf16.msra.mxu1 %v3046_v5  ;;  %2710 = vmatprep.mubr.msk.bf16.mxu1 %vm3509_vm0, %v3508_v4  ;;  %v3048_v7 = vld [vmem:[#allocation11 + $0x20] ss:$8 sps:$4 sm:$0xff]   ;;  %v3049_v9 = vld [vmem:[#allocation11 + $0x30] ss:$8 sps:$4 sm:$0xff]   ;;  %v3055_v16 = vld [vmem:[#allocation11 + $0x14] ss:$8 sps:$4 sm:$0xff]  }
 0x119   : > { %2696 = vmatprep.subr.bf16.mxu1 %v3508_v4  ;;  %2750 = vmatprep.mubr.msk.bf16.mxu0 %vm3509_vm0, %v3508_v4  ;;  %v3063_v8 = vld [vmem:[#allocation10] sm:$0xff]   ;;  %v3051_v11 = vld [vmem:[#allocation11 + $0x50] ss:$8 sps:$4 sm:$0xff]   ;;  %v3057_v18 = vld [vmem:[#allocation11 + $0x34] ss:$8 sps:$4 sm:$0xff]   ;;  %v526_v26 = vand.u32 127, %v525_v25 }
 0x11a   : > { %604 = vadd.xlane.f32.xlu0 %v3938_v1  ;;  %2735 = vmatpush3.bf16.msra.mxu0 %v3063_v8  ;;  %v3050_v10 = vld [vmem:[#allocation11 + $0x40] ss:$8 sps:$4 sm:$0xff]   ;;  %v3053_v13 = vld [vmem:[#allocation11 + $0x70] ss:$8 sps:$4 sm:$0xff]   ;;  %v3056_v17 = vld [vmem:[#allocation11 + $0x24] ss:$8 sps:$4 sm:$0xff]  }
 0x11b   : > { %580 = vadd.xlane.f32.xlu1 %v3944_v3  ;;  %2736 = vmatprep.subr.bf16.mxu0 %v3508_v4  ;;  %v3052_v12 = vld [vmem:[#allocation11 + $0x60] ss:$8 sps:$4 sm:$0xff]   ;;  %v3058_v19 = vld [vmem:[#allocation11 + $0x44] ss:$8 sps:$4 sm:$0xff]   ;;  %v3059_v20 = vld [vmem:[#allocation11 + $0x54] ss:$8 sps:$4 sm:$0xff]  }
 0x11c   : > { %2697 = vmatpush3.bf16.msra.mxu1 %v3047_v6  ;;  %v3060_v21 = vld [vmem:[#allocation11 + $0x64] ss:$8 sps:$4 sm:$0xff]   ;;  %v3061_v22 = vld [vmem:[#allocation11 + $0x74] ss:$8 sps:$4 sm:$0xff]   ;;  %vm527_vm1 = vcmp.lt.s32.totalorder %v526_v26, 32  ;;  %s2588_s23 = sshll.u32 %s4325_s25, 8 }
 0x11d   : > { %2698 = vmatprep.subr.bf16.mxu1 %v3508_v4  ;;  %v3062_v23 = vld [vmem:[#allocation10 + $0x40] sm:$0xff]   ;;  %v3064_v24 = vld [vmem:[#allocation10 + $0x48] sm:$0xff]   ;;  %v2482_v31 = vsel %vm527_vm1, 1.0, %v3508_v4  ;;  %v3066_v49 = vld [vmem:[#allocation10 + $0x50] sm:$0xff]   ;;  %s519_s4 = scalar_lea.vmem [#allocation16], %s3901_s13  ;;  %s4334_s29 = sld [smem:[#allocation35_spill]] }
 0x11e   : > { %v3065_v48 = vld [vmem:[#allocation10 + $0x8] sm:$0xff]   ;;  %v3067_v50 = vld [vmem:[#allocation10 + $0x10] sm:$0xff]   ;;  %v3068_v51 = vld [vmem:[#allocation10 + $0x58] sm:$0xff]   ;;  %s2278_s24 = sshll.u32 %s519_s4, 4  ;;  %s2265_s8 = scalar_lea.sflag [#allocation4], %s3898_s21  ;;  %s4199_s24 = int_to_ptr.vmem [resolvable:$true] %s2278_s24 }
 0x11f   : > { %2737 = vmatpush3.bf16.msra.mxu0 %v3065_v48  ;;  %v3069_v52 = vld [vmem:[#allocation10 + $0x18] sm:$0xff]   ;;  %v3070_v53 = vld [vmem:[#allocation10 + $0x60] sm:$0xff]   ;;  %v3072_v55 = vld [vmem:[#allocation10 + $0x68] sm:$0xff]   ;;  %s3408_s13 = scalar_lea.vmem %s4199_s24, 256  ;;  %p4335_p7 = scmp.ne.s32.totalorder %s4333_s14, 0 }
 0x120   : > { %2699 = vmatpush3.bf16.msra.mxu1 %v3048_v7  ;;  %2738 = vmatprep.subr.bf16.mxu0 %v3508_v4  ;;  %v3071_v54 = vld [vmem:[#allocation10 + $0x20] sm:$0xff]   ;;  %v3073_v56 = vld [vmem:[#allocation10 + $0x28] sm:$0xff]   ;;  %v3074_v57 = vld [vmem:[#allocation10 + $0x70] sm:$0xff]   ;;  %p3409_p9 = scmp.ne.s32.totalorder %s4199_s24, %s3408_s13  ;;  %s3512_s28 = smov [#allocation16]  }
 0x121   : > { %2700 = vmatprep.subr.bf16.mxu1 %v3508_v4  ;;  %v3075_v58 = vld [vmem:[#allocation10 + $0x30] sm:$0xff]   ;;  %v3076_v59 = vld [vmem:[#allocation10 + $0x78] sm:$0xff]   ;;  %s3412_s18 = sshll.u32 %s3512_s28, 4  ;;  %s3413_s18 = int_to_ptr.vmem [resolvable:$false] %s3412_s18 }
 0x122   : > { %v3077_v60 = vld [vmem:[#allocation10 + $0x38] sm:$0xff]   ;;  %p3410_p0 = pnand %p3409_p9, %p4335_p7  ;;  %s3414_s25 = scalar_lea.vmem %s3413_s18, 512 }
 0x123   : > { %2739 = vmatpush3.bf16.msra.mxu0 %v3067_v50  ;;  %s4197_s9 = scalar_lea.hbm %s4334_s29, %s2588_s23  ;;  %p3415_p3 = scmp.lt.s32.totalorder %s4199_s24, %s3413_s18 }
 0x124   : > { %2701 = vmatpush3.bf16.msra.mxu1 %v3049_v9  ;;  %2740 = vmatprep.subr.bf16.mxu0 %v3508_v4  ;;  %p3411_p10 = pneg %p3410_p0  ;;  %p3416_p6 = scmp.lt.s32.totalorder %s3414_s25, %s3408_s13 }
 0x125   : > { %2702 = vmatprep.subr.bf16.mxu1 %v3508_v4 }
 0x126   : > { %p3417_p1 = por %p3416_p6, %p3415_p3 }
 0x127   : > { %2741 = vmatpush3.bf16.msra.mxu0 %v3069_v52 }
 0x128   : > { %2703 = vmatpush3.bf16.msra.mxu1 %v3050_v10  ;;  %2742 = vmatprep.subr.bf16.mxu0 %v3508_v4  ;;  %p3418_p8 = pnand %p3417_p1, %p3411_p10 }
 0x129   : > { %2704 = vmatprep.subr.bf16.mxu1 %v3508_v4 }
 0x12b   : > { %2743 = vmatpush3.bf16.msra.mxu0 %v3071_v54 }
 0x12c   : > { %2705 = vmatpush3.bf16.msra.mxu1 %v3051_v11  ;;  %2744 = vmatprep.subr.bf16.mxu0 %v3508_v4 }
 0x12d   : > { %2706 = vmatprep.subr.bf16.mxu1 %v3508_v4 }
 0x12f   : > { %2745 = vmatpush3.bf16.msra.mxu0 %v3073_v56 }
 0x130   : > { %2707 = vmatpush3.bf16.msra.mxu1 %v3052_v12  ;;  %2746 = vmatprep.subr.bf16.mxu0 %v3508_v4 }
 0x131   : > { %2708 = vmatprep.subr.bf16.mxu1 %v3508_v4 }
 0x133   : > { %2747 = vmatpush3.bf16.msra.mxu0 %v3075_v58 }
 0x134   : > { %2709 = vmatpush3.bf16.msra.mxu1 %v3053_v13  ;;  %2748 = vmatprep.subr.bf16.mxu0 %v3508_v4 }
 0x135   : > { %2714 = vmatprep.subr.bf16.mxu1 %v3508_v4 }
 0x137   : > { %2711 = vmatmul.mubr.bf16.vlgmr.msra.gmra.mrb[0].mxu1 %v626_v15  ;;  %2749 = vmatpush3.bf16.msra.mxu0 %v3077_v60 }
 0x138   : > { %2715 = vmatpush3.bf16.msra.mxu1 %v3054_v14  ;;  %2730 = vmatprep.mubr.msk.bf16.mxu1 %vm3509_vm0, %v3508_v4 }
 0x139   : > { %2716 = vmatprep.subr.bf16.mxu1 %v3508_v4  ;;  %2780 = vmatprep.subr.bf16.mxu0 %v3508_v4 }
 0x13c   : > { %2717 = vmatpush3.bf16.msra.mxu1 %v3055_v16 }
 0x13d   : > { %2718 = vmatprep.subr.bf16.mxu1 %v3508_v4 }
 0x140   : > { %2719 = vmatpush3.bf16.msra.mxu1 %v3056_v17 }
 0x141   : > { %2720 = vmatprep.subr.bf16.mxu1 %v3508_v4 }
 0x144   : > { %2721 = vmatpush3.bf16.msra.mxu1 %v3057_v18 }
 0x145   : > { %2722 = vmatprep.subr.bf16.mxu1 %v3508_v4 }
 0x148   : > { %2723 = vmatpush3.bf16.msra.mxu1 %v3058_v19 }
 0x149   : > { %2724 = vmatprep.subr.bf16.mxu1 %v3508_v4 }
 0x14c   : > { %2725 = vmatpush3.bf16.msra.mxu1 %v3059_v20 }
 0x14d   : > { %2726 = vmatprep.subr.bf16.mxu1 %v3508_v4 }
 0x150   : > { %2727 = vmatpush3.bf16.msra.mxu1 %v3060_v21 }
 0x151   : > { %2728 = vmatprep.subr.bf16.mxu1 %v3508_v4 }
 0x154   : > { %2729 = vmatpush3.bf16.msra.mxu1 %v3061_v22 }
 0x155   : > { %2754 = vmatprep.subr.bf16.mxu1 %v3508_v4 }
 0x157   : > { %2731 = vmatmul.mubr.bf16.vlgmr.msra.gmra.mrb[4].mxu1 %v626_v15 }
 0x158   : > { %2755 = vmatpush3.bf16.msra.mxu1 %v3062_v23  ;;  %2770 = vmatprep.mubr.msk.bf16.mxu1 %vm3509_vm0, %v3508_v4 }
 0x159   : > { %2756 = vmatprep.subr.bf16.mxu1 %v3508_v4 }
 0x15c   : > { %2757 = vmatpush3.bf16.msra.mxu1 %v3064_v24 }
 0x15d   : > { %2758 = vmatprep.subr.bf16.mxu1 %v3508_v4 }
 0x160   : > { %2759 = vmatpush3.bf16.msra.mxu1 %v3066_v49 }
 0x161   : > { %2760 = vmatprep.subr.bf16.mxu1 %v3508_v4 }
 0x164   : > { %2761 = vmatpush3.bf16.msra.mxu1 %v3068_v51 }
 0x165   : > { %2762 = vmatprep.subr.bf16.mxu1 %v3508_v4 }
 0x168   : > { %2763 = vmatpush3.bf16.msra.mxu1 %v3070_v53 }
 0x169   : > { %2764 = vmatprep.subr.bf16.mxu1 %v3508_v4 }
 0x16c   : > { %2765 = vmatpush3.bf16.msra.mxu1 %v3072_v55 }
 0x16d   : > { %2766 = vmatprep.subr.bf16.mxu1 %v3508_v4 }
 0x170   : > { %2767 = vmatpush3.bf16.msra.mxu1 %v3074_v57  ;;  %v530_v57 = vadd.f32 %v3944_v3, %v3940_v2 }
 0x171   : > { %2768 = vmatprep.subr.bf16.mxu1 %v3508_v4 }
 0x172   : > { %v531_v58 = vrot.slane %v530_v57, 4 }
 0x174   : > { %2769 = vmatpush3.bf16.msra.mxu1 %v3076_v59  ;;  %v532_v59 = vadd.f32 %v531_v58, %v530_v57 }
 0x175   : > { %2774 = vmatprep.subr.bf16.mxu1 %v3508_v4 }
 0x1a3   : > { %v603_v27 = vpop.xlane.xlu0 %602 }
 0x1a4   : > { %v579_v28 = vpop.xlane.xlu1 %578  ;;  %v606_v29 = vmul.f32 0.03125, %v603_v27 }
 0x1a5   : > { %v582_v30 = vmul.f32 0.03125, %v579_v28 }
 0x1a6   : > { %v608_v32 = vsub.f32 %v3936_v0, %v606_v29 }
 0x1a7   : > { %v584_v33 = vsub.f32 %v3940_v2, %v582_v30  ;;  %v605_v34 = vpop.xlane.xlu0 %604 }
 0x1a8   : > { %v581_v35 = vpop.xlane.xlu1 %580  ;;  %v607_v36 = vmul.f32 0.03125, %v605_v34  ;;  %v3983_v38 = vmul.f32 %v2482_v31, %v608_v32 }
 0x1a9   : > { %v583_v37 = vmul.f32 0.03125, %v581_v35  ;;  %v3985_v39 = vmul.f32 %v2482_v31, %v584_v33 }
 0x1aa   : > { %v609_v40 = vsub.f32 %v3938_v1, %v607_v36  ;;  %v612_v42 = vmul.f32 %v3983_v38, %v3983_v38 }
 0x1ab   : > { %v585_v41 = vsub.f32 %v3944_v3, %v583_v37  ;;  %v588_v44 = vmul.f32 %v3985_v39, %v3985_v39 }
 0x1ac   : > { %614 = vadd.xlane.f32.xlu0 %v612_v42  ;;  %v3991_v43 = vmul.f32 %v2482_v31, %v609_v40 }
 0x1ad   : > { %v3995_v45 = vmul.f32 %v2482_v31, %v585_v41 }
 0x1ae   : > { %v613_v46 = vmul.f32 %v3991_v43, %v3991_v43 }
 0x1af   : > { %v589_v47 = vmul.f32 %v3995_v45, %v3995_v45 }
 0x1b0   : > { %616 = vadd.xlane.f32.xlu1 %v613_v46  ;;  %590 = vadd.xlane.f32.xlu0 %v588_v44 }
 0x1b4   : > { %592 = vadd.xlane.f32.xlu1 %v589_v47 }
 0x20a   : > { %v725_v61 = vpop.f32.mrb[0].mxu1 }
 0x20b   : > { %v1117_v62 = vmul.f32 %v725_v61, %v725_v61  ;;  %v2712_v63 = vpop.f32.mrb[1].mxu1 }
 0x20c   : > { %v728_v5 = vpop.f32.mrb[2].mxu1 }
 0x20d   : > { %v1116_v6 = vpack.c.bf16 %v728_v5, %v725_v61  ;;  %v1118_v7 = vmul.f32 %v728_v5, %v728_v5  ;;  %v2713_v8 = vpop.f32.mrb[3].mxu1  ;;  %v533_v61 = vrot.slane %v532_v59, 2 }
 0x20f   : > { %v1119_v9 = vpack.c.bf16 %v1118_v7, %v1117_v62  ;;  %v534_v7 = vadd.f32 %v533_v61, %v532_v59 }
 0x22a   : > { %v4014_v22 = vpop.f32.mrb[4].mxu1 }
 0x22b   : > { %v4018_v23 = vmul.f32 %v4014_v22, %v4014_v22  ;;  %v2732_v24 = vpop.f32.mrb[5].mxu1 }
 0x22c   : > { %v4020_v26 = vpop.f32.mrb[6].mxu1 }
 0x22d   : > { %v1480_v28 = vpack.c.bf16 %v4020_v26, %v4014_v22  ;;  %v4026_v29 = vmul.f32 %v4020_v26, %v4020_v26  ;;  %v2733_v30 = vpop.f32.mrb[7].mxu1 }
 0x22f   : > { %v1483_v32 = vpack.c.bf16 %v4026_v29, %v4018_v23 }
 0x239   : > { %v615_v10 = vpop.xlane.xlu0 %614 }
 0x23a   : > { %v618_v11 = vmul.f32 0.032258064, %v615_v10 }
 0x23c   : > { %v620_v12 = vadd.f32 1e-05, %v618_v11 }
 0x23d   : > { %v591_v13 = vpop.xlane.xlu0 %590  ;;  %v617_v14 = vpop.xlane.xlu1 %616 }
 0x23e   : > { %v594_v15 = vmul.f32 0.032258064, %v591_v13  ;;  %v619_v16 = vmul.f32 0.032258064, %v617_v14  ;;  %3134 = vrsqrt.f32 %v620_v12 }
 0x240   : > { %v596_v17 = vadd.f32 1e-05, %v594_v15  ;;  %v621_v18 = vadd.f32 1e-05, %v619_v16 }
 0x241   : > { %v593_v19 = vpop.xlane.xlu1 %592 }
 0x242   : > { %v595_v20 = vmul.f32 0.032258064, %v593_v19  ;;  %3136 = vrsqrt.f32 %v621_v18 }
 0x243   : > { %3138 = vrsqrt.f32 %v596_v17 }
 0x244   : > { %v597_v21 = vadd.f32 1e-05, %v595_v20 }
 0x246   : > { %3140 = vrsqrt.f32 %v597_v21 }
 0x248   : > { %v3135_v27 = vpop.eup %3134 }
 0x249   : > { %v624_v34 = vmul.f32 %v3135_v27, %v3983_v38 }
 0x24c   : > { %v3137_v31 = vpop.eup %3136 }
 0x24d   : > { %v3139_v33 = vpop.eup %3138  ;;  %v625_v35 = vmul.f32 %v3137_v31, %v3991_v43  ;;  %v3510_v31 = vmov 0  }
 0x24e   : > { %v600_v40 = vmul.f32 %v3139_v33, %v3985_v39 }
 0x24f   : > { %v960_v37 = vpack.c.bf16 %v625_v35, %v624_v34  ;;  %v3080_v34 = vld [vmem:[#allocation10 + $0x80] sm:$0xff]  }
 0x250   : > { %v3141_v36 = vpop.eup %3140 }
 0x251   : > { %v601_v41 = vmul.f32 %v3141_v36, %v3995_v45  ;;  %2771 = vmatmul.mubr.bf16.vlgmr.msra.gmra.mrb[8].mxu1 %v960_v37  ;;  %v3082_v36 = vld [vmem:[#allocation10 + $0x88] sm:$0xff]  }
 0x252   : > { %2776 = vmatprep.mubr.msk.bf16.mxu1 %vm3509_vm0, %v3508_v4 }
 0x253   : > { %v870_v42 = vpack.c.bf16 %v601_v41, %v600_v40  ;;  %v3086_v40 = vld [vmem:[#allocation10 + $0x98] sm:$0xff]   ;;  %v3088_v41 = vld [vmem:[#allocation10 + $0xa0] sm:$0xff]  }
 0x255   : > { %2751 = vmatmul.mubr.bf16.vlgmr.msra.gmra.mrb[0].mxu0 %v870_v42  ;;  %v3090_v42 = vld [vmem:[#allocation10 + $0xa8] sm:$0xff]  }
 0x256   : > { %2796 = vmatprep.mubr.msk.bf16.mxu0 %vm3509_vm0, %v3508_v4  ;;  %2781 = vmatpush3.bf16.msra.mxu0 %v3080_v34 }
 0x257   : > { %2782 = vmatprep.subr.bf16.mxu0 %v3508_v4 }
 0x25a   : > { %2783 = vmatpush3.bf16.msra.mxu0 %v3082_v36 }
 0x25b   : > { %2784 = vmatprep.subr.bf16.mxu0 %v3508_v4 }
 0x324   : > { %v1043_v44 = vpop.f32.mrb[8].mxu1 }
 0x325   : > { %v2772_v46 = vpop.f32.mrb[9].mxu1 }
 0x326   : > { %v1046_v38 = vpop.f32.mrb[10].mxu1  ;;  %v3092_v46 = vld [vmem:[#allocation10 + $0xb0] sm:$0xff]  }
 0x327   : > { %v1051_v47 = vpack.c.bf16 %v1046_v38, %v1043_v44  ;;  %v2773_v43 = vpop.f32.mrb[11].mxu1 }
 0x328   : > { %v953_v48 = vpop.f32.mrb[0].mxu0 }
 0x329   : > { %v2752_v49 = vpop.f32.mrb[1].mxu0  ;;  %2775 = vmatpush3.bf16.xpose.msra.mxu1 %v1051_v47  ;;  %v3093_v47 = vld [vmem:[#allocation10 + $0xb8] sm:$0xff]  }
 0x32a   : > { %v956_v39 = vpop.f32.mrb[2].mxu0  ;;  %1124 = vmatprep.subr.bf16.mxu1 %v1119_v9  ;;  %v535_v9 = vrot.slane %v534_v7, 1  ;;  %v554_v49 = vadd.f32 %v3938_v1, %v3936_v0 }
 0x32b   : > { %v1050_v50 = vpack.c.bf16 %v956_v39, %v953_v48  ;;  %v2753_v45 = vpop.f32.mrb[3].mxu0 }
 0x32c   : > { %v536_v10 = vadd.f32 %v535_v9, %v534_v7  ;;  %v555_v39 = vrot.slane %v554_v49, 4 }
 0x32e   : > { %v537_v14 = vmul.f32 0.0625, %v536_v10 }
 0x330   : > { %2777 = vmatmul.mubr.bf16.vlgmr.msra.gmra.mrb[12].mxu1 %v1050_v50  ;;  %v538_v16 = vsub.f32 %v3940_v2, %v537_v14  ;;  %v539_v17 = vsub.f32 %v3944_v3, %v537_v14  ;;  %v3084_v3 = vld [vmem:[#allocation10 + $0x90] sm:$0xff]   ;;  %v556_v50 = vadd.f32 %v555_v39, %v554_v49 }
 0x331   : > { %1125 = vmatpush1.bf16.msra.mxu1 %v1116_v6  ;;  %1156 = vmatprep.mubr.bf16.mxu1 %v3510_v31 }
 0x332   : > { %2800 = vmatprep.subr.bf16.mxu1 %v3508_v4  ;;  %v540_v18 = vmul.f32 %v538_v16, %v538_v16  ;;  %v541_v19 = vmul.f32 %v539_v17, %v539_v17  ;;  %2785 = vmatpush3.bf16.msra.mxu0 %v3084_v3  ;;  %v557_v45 = vrot.slane %v556_v50, 2 }
 0x333   : > { %2786 = vmatprep.subr.bf16.mxu0 %v3508_v4 }
 0x334   : > { %v542_v20 = vadd.f32 %v541_v19, %v540_v18  ;;  %v3085_v18 = vld [vmem:[#allocation10 + $0xe0] sm:$0xff]   ;;  %v3087_v19 = vld [vmem:[#allocation10 + $0xe8] sm:$0xff]  }
 0x336   : > { %v543_v21 = vrot.slane %v542_v20, 4  ;;  %2787 = vmatpush3.bf16.msra.mxu0 %v3086_v40 }
 0x337   : > { %2788 = vmatprep.subr.bf16.mxu0 %v3508_v4 }
 0x338   : > { %v544_v24 = vadd.f32 %v543_v21, %v542_v20  ;;  %v3089_v21 = vld [vmem:[#allocation10 + $0xf0] sm:$0xff]  }
 0x33a   : > { %v545_v27 = vrot.slane %v544_v24, 2  ;;  %2789 = vmatpush3.bf16.msra.mxu0 %v3088_v41 }
 0x33b   : > { %2790 = vmatprep.subr.bf16.mxu0 %v3508_v4 }
 0x33c   : > { %v546_v30 = vadd.f32 %v545_v27, %v544_v24 }
 0x33e   : > { %v547_v33 = vrot.slane %v546_v30, 1  ;;  %2791 = vmatpush3.bf16.msra.mxu0 %v3090_v42 }
 0x33f   : > { %2792 = vmatprep.subr.bf16.mxu0 %v3508_v4 }
 0x340   : > { %v548_v35 = vadd.f32 %v547_v33, %v546_v30  ;;  %v3091_v30 = vld [vmem:[#allocation10 + $0xf8] sm:$0xff]  }
 0x342   : > { %v549_v2 = vmul.f32 0.06666667, %v548_v35  ;;  %2793 = vmatpush3.bf16.msra.mxu0 %v3092_v46 }
 0x343   : > { %2794 = vmatprep.subr.bf16.mxu0 %v3508_v4 }
 0x344   : > { %v550_v37 = vadd.f32 1e-05, %v549_v2 }
 0x346   : > { %2795 = vmatpush3.bf16.msra.mxu0 %v3093_v47 }
 0x347   : > { %2826 = vmatprep.subr.bf16.mxu0 %v3508_v4 }
 0x403   : > { %v1086_v51 = vpop.f32.mrb[12].mxu1 }
 0x404   : > { %v2778_v52 = vpop.f32.mrb[13].mxu1  ;;  %v1094_v53 = vsel %vm1093_vm2, %v1086_v51, -inf }
 0x405   : > { %1095 = vmax.xlane.f32.xlu0 %v1094_v53  ;;  %v1089_v54 = vpop.f32.mrb[14].mxu1 }
 0x406   : > { %v2779_v55 = vpop.f32.mrb[15].mxu1  ;;  %v1097_v56 = vsel %vm1093_vm2, %v1089_v54, -inf }
 0x407   : > { %1098 = vmax.xlane.f32.xlu1 %v1097_v56 }
 0x492   : > { %v1096_v60 = vpop.xlane.xlu0 %1095 }
 0x493   : > { %v1100_v62 = vsub.f32 %v1086_v51, %v1096_v60  ;;  %v558_v51 = vadd.f32 %v557_v45, %v556_v50 }
 0x494   : > { %v1099_v63 = vpop.xlane.xlu1 %1098 }
 0x495   : > { %v1102_v5 = vmul.f32 1.442695, %v1100_v62  ;;  %v1101_v6 = vsub.f32 %v1089_v54, %v1099_v63  ;;  %v559_v52 = vrot.slane %v558_v51, 1 }
 0x497   : > { %3142 = vpow2.f32 %v1102_v5  ;;  %v1104_v8 = vmul.f32 1.442695, %v1101_v6  ;;  %v560_v53 = vadd.f32 %v559_v52, %v558_v51 }
 0x499   : > { %3144 = vpow2.f32 %v1104_v8  ;;  %v561_v54 = vmul.f32 0.0625, %v560_v53 }
 0x49a   : > { %3146 = vrsqrt.f32 %v550_v37 }
 0x49b   : > { %v562_v55 = vsub.f32 %v3936_v0, %v561_v54  ;;  %v563_v56 = vsub.f32 %v3938_v1, %v561_v54 }
 0x49d   : > { %v564_v57 = vmul.f32 %v562_v55, %v562_v55  ;;  %v565_v58 = vmul.f32 %v563_v56, %v563_v56 }
 0x49f   : > { %v566_v59 = vadd.f32 %v565_v58, %v564_v57 }
 0x4a1   : > { %v4043_v11 = vpop.eup %3142  ;;  %v567_v60 = vrot.slane %v566_v59, 4 }
 0x4a2   : > { %v1106_v12 = vsel %vm1093_vm2, %v4043_v11, 0.0 }
 0x4a3   : > { %v4047_v13 = vpop.eup %3144  ;;  %1107 = vadd.xlane.f32.xlu0 %v1106_v12  ;;  %v568_v62 = vadd.f32 %v567_v60, %v566_v59  ;;  %v3078_v12 = vld [vmem:[#allocation10 + $0xc0] sm:$0xff]  }
 0x4a4   : > { %v1109_v15 = vsel %vm1093_vm2, %v4047_v13, 0.0  ;;  %v3147_v44 = vpop.eup %3146 }
 0x4a5   : > { %1110 = vadd.xlane.f32.xlu1 %v1109_v15  ;;  %v4060_v38 = vmul.f32 %v3147_v44, %v539_v17  ;;  %v4063_v43 = vmul.f32 %v3147_v44, %v538_v16  ;;  %v569_v5 = vrot.slane %v568_v62, 2  ;;  %v3079_v15 = vld [vmem:[#allocation10 + $0xc8] sm:$0xff]   ;;  %v3081_v17 = vld [vmem:[#allocation10 + $0xd0] sm:$0xff]  }
 0x4a7   : > { %v1235_v48 = vpack.c.bf16 %v4060_v38, %v4063_v43  ;;  %v570_v6 = vadd.f32 %v569_v5, %v568_v62 }
 0x4a9   : > { %2797 = vmatmul.mubr.bf16.vlgmr.msra.gmra.mrb[4].mxu0 %v1235_v48  ;;  %v571_v9 = vrot.slane %v570_v6, 1 }
 0x4aa   : > { %2842 = vmatprep.mubr.msk.bf16.mxu0 %vm3509_vm0, %v3508_v4 }
 0x4ab   : > { %v572_v14 = vadd.f32 %v571_v9, %v570_v6 }
 0x4ad   : > { %v573_v16 = vmul.f32 0.06666667, %v572_v14 }
 0x530   : > { %v1108_v61 = vpop.xlane.xlu0 %1107 }
 0x531   : > { %3148 = vrcp.f32 %v1108_v61 }
 0x532   : > { %v1111_v63 = vpop.xlane.xlu1 %1110 }
 0x533   : > { %3150 = vrcp.f32 %v1111_v63 }
 0x53b   : > { %v3149_v7 = vpop.eup %3148 }
 0x53c   : > { %v1114_v10 = vmul.f32 %v3149_v7, %v4043_v11  ;;  %v574_v11 = vadd.f32 1e-05, %v573_v16 }
 0x53d   : > { %v3151_v8 = vpop.eup %3150 }
 0x53e   : > { %v1115_v0 = vmul.f32 %v3151_v8, %v4047_v13  ;;  %v3083_v13 = vld [vmem:[#allocation10 + $0xd8] sm:$0xff]   ;;  %3152 = vrsqrt.f32 %v574_v11 }
 0x540   : > { %v1120_v1 = vpack.c.bf16 %v1115_v0, %v1114_v10 }
 0x542   : > { %2515 = vmatmul.mubr.msk.bf16.vlgmr.msra.gmra.mrb[16].mxu1 %vm1093_vm2, %v1120_v1 }
 0x543   : > { %2801 = vmatpush3.bf16.msra.mxu1 %v3078_v12  ;;  %2816 = vmatprep.mubr.msk.bf16.mxu1 %vm3509_vm0, %v3508_v4 }
 0x544   : > { %2802 = vmatprep.subr.bf16.mxu1 %v3508_v4 }
 0x547   : > { %2803 = vmatpush3.bf16.msra.mxu1 %v3079_v15 }
 0x548   : > { %2804 = vmatprep.subr.bf16.mxu1 %v3508_v4  ;;  %v3153_v20 = vpop.eup %3152 }
 0x549   : > { %v576_v24 = vmul.f32 %v3153_v20, %v562_v55  ;;  %v577_v27 = vmul.f32 %v3153_v20, %v563_v56 }
 0x54b   : > { %2805 = vmatpush3.bf16.msra.mxu1 %v3081_v17  ;;  %v1325_v33 = vpack.c.bf16 %v577_v27, %v576_v24 }
 0x54c   : > { %2806 = vmatprep.subr.bf16.mxu1 %v3508_v4 }
 0x54f   : > { %2807 = vmatpush3.bf16.msra.mxu1 %v3083_v13 }
 0x550   : > { %2808 = vmatprep.subr.bf16.mxu1 %v3508_v4 }
 0x553   : > { %2809 = vmatpush3.bf16.msra.mxu1 %v3085_v18 }
 0x554   : > { %2810 = vmatprep.subr.bf16.mxu1 %v3508_v4 }
 0x557   : > { %2811 = vmatpush3.bf16.msra.mxu1 %v3087_v19 }
 0x558   : > { %2812 = vmatprep.subr.bf16.mxu1 %v3508_v4 }
 0x55b   : > { %2813 = vmatpush3.bf16.msra.mxu1 %v3089_v21 }
 0x55c   : > { %2814 = vmatprep.subr.bf16.mxu1 %v3508_v4 }
 0x55f   : > { %2815 = vmatpush3.bf16.msra.mxu1 %v3091_v30 }
 0x560   : > { %2820 = vmatprep.subr.bf16.mxu1 %v3508_v4 }
 0x562   : > { %2817 = vmatmul.mubr.bf16.vlgmr.msra.gmra.mrb[20].mxu1 %v1325_v33 }
 0x563   : > { %2822 = vmatprep.mubr.msk.bf16.mxu1 %vm3509_vm0, %v3508_v4 }
 0x57c   : > { %v1318_v34 = vpop.f32.mrb[4].mxu0 }
 0x57d   : > { %v2798_v35 = vpop.f32.mrb[5].mxu0 }
 0x57e   : > { %v1321_v36 = vpop.f32.mrb[6].mxu0 }
 0x57f   : > { %v1415_v2 = vpack.c.bf16 %v1321_v36, %v1318_v34  ;;  %v2799_v3 = vpop.f32.mrb[7].mxu0 }
 0x615   : > { %v1158_v37 = vpop.f32.mrb[16].mxu1 }
 0x616   : > { %v1167_v40 = vmul.f32 %v1158_v37, %v1158_v37  ;;  %v1160_v41 = vpop.f32.mrb[17].mxu1 }
 0x617   : > { %v1162_v42 = vpop.f32.mrb[18].mxu1 }
 0x618   : > { %v1169_v44 = vsub.f32 %v1160_v41, %v1167_v40  ;;  %v1168_v46 = vmul.f32 %v1162_v42, %v1162_v42  ;;  %v1173_v47 = vadd.f32 %v1162_v42, %v1158_v37  ;;  %v1164_v48 = vpop.f32.mrb[19].mxu1  ;;  %v3094_v42 = vld [vmem:[#allocation13] sm:$0xff]  }
 0x61a   : > { %v1170_v49 = vsub.f32 %v1164_v48, %v1168_v46  ;;  %v1171_v39 = vmax.f32 %v1169_v44, 0.0  ;;  %v1174_v54 = vrot.slane %v1173_v47, 4  ;;  %v3095_v46 = vld [vmem:[#allocation13 + $0x8] sm:$0xff]   ;;  %v3097_v48 = vld [vmem:[#allocation13 + $0x18] sm:$0xff]  }
 0x61c   : > { %v1172_v50 = vmax.f32 %v1170_v49, 0.0  ;;  %v1175_v57 = vadd.f32 %v1174_v54, %v1173_v47  ;;  %v3096_v47 = vld [vmem:[#allocation13 + $0x10] sm:$0xff]   ;;  %v3098_v49 = vld [vmem:[#allocation13 + $0x20] sm:$0xff]   ;;  %v3105_v54 = vld [vmem:[#allocation13 + $0x58] sm:$0xff]  }
 0x61e   : > { %v1182_v45 = vadd.f32 %v1172_v50, %v1171_v39  ;;  %v1176_v60 = vrot.slane %v1175_v57, 2  ;;  %v3099_v39 = vld [vmem:[#allocation13 + $0x28] sm:$0xff]   ;;  %v3100_v50 = vld [vmem:[#allocation13 + $0x30] sm:$0xff]  }
 0x620   : > { %v1183_v51 = vrot.slane %v1182_v45, 4  ;;  %v1177_v61 = vadd.f32 %v1176_v60, %v1175_v57  ;;  %v3108_v57 = vld [vmem:[#allocation13 + $0x70] sm:$0xff]  }
 0x622   : > { %v1184_v52 = vadd.f32 %v1183_v51, %v1182_v45  ;;  %v1178_v62 = vrot.slane %v1177_v61, 1  ;;  %v3101_v45 = vld [vmem:[#allocation13 + $0x38] sm:$0xff]   ;;  %v3102_v51 = vld [vmem:[#allocation13 + $0x40] sm:$0xff]  }
 0x623   : > { %2827 = vmatpush3.bf16.msra.mxu0 %v3102_v51 }
 0x624   : > { %v1185_v53 = vrot.slane %v1184_v52, 2  ;;  %v1179_v10 = vadd.f32 %v1178_v62, %v1177_v61  ;;  %2828 = vmatprep.subr.bf16.mxu0 %v3508_v4 }
 0x626   : > { %v1186_v55 = vadd.f32 %v1185_v53, %v1184_v52  ;;  %v1181_v15 = vmul.f32 0.0625, %v1179_v10  ;;  %v3103_v52 = vld [vmem:[#allocation13 + $0x48] sm:$0xff]   ;;  %v3104_v53 = vld [vmem:[#allocation13 + $0x50] sm:$0xff]  }
 0x627   : > { %2829 = vmatpush3.bf16.msra.mxu0 %v3103_v52 }
 0x628   : > { %v1187_v56 = vrot.slane %v1186_v55, 1  ;;  %2830 = vmatprep.subr.bf16.mxu0 %v3508_v4 }
 0x62a   : > { %v1188_v58 = vadd.f32 %v1187_v56, %v1186_v55  ;;  %v3106_v55 = vld [vmem:[#allocation13 + $0x60] sm:$0xff]   ;;  %v3107_v56 = vld [vmem:[#allocation13 + $0x68] sm:$0xff]  }
 0x62b   : > { %2831 = vmatpush3.bf16.msra.mxu0 %v3104_v53 }
 0x62c   : > { %v1189_v59 = vmul.f32 0.0625, %v1188_v58  ;;  %2832 = vmatprep.subr.bf16.mxu0 %v3508_v4  ;;  %v3109_v58 = vld [vmem:[#allocation13 + $0x78] sm:$0xff]  }
 0x62e   : > { %3154 = vrsqrt.f32 %v1189_v59  ;;  %vm1192_vm3 = vcmp.eq.f32.partialorder %v1189_v59, inf  ;;  %v1195_v12 = vand.u32 2147483648, %v1189_v59  ;;  %vm1194_vm4 = vcmp.eq.f32.partialorder %v1189_v59, 0.0 }
 0x62f   : > { %2833 = vmatpush3.bf16.msra.mxu0 %v3105_v54 }
 0x630   : > { %2834 = vmatprep.subr.bf16.mxu0 %v3508_v4 }
 0x633   : > { %2835 = vmatpush3.bf16.msra.mxu0 %v3106_v55 }
 0x634   : > { %2836 = vmatprep.subr.bf16.mxu0 %v3508_v4 }
 0x635   : > { %v1408_v63 = vpop.f32.mrb[20].mxu1 }
 0x636   : > { %v2818_v5 = vpop.f32.mrb[21].mxu1 }
 0x637   : > { %v1411_v6 = vpop.f32.mrb[22].mxu1  ;;  %2837 = vmatpush3.bf16.msra.mxu0 %v3107_v56 }
 0x638   : > { %v3155_v7 = vpop.eup %3154  ;;  %v1416_v8 = vpack.c.bf16 %v1411_v6, %v1408_v63  ;;  %v2819_v9 = vpop.f32.mrb[23].mxu1  ;;  %2838 = vmatprep.subr.bf16.mxu0 %v3508_v4 }
 0x639   : > { %v1191_v0 = vmul.f32 %v3155_v7, %v1189_v59 }
 0x63a   : > { %2821 = vmatpush3.bf16.xpose.msra.mxu1 %v1416_v8 }
 0x63b   : > { %1488 = vmatprep.subr.bf16.mxu1 %v1483_v32  ;;  %v1193_v1 = vsel %vm1192_vm3, %v1189_v59, %v1191_v0  ;;  %2839 = vmatpush3.bf16.msra.mxu0 %v3108_v57 }
 0x63c   : > { %v1196_v14 = vsel %vm1194_vm4, %v1195_v12, %v1193_v1  ;;  %2840 = vmatprep.subr.bf16.mxu0 %v3508_v4 }
 0x63d   : > { %v1197_v16 = vmul.f32 %v1196_v14, %v4063_v43  ;;  %v1198_v17 = vmul.f32 %v1196_v14, %v4060_v38 }
 0x63f   : > { %v4094_v11 = vadd.f32 %v1197_v16, %v1181_v15  ;;  %v1200_v13 = vadd.f32 %v1198_v17, %v1181_v15  ;;  %2841 = vmatpush3.bf16.msra.mxu0 %v3109_v58 }
 0x640   : > { %2866 = vmatprep.subr.bf16.mxu0 %v3508_v4 }
 0x641   : > { %2823 = vmatmul.mubr.bf16.vlgmr.msra.gmra.mrb[24].mxu1 %v1415_v2  ;;  %v1565_v18 = vpack.c.bf16 %v1200_v13, %v4094_v11 }
 0x642   : > { %1489 = vmatpush1.bf16.msra.mxu1 %v1480_v28  ;;  %1520 = vmatprep.mubr.bf16.mxu1 %v3510_v31 }
 0x643   : > { %2846 = vmatprep.subr.bf16.mxu1 %v3508_v4 }
 0x714   : > { %v1451_v23 = vpop.f32.mrb[24].mxu1 }
 0x715   : > { %v2824_v29 = vpop.f32.mrb[25].mxu1  ;;  %v1458_v32 = vsel %vm1093_vm2, %v1451_v23, -inf }
 0x716   : > { %1459 = vmax.xlane.f32.xlu0 %v1458_v32  ;;  %v1454_v19 = vpop.f32.mrb[26].mxu1 }
 0x717   : > { %v2825_v20 = vpop.f32.mrb[27].mxu1  ;;  %v1461_v21 = vsel %vm1093_vm2, %v1454_v19, -inf }
 0x718   : > { %1462 = vmax.xlane.f32.xlu1 %v1461_v21 }
 0x7a3   : > { %v1460_v24 = vpop.xlane.xlu0 %1459 }
 0x7a4   : > { %v1464_v27 = vsub.f32 %v1451_v23, %v1460_v24 }
 0x7a5   : > { %v1463_v30 = vpop.xlane.xlu1 %1462 }
 0x7a6   : > { %v1466_v33 = vmul.f32 1.442695, %v1464_v27  ;;  %v1465_v22 = vsub.f32 %v1454_v19, %v1463_v30 }
 0x7a8   : > { %3156 = vpow2.f32 %v1466_v33  ;;  %v1468_v26 = vmul.f32 1.442695, %v1465_v22 }
 0x7aa   : > { %3158 = vpow2.f32 %v1468_v26 }
 0x7b2   : > { %v3157_v28 = vpop.eup %3156 }
 0x7b3   : > { %v1470_v31 = vsel %vm1093_vm2, %v3157_v28, 0.0 }
 0x7b4   : > { %v3159_v34 = vpop.eup %3158  ;;  %1471 = vadd.xlane.f32.xlu0 %v1470_v31 }
 0x7b5   : > { %v1473_v35 = vsel %vm1093_vm2, %v3159_v34, 0.0 }
 0x7b6   : > { %1474 = vadd.xlane.f32.xlu1 %v1473_v35 }
 0x841   : > { %v1472_v36 = vpop.xlane.xlu0 %1471 }
 0x842   : > { %3160 = vrcp.f32 %v1472_v36 }
 0x843   : > { %v1475_v2 = vpop.xlane.xlu1 %1474 }
 0x844   : > { %3162 = vrcp.f32 %v1475_v2 }
 0x84c   : > { %v3161_v3 = vpop.eup %3160 }
 0x84d   : > { %v1478_v40 = vmul.f32 %v3161_v3, %v3157_v28  ;;  %v3110_v3 = vld [vmem:[#allocation14 + $0x40] sm:$0xff]  }
 0x84e   : > { %v3163_v37 = vpop.eup %3162 }
 0x84f   : > { %v1479_v41 = vmul.f32 %v3163_v37, %v3159_v34 }
 0x851   : > { %v1484_v44 = vpack.c.bf16 %v1479_v41, %v1478_v40  ;;  %v3111_v40 = vld [vmem:[#allocation14 + $0x48] sm:$0xff]   ;;  %v3112_v41 = vld [vmem:[#allocation14 + $0x50] sm:$0xff]  }
 0x853   : > { %2532 = vmatmul.mubr.msk.bf16.vlgmr.msra.gmra.mrb[28].mxu1 %vm1093_vm2, %v1484_v44  ;;  %v3116_v44 = vld [vmem:[#allocation14 + $0x70] sm:$0xff]  }
 0x854   : > { %2847 = vmatpush3.bf16.msra.mxu1 %v3094_v42  ;;  %2862 = vmatprep.mubr.msk.bf16.mxu1 %vm3509_vm0, %v3508_v4  ;;  %v3115_v42 = vld [vmem:[#allocation14 + $0x68] sm:$0xff]  }
 0x855   : > { %2848 = vmatprep.subr.bf16.mxu1 %v3508_v4 }
 0x858   : > { %2849 = vmatpush3.bf16.msra.mxu1 %v3095_v46  ;;  %v3117_v46 = vld [vmem:[#allocation14 + $0x78] sm:$0xff]  }
 0x859   : > { %2850 = vmatprep.subr.bf16.mxu1 %v3508_v4 }
 0x85c   : > { %2851 = vmatpush3.bf16.msra.mxu1 %v3096_v47  ;;  %v4137_v47 = vshrl.u32 %v525_v25, 7 }
 0x85d   : > { %2852 = vmatprep.subr.bf16.mxu1 %v3508_v4 }
 0x85e   : > { %v1779_v54 = vsub.s32 0, %v4137_v47  ;;  %vm1814_vm7 = vcmp.lt.s32.totalorder %v4137_v47, 1  ;;  %vm1827_vm8 = vcmp.lt.s32.totalorder %v4137_v47, 7 }
 0x860   : > { %2853 = vmatpush3.bf16.msra.mxu1 %v3097_v48  ;;  %v2205_v48 = vsub.s32 4, %v4137_v47 }
 0x861   : > { %2854 = vmatprep.subr.bf16.mxu1 %v3508_v4 }
 0x864   : > { %2855 = vmatpush3.bf16.msra.mxu1 %v3098_v49  ;;  %v2173_v49 = vsub.s32 3, %v4137_v47 }
 0x865   : > { %2856 = vmatprep.subr.bf16.mxu1 %v3508_v4 }
 0x868   : > { %2857 = vmatpush3.bf16.msra.mxu1 %v3099_v39  ;;  %v4144_v39 = vld [vmem:[%s4332_s26] sm:$0x1f] }
 0x869   : > { %2858 = vmatprep.subr.bf16.mxu1 %v3508_v4  ;;  %v2206_v51 = vrot.slane %v4144_v39, %v2205_v48  ;;  %v2174_v52 = vrot.slane %v4144_v39, %v2173_v49  ;;  %v1780_v55 = vrot.slane %v4144_v39, %v1779_v54 }
 0x86c   : > { %2859 = vmatpush3.bf16.msra.mxu1 %v3100_v50  ;;  %v4147_v50 = vld [vmem:[%s3918_s11] sm:$0xff] }
 0x86d   : > { %2860 = vmatprep.subr.bf16.mxu1 %v3508_v4  ;;  %v2207_v25 = vmul.f32 %v2206_v51, %v4147_v50 }
 0x86f   : > { %2208 = vadd.xlane.f32.xlu0 %v2207_v25 }
 0x870   : > { %2861 = vmatpush3.bf16.msra.mxu1 %v3101_v45  ;;  %v4150_v45 = vld [vmem:[%s3916_s30] sm:$0xff] }
 0x871   : > { %v2175_v53 = vmul.f32 %v2174_v52, %v4150_v45 }
 0x873   : > { %2863 = vmatmul.mubr.bf16.vlgmr.msra.gmra.mrb[32].mxu1 %v1565_v18  ;;  %2176 = vadd.xlane.f32.xlu1 %v2175_v53 }
 0x926   : > { %v1522_v59 = vpop.f32.mrb[28].mxu1 }
 0x927   : > { %v1531_v60 = vmul.f32 %v1522_v59, %v1522_v59  ;;  %v1524_v61 = vpop.f32.mrb[29].mxu1 }
 0x928   : > { %v1526_v62 = vpop.f32.mrb[30].mxu1 }
 0x929   : > { %v1533_v63 = vsub.f32 %v1524_v61, %v1531_v60  ;;  %v1532_v5 = vmul.f32 %v1526_v62, %v1526_v62  ;;  %v1537_v6 = vadd.f32 %v1526_v62, %v1522_v59  ;;  %v1528_v7 = vpop.f32.mrb[31].mxu1 }
 0x92b   : > { %v1534_v8 = vsub.f32 %v1528_v7, %v1532_v5  ;;  %v1535_v9 = vmax.f32 %v1533_v63, 0.0  ;;  %v1538_v15 = vrot.slane %v1537_v6, 4 }
 0x92d   : > { %v1536_v10 = vmax.f32 %v1534_v8, 0.0  ;;  %v1539_v11 = vadd.f32 %v1538_v15, %v1537_v6  ;;  %v3118_v6 = vld [vmem:[#allocation14] sm:$0xff]   ;;  %v3119_v15 = vld [vmem:[#allocation14 + $0x8] sm:$0xff]  }
 0x92f   : > { %v1545_v0 = vadd.f32 %v1536_v10, %v1535_v9  ;;  %v1540_v23 = vrot.slane %v1539_v11, 2 }
 0x931   : > { %v1546_v12 = vrot.slane %v1545_v0, 4  ;;  %v1541_v29 = vadd.f32 %v1540_v23, %v1539_v11  ;;  %v3120_v11 = vld [vmem:[#allocation14 + $0x10] sm:$0xff]   ;;  %v3123_v23 = vld [vmem:[#allocation14 + $0x28] sm:$0xff]  }
 0x933   : > { %v1547_v1 = vadd.f32 %v1546_v12, %v1545_v0  ;;  %v1542_v32 = vrot.slane %v1541_v29, 1 }
 0x935   : > { %v1548_v14 = vrot.slane %v1547_v1, 2  ;;  %v1543_v30 = vadd.f32 %v1542_v32, %v1541_v29  ;;  %v3124_v29 = vld [vmem:[#allocation14 + $0x30] sm:$0xff]   ;;  %v1790_v32 = vand.u32 15, %v4137_v47 }
 0x937   : > { %v1549_v16 = vadd.f32 %v1548_v14, %v1547_v1  ;;  %v1544_v31 = vmul.f32 0.0625, %v1543_v30  ;;  %vm2589_vm9 = vcmp.ne.s32.totalorder %v1790_v32, 0  ;;  %v3130_v30 = vld [vmem:[#allocation14 + $0xa0] sm:$0xff]  }
 0x938   : > { %vm2566_vm11 = vmpackc.low %vm3511_vm10, %vm2589_vm9 }
 0x939   : > { %v1550_v17 = vrot.slane %v1549_v16, 1 }
 0x93b   : > { %v1551_v13 = vadd.f32 %v1550_v17, %v1549_v16 }
 0x93d   : > { %v1552_v18 = vmul.f32 0.0625, %v1551_v13  ;;  %v3121_v13 = vld [vmem:[#allocation14 + $0x18] sm:$0xff]  }
 0x93f   : > { %3164 = vrsqrt.f32 %v1552_v18  ;;  %vm1555_vm5 = vcmp.eq.f32.partialorder %v1552_v18, inf  ;;  %v1558_v22 = vand.u32 2147483648, %v1552_v18  ;;  %vm1557_vm6 = vcmp.eq.f32.partialorder %v1552_v18, 0.0 }
 0x946   : > { %v1770_v19 = vpop.f32.mrb[32].mxu1 }
 0x947   : > { %v2864_v20 = vpop.f32.mrb[33].mxu1 }
 0x948   : > { %v1773_v21 = vpop.f32.mrb[34].mxu1  ;;  %v3126_v20 = vld [vmem:[#allocation14 + $0x80] sm:$0xff]  }
 0x949   : > { %v3165_v24 = vpop.eup %3164  ;;  %v2865_v27 = vpop.f32.mrb[35].mxu1 }
 0x94a   : > { %v1554_v33 = vmul.f32 %v3165_v24, %v1552_v18  ;;  %v3128_v24 = vld [vmem:[#allocation14 + $0x90] sm:$0xff]   ;;  %v3129_v27 = vld [vmem:[#allocation14 + $0x98] sm:$0xff]  }
 0x94c   : > { %v1556_v26 = vsel %vm1555_vm5, %v1552_v18, %v1554_v33  ;;  %v3122_v18 = vld [vmem:[#allocation14 + $0x20] sm:$0xff]   ;;  %v3131_v33 = vld [vmem:[#allocation14 + $0xa8] sm:$0xff]  }
 0x94d   : > { %v1559_v28 = vsel %vm1557_vm6, %v1558_v22, %v1556_v26  ;;  %v1785_v22 = vadd.s32 8, %v4137_v47  ;;  %v3132_v26 = vld [vmem:[#allocation14 + $0xb0] sm:$0xff]  }
 0x94e   : > { %v1560_v34 = vmul.f32 %v1559_v28, %v4063_v43  ;;  %v1561_v35 = vmul.f32 %v1559_v28, %v4060_v38  ;;  %v3113_v43 = vld [vmem:[#allocation14 + $0x58] sm:$0xff]   ;;  %v3114_v38 = vld [vmem:[#allocation14 + $0x60] sm:$0xff]  }
 0x94f   : > { %v1797_v28 = vand.u32 15, %v1785_v22 }
 0x950   : > { %v1562_v36 = vadd.f32 %v1560_v34, %v1544_v31  ;;  %v1563_v2 = vadd.f32 %v1561_v35, %v1544_v31  ;;  %v3133_v31 = vld [vmem:[#allocation14 + $0xb8] sm:$0xff]   ;;  %v2209_v34 = vpop.xlane.xlu0 %2208  ;;  %v2177_v35 = vpop.xlane.xlu1 %2176 }
 0x951   : > { %vm2590_vm12 = vcmp.ne.s32.totalorder %v1797_v28, 15 }
 0x952   : > { %v1582_v37 = vpack.c.bf16 %v1563_v2, %v1562_v36  ;;  %vm2578_vm13 = vmpackc.low %vm2590_vm12, %vm3511_vm10  ;;  %v2210_v36 = vrot.slane %v2209_v34, 4  ;;  %v2178_v2 = vrot.slane %v2177_v35, 4 }
 0x954   : > { %2843 = vmatmul.mubr.bf16.vlgmr.msra.gmra.mrb[8].mxu0 %v1582_v37  ;;  %v2179_v37 = vmax.f32 %v2177_v35, %v2178_v2 }
 0x955   : > { %2867 = vmatpush3.bf16.msra.mxu0 %v3110_v3  ;;  %2882 = vmatprep.mubr.msk.bf16.mxu0 %vm3509_vm0, %v3508_v4  ;;  %v2211_v3 = vmax.f32 %v2209_v34, %v2210_v36 }
 0x956   : > { %2868 = vmatprep.subr.bf16.mxu0 %v3508_v4 }
 0x959   : > { %2869 = vmatpush3.bf16.msra.mxu0 %v3111_v40  ;;  %v2212_v40 = vrot.slane %v2211_v3, 2 }
 0x95a   : > { %2870 = vmatprep.subr.bf16.mxu0 %v3508_v4 }
 0x95d   : > { %2871 = vmatpush3.bf16.msra.mxu0 %v3112_v41  ;;  %v2180_v41 = vrot.slane %v2179_v37, 2 }
 0x95e   : > { %2872 = vmatprep.subr.bf16.mxu0 %v3508_v4 }
 0x961   : > { %2873 = vmatpush3.bf16.msra.mxu0 %v3113_v43  ;;  %v2213_v43 = vmax.f32 %v2211_v3, %v2212_v40 }
 0x962   : > { %2874 = vmatprep.subr.bf16.mxu0 %v3508_v4 }
 0x965   : > { %2875 = vmatpush3.bf16.msra.mxu0 %v3114_v38  ;;  %v2181_v38 = vmax.f32 %v2179_v37, %v2180_v41 }
 0x966   : > { %2876 = vmatprep.subr.bf16.mxu0 %v3508_v4 }
 0x969   : > { %2877 = vmatpush3.bf16.msra.mxu0 %v3115_v42  ;;  %v2214_v42 = vrot.slane %v2213_v43, 1 }
 0x96a   : > { %2878 = vmatprep.subr.bf16.mxu0 %v3508_v4 }
 0x96d   : > { %2879 = vmatpush3.bf16.msra.mxu0 %v3116_v44  ;;  %v2182_v44 = vrot.slane %v2181_v38, 1 }
 0x96e   : > { %2880 = vmatprep.subr.bf16.mxu0 %v3508_v4 }
 0x96f   : > { %v2183_v48 = vmax.f32 %v2181_v38, %v2182_v44 }
 0x971   : > { %2881 = vmatpush3.bf16.msra.mxu0 %v3117_v46  ;;  %v2215_v46 = vmax.f32 %v2213_v43, %v2214_v42  ;;  %v2184_v49 = vsub.f32 %v2177_v35, %v2183_v48 }
 0x972   : > { %2886 = vmatprep.subr.bf16.mxu0 %v3508_v4 }
 0x973   : > { %v2185_v52 = vmul.f32 1.442695, %v2184_v49 }
 0xa27   : > { %v1681_v56 = vpop.f32.mrb[8].mxu0 }
 0xa28   : > { %v1771_v57 = vadd.f32 %v1770_v19, %v1681_v56  ;;  %v2844_v58 = vpop.f32.mrb[9].mxu0  ;;  %v3125_v19 = vld [vmem:[#allocation14 + $0x38] sm:$0xff]  }
 0xa29   : > { %v1684_v59 = vpop.f32.mrb[10].mxu0 }
 0xa2a   : > { %v1781_v60 = vadd.f32 %v1780_v55, %v1771_v57  ;;  %v1774_v61 = vadd.f32 %v1773_v21, %v1684_v59  ;;  %v2845_v62 = vpop.f32.mrb[11].mxu0  ;;  %v3127_v21 = vld [vmem:[#allocation14 + $0x88] sm:$0xff]   ;;  %v2164_v57 = vsub.s32 2, %v4137_v47 }
 0xa2c   : > { %v1782_v63 = vadd.f32 %v1780_v55, %v1774_v61  ;;  %v1812_v5 = vrot.slane %v1781_v60, 7  ;;  %v1825_v7 = vrot.slane %v1781_v60, 1  ;;  %v2158_v55 = vsub.s32 1, %v4137_v47 }
 0xa2d   : > { %v2165_v61 = vrot.slane %v4144_v39, %v2164_v57 }
 0xa2e   : > { %v1813_v8 = vrot.slane %v1782_v63, 7  ;;  %v1826_v9 = vrot.slane %v1782_v63, 1  ;;  %v1853_v10 = vpack.c.bf16 %v1782_v63, %v1781_v60  ;;  %v2159_v59 = vrot.slane %v4144_v39, %v2158_v55 }
 0xa30   : > { %v1815_v0 = vsel %vm1814_vm7, %v1812_v5, %v1813_v8  ;;  %v1816_v12 = vsel %vm1814_vm7, %v1813_v8, %v1812_v5  ;;  %v4160_v1 = vsel %vm1827_vm8, %v1825_v7, %v1826_v9  ;;  %v1829_v14 = vsel %vm1827_vm8, %v1826_v9, %v1825_v7  ;;  %2883 = vmatmul.mubr.bf16.vlgmr.msra.gmra.mrb[12].mxu0 %v1853_v10 }
 0xa31   : > { %2887 = vmatpush3.bf16.msra.mxu0 %v3118_v6  ;;  %2902 = vmatprep.mubr.msk.bf16.mxu0 %vm3509_vm0, %v3508_v4  ;;  %v2567_v16 = vpack.c.bf16 %v1815_v0, %v1816_v12  ;;  %v2579_v17 = vpack.c.bf16 %v1829_v14, %v4160_v1 }
 0xa32   : > { %2888 = vmatprep.subr.bf16.mxu0 %v3508_v4 }
 0xa35   : > { %2889 = vmatpush3.bf16.msra.mxu0 %v3119_v15 }
 0xa36   : > { %2890 = vmatprep.subr.bf16.mxu0 %v3508_v4 }
 0xa39   : > { %2891 = vmatpush3.bf16.msra.mxu0 %v3120_v11 }
 0xa3a   : > { %2892 = vmatprep.subr.bf16.mxu0 %v3508_v4 }
 0xa3d   : > { %2893 = vmatpush3.bf16.msra.mxu0 %v3121_v13 }
 0xa3e   : > { %2894 = vmatprep.subr.bf16.mxu0 %v3508_v4 }
 0xa41   : > { %2895 = vmatpush3.bf16.msra.mxu0 %v3122_v18 }
 0xa42   : > { %2896 = vmatprep.subr.bf16.mxu0 %v3508_v4 }
 0xa45   : > { %2897 = vmatpush3.bf16.msra.mxu0 %v3123_v23 }
 0xa46   : > { %2898 = vmatprep.subr.bf16.mxu0 %v3508_v4 }
 0xa49   : > { %2899 = vmatpush3.bf16.msra.mxu0 %v3124_v29 }
 0xa4a   : > { %2900 = vmatprep.subr.bf16.mxu0 %v3508_v4 }
 0xa4d   : > { %2901 = vmatpush3.bf16.msra.mxu0 %v3125_v19 }
 0xa4e   : > { %2906 = vmatprep.subr.bf16.mxu0 %v3508_v4 }
 0xa50   : > { %2903 = vmatmul.mubr.msk.bf16.vlgmr.msra.gmra.mrb[12].mxu0 %vm2566_vm11, %v2567_v16 }
 0xa51   : > { %2907 = vmatpush3.bf16.msra.mxu0 %v3126_v20  ;;  %2922 = vmatprep.mubr.msk.bf16.mxu0 %vm3509_vm0, %v3508_v4 }
 0xa52   : > { %2908 = vmatprep.subr.bf16.mxu0 %v3508_v4 }
 0xa55   : > { %2909 = vmatpush3.bf16.msra.mxu0 %v3127_v21 }
 0xa56   : > { %2910 = vmatprep.subr.bf16.mxu0 %v3508_v4 }
 0xa59   : > { %2911 = vmatpush3.bf16.msra.mxu0 %v3128_v24 }
 0xa5a   : > { %2912 = vmatprep.subr.bf16.mxu0 %v3508_v4 }
 0xa5d   : > { %2913 = vmatpush3.bf16.msra.mxu0 %v3129_v27 }
 0xa5e   : > { %2914 = vmatprep.subr.bf16.mxu0 %v3508_v4 }
 0xa61   : > { %2915 = vmatpush3.bf16.msra.mxu0 %v3130_v30 }
 0xa62   : > { %2916 = vmatprep.subr.bf16.mxu0 %v3508_v4 }
 0xa65   : > { %2917 = vmatpush3.bf16.msra.mxu0 %v3131_v33 }
 0xa66   : > { %2918 = vmatprep.subr.bf16.mxu0 %v3508_v4 }
 0xa69   : > { %2919 = vmatpush3.bf16.msra.mxu0 %v3132_v26 }
 0xa6a   : > { %2920 = vmatprep.subr.bf16.mxu0 %v3508_v4  ;;  %v2216_v4 = vsub.f32 %v2209_v34, %v2215_v46 }
 0xa6c   : > { %v2217_v51 = vmul.f32 1.442695, %v2216_v4 }
 0xa6d   : > { %2921 = vmatpush3.bf16.msra.mxu0 %v3133_v31 }
 0xa6e   : > { %3166 = vpow2.f32 %v2217_v51 }
 0xa6f   : > { %3168 = vpow2.f32 %v2185_v52 }
 0xa70   : > { %2923 = vmatmul.mubr.msk.bf16.vlgmr.msra.gmra.mrb[12].mxu0 %vm2578_vm13, %v2579_v17 }
 0xa78   : > { %v3167_v25 = vpop.eup %3166 }
 0xa79   : > { %v3169_v53 = vpop.eup %3168  ;;  %v2219_v54 = vrot.slane %v3167_v25, 4 }
 0xa7a   : > { %v2187_v56 = vrot.slane %v3169_v53, 4 }
 0xa7b   : > { %v2220_v58 = vadd.f32 %v3167_v25, %v2219_v54 }
 0xa7c   : > { %v2188_v60 = vadd.f32 %v3169_v53, %v2187_v56 }
 0xa7d   : > { %v2221_v63 = vrot.slane %v2220_v58, 2 }
 0xa7e   : > { %v2189_v8 = vrot.slane %v2188_v60, 2 }
 0xa7f   : > { %v2222_v12 = vadd.f32 %v2221_v63, %v2220_v58 }
 0xa80   : > { %v2190_v14 = vadd.f32 %v2189_v8, %v2188_v60 }
 0xa81   : > { %v2223_v16 = vrot.slane %v2222_v12, 1 }
 0xa82   : > { %v2191_v11 = vrot.slane %v2190_v14, 1 }
 0xa83   : > { %v2224_v18 = vadd.f32 %v2223_v16, %v2222_v12 }
 0xa84   : > { %v2192_v23 = vadd.f32 %v2191_v11, %v2190_v14 }
 0xa85   : > { %3170 = vrcp.f32 %v2224_v18 }
 0xa86   : > { %3172 = vrcp.f32 %v2192_v23 }
 0xa8f   : > { %v3171_v30 = vpop.eup %3170 }
 0xa90   : > { %v3173_v26 = vpop.eup %3172  ;;  %v2226_v31 = vmul.f32 %v3171_v30, %v3167_v25 }
 0xa91   : > { %v2194_v35 = vmul.f32 %v3173_v26, %v3169_v53 }
 0xa92   : > { %v2227_v2 = vmul.f32 %v2226_v31, %v4147_v50 }
 0xa93   : > { %v2195_v37 = vmul.f32 %v2194_v35, %v4150_v45 }
 0xa94   : > { %v2228_v41 = vrot.slane %v2227_v2, 4 }
 0xa95   : > { %v2196_v38 = vrot.slane %v2195_v37, 4 }
 0xa96   : > { %v2229_v44 = vadd.f32 %v2228_v41, %v2227_v2 }
 0xa97   : > { %v2197_v48 = vadd.f32 %v2196_v38, %v2195_v37 }
 0xa98   : > { %v2230_v49 = vrot.slane %v2229_v44, 2 }
 0xa99   : > { %v2198_v51 = vrot.slane %v2197_v48, 2 }
 0xa9a   : > { %v2231_v52 = vadd.f32 %v2230_v49, %v2229_v44 }
 0xa9b   : > { %v2199_v25 = vadd.f32 %v2198_v51, %v2197_v48 }
 0xa9c   : > { %v2232_v50 = vrot.slane %v2231_v52, 1 }
 0xa9d   : > { %v2200_v53 = vrot.slane %v2199_v25, 1 }
 0xa9e   : > { %v2233_v45 = vadd.f32 %v2232_v50, %v2231_v52 }
 0xa9f   : > { %v2201_v57 = vadd.f32 %v2200_v53, %v2199_v25 }
 0xb43   : > { %v2147_v62 = vpop.f32.mrb[12].mxu0 }
 0xb44   : > { %v2160_v5 = vmul.f32 %v2159_v59, %v2147_v62  ;;  %v2924_v6 = vpop.f32.mrb[13].mxu0 }
 0xb45   : > { %v2150_v7 = vpop.f32.mrb[14].mxu0 }
 0xb46   : > { %v2166_v9 = vadd.f32 %v2165_v61, %v2160_v5  ;;  %v2161_v10 = vmul.f32 %v2159_v59, %v2150_v7  ;;  %v2925_v0 = vpop.f32.mrb[15].mxu0 }
 0xb48   : > { %v2167_v1 = vadd.f32 %v2165_v61, %v2161_v10  ;;  %v2168_v15 = vmax.f32 %v2166_v9, 0.0 }
 0xb4a   : > { %v2169_v47 = vmax.f32 %v2167_v1, 0.0 }
 0xb4c   : > { %v2234_v17 = vadd.f32 %v2169_v47, %v2168_v15 }
 0xb4e   : > { %v2235_v13 = vrot.slane %v2234_v17, 4 }
 0xb50   : > { %v2236_v39 = vadd.f32 %v2235_v13, %v2234_v17 }
 0xb52   : > { %v2237_v29 = vrot.slane %v2236_v39, 2 }
 0xb54   : > { %v2238_v32 = vadd.f32 %v2237_v29, %v2236_v39 }
 0xb56   : > { %v2239_v19 = vrot.slane %v2238_v32, 1 }
 0xb58   : > { %v2240_v20 = vadd.f32 %v2239_v19, %v2238_v32 }
 0xb5a   : > { %v2241_v21 = vmul.f32 0.0625, %v2240_v20 }
 0xb5c   : > { %v2242_v24 = vsub.f32 %v2168_v15, %v2241_v21  ;;  %v2243_v27 = vsub.f32 %v2169_v47, %v2241_v21 }
 0xb5e   : > { %v2244_v33 = vmul.f32 %v2242_v24, %v2242_v24  ;;  %v2245_v22 = vmul.f32 %v2243_v27, %v2243_v27 }
 0xb60   : > { %v2246_v28 = vadd.f32 %v2245_v22, %v2244_v33 }
 0xb62   : > { %v2247_v34 = vrot.slane %v2246_v28, 4 }
 0xb64   : > { %v2248_v36 = vadd.f32 %v2247_v34, %v2246_v28 }
 0xb66   : > { %v2249_v3 = vrot.slane %v2248_v36, 2 }
 0xb68   : > { %v2250_v40 = vadd.f32 %v2249_v3, %v2248_v36 }
 0xb6a   : > { %v2251_v43 = vrot.slane %v2250_v40, 1 }
 0xb6c   : > { %v2252_v42 = vadd.f32 %v2251_v43, %v2250_v40 }
 0xb6e   : > { %v2253_v46 = vmul.f32 0.06666667, %v2252_v42 }
 0xb70   : > { %v2254_v4 = vadd.f32 1e-05, %v2253_v46 }
 0xb72   : > { %3174 = vrsqrt.f32 %v2254_v4 }
 0xb7c   : > { %v3175_v54 = vpop.eup %3174 }
 0xb7d   : > { %v2256_v55 = vmul.f32 %v3175_v54, %v2242_v24  ;;  %v2257_v56 = vmul.f32 %v3175_v54, %v2243_v27 }
 0xb7f   : > { %v2258_v58 = vmul.f32 %v2256_v55, %v2233_v45  ;;  %v2259_v59 = vmul.f32 %v2257_v56, %v2233_v45 }
 0xb81   : > { %v2260_v60 = vadd.f32 %v2258_v58, %v2201_v57  ;;  %v2261_v61 = vadd.f32 %v2259_v59, %v2201_v57 }
 0xb83   : > { %2262 = vst [vmem:[%s519_s4] sm:$0xff] %v2260_v60  ;;  %2263 = vst [vmem:[%s519_s4 + $0x8] sm:$0xff] %v2261_v61 }
 0xb84   : > { %3421 = shalt.err (!%p3418_p8)
}
 0xb85   : > { %s3422_s17 = scalar_lea.hbm %s4197_s9, 256  ;;  %s3426_s16 = scalar_lea.hbm %s4334_s29, 512 }
 0xb86   : > { %p3423_p12 = scmp.ne.s32.totalorder %s4197_s9, %s3422_s17  ;;  %p3427_p4 = scmp.lt.u32.totalorder %s4197_s9, %s4334_s29 }
 0xb87   : > { %p3428_p11 = scmp.lt.u32.totalorder %s3426_s16, %s3422_s17  ;;  %p3430_p9 = scmp.lt.u32.totalorder %s3422_s17, %s4197_s9 }
 0xb88   : > { %p3424_p5 = pnand %p3423_p12, %p4335_p7 }
 0xb89   : > { %p3429_p13 = por %p3428_p11, %p3427_p4 }
 0xb8a   : > { %p3425_p2 = pneg %p3424_p5 }
 0xb8b   : > { %p3431_p0 = por %p3430_p9, %p3429_p13 }
 0xb8d   : > { %p3432_p10 = pnand %p3431_p0, %p3425_p2 }
 0xb8f   : > { %3435 = shalt.err (!%p3432_p10)
}
 0xb90   : > { %s3513_s11 = smov 128   ;;  %s3514_s15 = smov 8  }
 0xb91   : > { %2958 = dma.vmem_to_hbm [thread:$0]  (%p4335_p7), %s4199_s24, 256, %s4197_s9, %s2265_s8, %s3513_s11, %s3513_s11, %s3514_s15  }
 0xb92 PF: > { %s4336_s19 = sld [smem:[#allocation24_spill]]  ;;  %s4337_s26 = sld [smem:[#allocation27_spill]] }
 0xb93   : > { %p4339_p6 = scmp.ge.s32.totalorder %s3494_s12, 2 }
 0xb98   : > { %s2293_s23 = sand.u32 1, %s4336_s19   ;;  %p4338_p3 = scmp.ne.s32.totalorder %s4337_s26, 0 }
 0xb99   : > { %s2294_s4 = scalar_lea.sflag [#allocation4], %s2293_s23 }
 0xb9a   : > { %p2987_p1 = pnand %p4339_p6, %p4338_p3 }
 0xb9c   : > { %3477 = dma.done.wait (!%p2987_p1), %s2294_s4, 256  }
 0xb9d   : > { %3479 = vsyncadd (!%p2987_p1), %s2294_s4, 4294967040  ;;  %s4340_s12 = sld [smem:[#allocation28_spill]]  ;;  %s4341_s22 = sld [smem:[#allocation25_spill]] }
 0xb9e   : > { %s4342_s11 = sld [smem:[#allocation29_spill]]  ;;  %s4343_s30 = smov %s3486_s10 }
 0xba3   : > { %p30_p8 = scmp.ge.s32.totalorder %s4340_s12, 4   ;;  %s4344_s10 = smov %s4341_s22 }
 0xba5   :  { %32 = sbr.rel (!%p30_p8) target bundleno = 17 (0x11), region = 157 }
 0xbac   :  { %2299 = vsyncpa [#allocation3], 1 }
 0xbad   :  { %2301 = vsyncpa [#allocation3 + $0x1], 1 }
 0xbae   :  { %2302 = vsyncpa [#allocation6], 1 }
 0xbaf   :  { %2304 = vsyncpa [#allocation6 + $0x1], 1 }
 0xbb0   :  { %2305 = vsyncpa [#allocation9], 1 }
 0xbb1   :  { %2307 = vsyncpa [#allocation9 + $0x1], 1 }
 0xbb2   :  { %2308 = vsyncpa [#allocation12], 1 }
 0xbb3   :  { %2309 = vsyncpa [#allocation15], 1 }
 0xbb4   :  { %2310 = vsyncpa [#allocation4], 1 }
 0xbb5   :  { %2312 = vsyncpa [#allocation4 + $0x1], 1 }

</bundles_post_ra>
